<compile_context>
chip_gen: v5e
topology: v5e:2x2
jax: 0.10.0
libtpu: 0.0.40
codegen_flags: <defaults>
</compile_context>

<pallas_src>
import functools

import jax
import jax.numpy as jnp
from jax.experimental import pallas as pl
from jax.experimental.pallas import tpu as pltpu


def _gat_kernel(x_ref, qw_ref, kw_ref, vw_ref, wo_ref, bo_ref,
                o_ref, concat_ref, *, scale, tile_n, heads, d):
    i = pl.program_id(0)
    row0 = pl.multiple_of(i * tile_n, tile_n)

    x_all = x_ref[...]                               # (N, D) f32, VMEM-resident
    x_tile = x_ref[pl.ds(row0, tile_n), :]           # (tile_n, D) f32 query rows
    x_all_bf = x_all.astype(jnp.bfloat16)
    x_tile_bf = x_tile.astype(jnp.bfloat16)

    # Head-batched projections: one wide bf16 MXU matmul each, f32 accumulate.
    q_all = jnp.dot(x_tile_bf, qw_ref[...],
                    preferred_element_type=jnp.float32).astype(jnp.bfloat16)
    k_all = jnp.dot(x_all_bf, kw_ref[...],
                    preferred_element_type=jnp.float32).astype(jnp.bfloat16)
    v_all = jnp.dot(x_all_bf, vw_ref[...],
                    preferred_element_type=jnp.float32).astype(jnp.bfloat16)

    # Per-head attention; static unrolled loop, all slices 128-lane aligned.
    for h in range(heads):
        sl = slice(h * d, (h + 1) * d)
        q_h = q_all[:, sl]                           # (tile_n, D) bf16
        k_h = k_all[:, sl]                           # (N, D)      bf16
        v_h = v_all[:, sl]                           # (N, D)      bf16

        # scores (tile_n, N): contract feature dim of q and k (no explicit k.T)
        s = jax.lax.dot_general(q_h, k_h, (((1,), (1,)), ((), ())),
                                preferred_element_type=jnp.float32) * scale

        # numerically stable row softmax with deferred normalization (f32 VPU)
        m = jnp.max(s, axis=-1, keepdims=True)
        p = jnp.exp(s - m)
        l = jnp.sum(p, axis=-1, keepdims=True)

        out_h = jnp.dot(p.astype(jnp.bfloat16), v_h,
                        preferred_element_type=jnp.float32)   # (tile_n, D) f32
        out_h = out_h * pl.reciprocal(l, approx=True)         # EUP, ~free slot
        concat_ref[:, sl] = out_h.astype(jnp.bfloat16)

    # Output Linear over the head concat as ONE (tile_n, H*D) @ (H*D, D) matmul,
    # then bias + residual, f32 accumulate, lane-dense (tile_n, D) store.
    out = jnp.dot(concat_ref[...], wo_ref[...],
                  preferred_element_type=jnp.float32)
    o_ref[...] = (out + bo_ref[...] + x_tile).astype(o_ref.dtype)


def gat_forward(x, q_w, k_w, v_w, w_o, b_o, *, tile_n=None):
    """Fused GraphAttentionLayer forward.

    x   : (N, D) float32 node features (D = in_channels = out_channels)
    q_w : (H, D, D) per-head Q weights (torch (in, out) layout)
    k_w : (H, D, D) per-head K weights
    v_w : (H, D, D) per-head V weights (torch V is (in, in); requires in == out)
    w_o : (H*D, D) output Linear weight, transposed vs. torch's (out, in)
    b_o : (D,)     output Linear bias
    """
    N, D = x.shape
    H = q_w.shape[0]
    HD = H * D
    assert q_w.shape == (H, D, D) and k_w.shape == (H, D, D)
    assert v_w.shape == (H, D, D)
    assert w_o.shape == (HD, D) and b_o.shape == (D,)

    if tile_n is None:
        # At least 2 node tiles so the "parallel" axis shards across v7x's two
        # TensorCores; cap the tile so the (tile_n, N) score block stays small.
        tile_n = max(8, min(256, N // 2))
    assert N % tile_n == 0, "pad N to a multiple of tile_n"
    assert tile_n % 8 == 0
    n_tiles = N // tile_n

    # Head-batched weight layouts, bf16 for the MXU (halves weight DMA bytes).
    qw_all = jnp.transpose(q_w, (1, 0, 2)).reshape(D, HD).astype(jnp.bfloat16)
    kw_all = jnp.transpose(k_w, (1, 0, 2)).reshape(D, HD).astype(jnp.bfloat16)
    vw_all = jnp.transpose(v_w, (1, 0, 2)).reshape(D, HD).astype(jnp.bfloat16)
    wo_bf = w_o.astype(jnp.bfloat16)
    bo_2d = b_o.reshape(1, D)
    scale = 1.0 / float(D) ** 0.5

    kernel = functools.partial(_gat_kernel, scale=scale, tile_n=tile_n,
                               heads=H, d=D)

    grid_spec = pltpu.PrefetchScalarGridSpec(
        num_scalar_prefetch=0,
        grid=(n_tiles,),
        in_specs=[
            pl.BlockSpec((N, D), lambda i: (0, 0)),      # x (full, DMA'd once)
            pl.BlockSpec((D, HD), lambda i: (0, 0)),     # Q all heads
            pl.BlockSpec((D, HD), lambda i: (0, 0)),     # K all heads
            pl.BlockSpec((D, HD), lambda i: (0, 0)),     # V all heads
            pl.BlockSpec((HD, D), lambda i: (0, 0)),     # W_o
            pl.BlockSpec((1, D), lambda i: (0, 0)),      # b_o
        ],
        out_specs=pl.BlockSpec((tile_n, D), lambda i: (i, 0)),
        scratch_shapes=[pltpu.VMEM((tile_n, HD), jnp.bfloat16)],
    )

    # VMEM budget: resident x + weights (constant index -> one DMA) plus the
    # per-tile output double-buffer, concat scratch and live intermediates.
    resident = N * D * 4 + (3 * D * HD + HD * D) * 2 + D * 4
    per_tile = (2 * tile_n * D * 4                       # output (dbl-buffered)
                + tile_n * HD * 2                        # concat scratch
                + (tile_n + 2 * N) * HD * 2              # q/k/v_all bf16
                + 2 * tile_n * N * 4)                    # live score/prob tiles
    vmem_limit = int(min(max(2 * (resident + per_tile), 16 * 1024 * 1024),
                         40 * 1024 * 1024))              # < v7x 64 MiB physical

    flops = (2 * N * D * HD                              # q projections
             + n_tiles * 2 * 2 * N * D * HD              # k, v per node tile
             + H * 4 * N * N * D                         # scores + p @ v
             + 2 * N * HD * D)                           # output projection
    bytes_accessed = (N * D * 4                          # x (DMA'd once)
                      + (3 * D * HD + HD * D) * 2 + D * 4  # weights + bias
                      + N * D * 4)                       # output

    return pl.pallas_call(
        kernel,
        out_shape=jax.ShapeDtypeStruct((N, D), jnp.float32),
        grid_spec=grid_spec,
        compiler_params=pltpu.CompilerParams(
            dimension_semantics=("parallel",),
            vmem_limit_bytes=vmem_limit),
        cost_estimate=pl.CostEstimate(
            flops=int(flops),
            transcendentals=int(H * N * N + H * N),
            bytes_accessed=int(bytes_accessed)),
    )(x, qw_all, kw_all, vw_all, wo_bf, bo_2d)


def init_params(key, d, heads):
    """Match PyTorch init: xavier_normal_ for Q/K/V, nn.Linear default for `line`."""
    kq, kk, kv, kw, kb = jax.random.split(key, 5)
    xavier_std = (2.0 / (d + d)) ** 0.5
    q_w = xavier_std * jax.random.normal(kq, (heads, d, d), jnp.float32)
    k_w = xavier_std * jax.random.normal(kk, (heads, d, d), jnp.float32)
    v_w = xavier_std * jax.random.normal(kv, (heads, d, d), jnp.float32)
    lim = 1.0 / (heads * d) ** 0.5
    w_o = jax.random.uniform(kw, (heads * d, d), jnp.float32, -lim, lim)
    b_o = jax.random.uniform(kb, (d,), jnp.float32, -lim, lim)
    return q_w, k_w, v_w, w_o, b_o


def reference(x, q_w, k_w, v_w, w_o, b_o):
    """Pure-JAX high-precision reference of the intended forward."""
    H, D, _ = q_w.shape
    hp = jax.lax.Precision.HIGHEST
    scale = 1.0 / float(D) ** 0.5
    outs = []
    for h in range(H):
        q = jnp.dot(x, q_w[h], precision=hp)
        k = jnp.dot(x, k_w[h], precision=hp)
        v = jnp.dot(x, v_w[h], precision=hp)
        a = jax.nn.softmax(jnp.dot(q, k.T, precision=hp) * scale, axis=1)
        outs.append(jnp.dot(a, v, precision=hp))
    out_all = jnp.concatenate(outs, axis=1)
    return jnp.dot(out_all, w_o, precision=hp) + b_o + x


if __name__ == "__main__":
    # Small deterministic example: 128 nodes, 128 channels (in == out, required
    # by the module's residual `+ x`), 8 heads.  128 channels keeps every
    # matmul / store lane-dense; tile_n defaults to 64 -> 2 node tiles.
    N, D, HEADS = 128, 128, 8

    key = jax.random.PRNGKey(0)
    kx, kp = jax.random.split(key)
    x = jax.random.normal(kx, (N, D), dtype=jnp.float32)
    # edge_index is never read by the PyTorch forward (dense attention); kept
    # only for interface parity with the module's signature.
    edge_index = jnp.zeros((2, 16), dtype=jnp.int32)  # noqa: F841

    q_w, k_w, v_w, w_o, b_o = init_params(kp, D, HEADS)

    out = gat_forward(x, q_w, k_w, v_w, w_o, b_o)
    out = jax.block_until_ready(out)

    ref = reference(x, q_w, k_w, v_w, w_o, b_o)
    assert out.shape == (N, D)
    max_diff = float(jnp.max(jnp.abs(out - ref)))
    assert jnp.allclose(out, ref, atol=2e-2, rtol=1e-2), (
        "max abs diff = %f" % max_diff)

    print("KERNEL_OK")
</pallas_src>

<mosaic_0001>
module attributes {stable_mosaic.version = 11 : i64} {
  func.func @_gat_kernel(%arg0: i32, %arg1: memref<128x128xf32, #tpu.memory_space<vmem>>, %arg2: memref<128x1024xbf16, #tpu.memory_space<vmem>>, %arg3: memref<128x1024xbf16, #tpu.memory_space<vmem>>, %arg4: memref<128x1024xbf16, #tpu.memory_space<vmem>>, %arg5: memref<1024x128xbf16, #tpu.memory_space<vmem>>, %arg6: memref<1x128xf32, #tpu.memory_space<vmem>>, %arg7: memref<64x128xf32, #tpu.memory_space<vmem>>, %arg8: memref<64x1024xbf16, #tpu.memory_space<vmem>>) attributes {dimension_semantics = [#tpu.dimension_semantics<parallel>], iteration_bounds = array<i64: 2>, scalar_prefetch = 0 : i64, scratch_operands = 1 : i64, tpu.core_type = #tpu.core_type<tc>, window_params = [{pipeline_mode = #tpu.pipeline_mode<synchronous>, transform_indices = @transform_0, window_bounds = array<i64: 128, 128>}, {pipeline_mode = #tpu.pipeline_mode<synchronous>, transform_indices = @transform_1, window_bounds = array<i64: 128, 1024>}, {pipeline_mode = #tpu.pipeline_mode<synchronous>, transform_indices = @transform_2, window_bounds = array<i64: 128, 1024>}, {pipeline_mode = #tpu.pipeline_mode<synchronous>, transform_indices = @transform_3, window_bounds = array<i64: 128, 1024>}, {pipeline_mode = #tpu.pipeline_mode<synchronous>, transform_indices = @transform_4, window_bounds = array<i64: 1024, 128>}, {pipeline_mode = #tpu.pipeline_mode<synchronous>, transform_indices = @transform_5, window_bounds = array<i64: 1, 128>}, {transform_indices = @transform_6, window_bounds = array<i64: 64, 128>}]} {
    %c64_i32 = arith.constant 64 : i32
    %0 = arith.muli %arg0, %c64_i32 : i32
    %1 = tpu.assume_multiple %0, 64 : i32
    %c0 = arith.constant 0 : index
    %c0_0 = arith.constant 0 : index
    %2 = vector.load %arg1[%c0, %c0_0] : memref<128x128xf32, #tpu.memory_space<vmem>>, vector<128x128xf32>
    %3 = arith.index_cast %1 : i32 to index
    %c0_1 = arith.constant 0 : index
    %4 = vector.load %arg1[%3, %c0_1] : memref<128x128xf32, #tpu.memory_space<vmem>>, vector<64x128xf32>
    %5 = arith.truncf %2 : vector<128x128xf32> to vector<128x128xbf16>
    %6 = arith.truncf %4 : vector<64x128xf32> to vector<64x128xbf16>
    %c0_2 = arith.constant 0 : index
    %c0_3 = arith.constant 0 : index
    %7 = vector.load %arg2[%c0_2, %c0_3] : memref<128x1024xbf16, #tpu.memory_space<vmem>>, vector<128x1024xbf16>
    %cst = arith.constant dense<0.000000e+00> : vector<64x1024xf32>
    %8 = tpu.matmul %6, %7, %cst {dimension_numbers = #tpu.dot_dimension_numbers<[1], [0], [0], [1], [0, 0, 1, 1], [], []>} : vector<64x128xbf16>, vector<128x1024xbf16>, vector<64x1024xf32> -> vector<64x1024xf32>
    %9 = arith.truncf %8 : vector<64x1024xf32> to vector<64x1024xbf16>
    %c0_4 = arith.constant 0 : index
    %c0_5 = arith.constant 0 : index
    %10 = vector.load %arg3[%c0_4, %c0_5] : memref<128x1024xbf16, #tpu.memory_space<vmem>>, vector<128x1024xbf16>
    %cst_6 = arith.constant dense<0.000000e+00> : vector<128x1024xf32>
    %11 = tpu.matmul %5, %10, %cst_6 {dimension_numbers = #tpu.dot_dimension_numbers<[1], [0], [0], [1], [0, 0, 1, 1], [], []>} : vector<128x128xbf16>, vector<128x1024xbf16>, vector<128x1024xf32> -> vector<128x1024xf32>
    %12 = arith.truncf %11 : vector<128x1024xf32> to vector<128x1024xbf16>
    %c0_7 = arith.constant 0 : index
    %c0_8 = arith.constant 0 : index
    %13 = vector.load %arg4[%c0_7, %c0_8] : memref<128x1024xbf16, #tpu.memory_space<vmem>>, vector<128x1024xbf16>
    %cst_9 = arith.constant dense<0.000000e+00> : vector<128x1024xf32>
    %14 = tpu.matmul %5, %13, %cst_9 {dimension_numbers = #tpu.dot_dimension_numbers<[1], [0], [0], [1], [0, 0, 1, 1], [], []>} : vector<128x128xbf16>, vector<128x1024xbf16>, vector<128x1024xf32> -> vector<128x1024xf32>
    %15 = arith.truncf %14 : vector<128x1024xf32> to vector<128x1024xbf16>
    %16 = vector.extract_strided_slice %9 {offsets = [0, 0], sizes = [64, 128], strides = [1, 1]} : vector<64x1024xbf16> to vector<64x128xbf16>
    %17 = vector.extract_strided_slice %12 {offsets = [0, 0], sizes = [128, 128], strides = [1, 1]} : vector<128x1024xbf16> to vector<128x128xbf16>
    %18 = vector.extract_strided_slice %15 {offsets = [0, 0], sizes = [128, 128], strides = [1, 1]} : vector<128x1024xbf16> to vector<128x128xbf16>
    %cst_10 = arith.constant dense<0.000000e+00> : vector<64x128xf32>
    %19 = tpu.matmul %16, %17, %cst_10 {dimension_numbers = #tpu.dot_dimension_numbers<[1], [1], [0], [0], [0, 0, 1, 0], [], []>} : vector<64x128xbf16>, vector<128x128xbf16>, vector<64x128xf32> -> vector<64x128xf32>
    %cst_11 = arith.constant 0.0883883461 : f32
    %20 = vector.broadcast %cst_11 : f32 to vector<64x128xf32>
    %21 = arith.mulf %19, %20 : vector<64x128xf32>
    %cst_12 = arith.constant dense<0xFF800000> : vector<64xf32>
    %22 = vector.multi_reduction <maximumf>, %21, %cst_12 [1] : vector<64x128xf32> to vector<64xf32>
    %23 = vector.shape_cast %22 : vector<64xf32> to vector<64x1xf32>
    %24 = vector.broadcast %23 : vector<64x1xf32> to vector<64x128xf32>
    %25 = arith.subf %21, %24 : vector<64x128xf32>
    %26 = math.exp %25 : vector<64x128xf32>
    %cst_13 = arith.constant dense<0.000000e+00> : vector<64xf32>
    %27 = vector.multi_reduction <add>, %26, %cst_13 [1] : vector<64x128xf32> to vector<64xf32>
    %28 = vector.shape_cast %27 : vector<64xf32> to vector<64x1xf32>
    %29 = arith.truncf %26 : vector<64x128xf32> to vector<64x128xbf16>
    %cst_14 = arith.constant dense<0.000000e+00> : vector<64x128xf32>
    %30 = tpu.matmul %29, %18, %cst_14 {dimension_numbers = #tpu.dot_dimension_numbers<[1], [0], [0], [1], [0, 0, 1, 1], [], []>} : vector<64x128xbf16>, vector<128x128xbf16>, vector<64x128xf32> -> vector<64x128xf32>
    %31 = tpu.reciprocal %28 {approx = true} : vector<64x1xf32> -> vector<64x1xf32>
    %32 = vector.broadcast %31 : vector<64x1xf32> to vector<64x128xf32>
    %33 = arith.mulf %30, %32 : vector<64x128xf32>
    %34 = arith.truncf %33 : vector<64x128xf32> to vector<64x128xbf16>
    %c0_15 = arith.constant 0 : index
    %c0_16 = arith.constant 0 : index
    %35 = vector.load %arg8[%c0_15, %c0_16] : memref<64x1024xbf16, #tpu.memory_space<vmem>>, vector<64x128xbf16>
    tpu.vector_store %arg8[%c0_15, %c0_16], %34 {strides = array<i32>} : memref<64x1024xbf16, #tpu.memory_space<vmem>>, vector<64x128xbf16>,
    %36 = vector.extract_strided_slice %9 {offsets = [0, 128], sizes = [64, 128], strides = [1, 1]} : vector<64x1024xbf16> to vector<64x128xbf16>
    %37 = vector.extract_strided_slice %12 {offsets = [0, 128], sizes = [128, 128], strides = [1, 1]} : vector<128x1024xbf16> to vector<128x128xbf16>
    %38 = vector.extract_strided_slice %15 {offsets = [0, 128], sizes = [128, 128], strides = [1, 1]} : vector<128x1024xbf16> to vector<128x128xbf16>
    %cst_17 = arith.constant dense<0.000000e+00> : vector<64x128xf32>
    %39 = tpu.matmul %36, %37, %cst_17 {dimension_numbers = #tpu.dot_dimension_numbers<[1], [1], [0], [0], [0, 0, 1, 0], [], []>} : vector<64x128xbf16>, vector<128x128xbf16>, vector<64x128xf32> -> vector<64x128xf32>
    %cst_18 = arith.constant 0.0883883461 : f32
    %40 = vector.broadcast %cst_18 : f32 to vector<64x128xf32>
    %41 = arith.mulf %39, %40 : vector<64x128xf32>
    %cst_19 = arith.constant dense<0xFF800000> : vector<64xf32>
    %42 = vector.multi_reduction <maximumf>, %41, %cst_19 [1] : vector<64x128xf32> to vector<64xf32>
    %43 = vector.shape_cast %42 : vector<64xf32> to vector<64x1xf32>
    %44 = vector.broadcast %43 : vector<64x1xf32> to vector<64x128xf32>
    %45 = arith.subf %41, %44 : vector<64x128xf32>
    %46 = math.exp %45 : vector<64x128xf32>
    %cst_20 = arith.constant dense<0.000000e+00> : vector<64xf32>
    %47 = vector.multi_reduction <add>, %46, %cst_20 [1] : vector<64x128xf32> to vector<64xf32>
    %48 = vector.shape_cast %47 : vector<64xf32> to vector<64x1xf32>
    %49 = arith.truncf %46 : vector<64x128xf32> to vector<64x128xbf16>
    %cst_21 = arith.constant dense<0.000000e+00> : vector<64x128xf32>
    %50 = tpu.matmul %49, %38, %cst_21 {dimension_numbers = #tpu.dot_dimension_numbers<[1], [0], [0], [1], [0, 0, 1, 1], [], []>} : vector<64x128xbf16>, vector<128x128xbf16>, vector<64x128xf32> -> vector<64x128xf32>
    %51 = tpu.reciprocal %48 {approx = true} : vector<64x1xf32> -> vector<64x1xf32>
    %52 = vector.broadcast %51 : vector<64x1xf32> to vector<64x128xf32>
    %53 = arith.mulf %50, %52 : vector<64x128xf32>
    %54 = arith.truncf %53 : vector<64x128xf32> to vector<64x128xbf16>
    %c0_22 = arith.constant 0 : index
    %c128 = arith.constant 128 : index
    %55 = vector.load %arg8[%c0_22, %c128] : memref<64x1024xbf16, #tpu.memory_space<vmem>>, vector<64x128xbf16>
    tpu.vector_store %arg8[%c0_22, %c128], %54 {strides = array<i32>} : memref<64x1024xbf16, #tpu.memory_space<vmem>>, vector<64x128xbf16>,
    %56 = vector.extract_strided_slice %9 {offsets = [0, 256], sizes = [64, 128], strides = [1, 1]} : vector<64x1024xbf16> to vector<64x128xbf16>
    %57 = vector.extract_strided_slice %12 {offsets = [0, 256], sizes = [128, 128], strides = [1, 1]} : vector<128x1024xbf16> to vector<128x128xbf16>
    %58 = vector.extract_strided_slice %15 {offsets = [0, 256], sizes = [128, 128], strides = [1, 1]} : vector<128x1024xbf16> to vector<128x128xbf16>
    %cst_23 = arith.constant dense<0.000000e+00> : vector<64x128xf32>
    %59 = tpu.matmul %56, %57, %cst_23 {dimension_numbers = #tpu.dot_dimension_numbers<[1], [1], [0], [0], [0, 0, 1, 0], [], []>} : vector<64x128xbf16>, vector<128x128xbf16>, vector<64x128xf32> -> vector<64x128xf32>
    %cst_24 = arith.constant 0.0883883461 : f32
    %60 = vector.broadcast %cst_24 : f32 to vector<64x128xf32>
    %61 = arith.mulf %59, %60 : vector<64x128xf32>
    %cst_25 = arith.constant dense<0xFF800000> : vector<64xf32>
    %62 = vector.multi_reduction <maximumf>, %61, %cst_25 [1] : vector<64x128xf32> to vector<64xf32>
    %63 = vector.shape_cast %62 : vector<64xf32> to vector<64x1xf32>
    %64 = vector.broadcast %63 : vector<64x1xf32> to vector<64x128xf32>
    %65 = arith.subf %61, %64 : vector<64x128xf32>
    %66 = math.exp %65 : vector<64x128xf32>
    %cst_26 = arith.constant dense<0.000000e+00> : vector<64xf32>
    %67 = vector.multi_reduction <add>, %66, %cst_26 [1] : vector<64x128xf32> to vector<64xf32>
    %68 = vector.shape_cast %67 : vector<64xf32> to vector<64x1xf32>
    %69 = arith.truncf %66 : vector<64x128xf32> to vector<64x128xbf16>
    %cst_27 = arith.constant dense<0.000000e+00> : vector<64x128xf32>
    %70 = tpu.matmul %69, %58, %cst_27 {dimension_numbers = #tpu.dot_dimension_numbers<[1], [0], [0], [1], [0, 0, 1, 1], [], []>} : vector<64x128xbf16>, vector<128x128xbf16>, vector<64x128xf32> -> vector<64x128xf32>
    %71 = tpu.reciprocal %68 {approx = true} : vector<64x1xf32> -> vector<64x1xf32>
    %72 = vector.broadcast %71 : vector<64x1xf32> to vector<64x128xf32>
    %73 = arith.mulf %70, %72 : vector<64x128xf32>
    %74 = arith.truncf %73 : vector<64x128xf32> to vector<64x128xbf16>
    %c0_28 = arith.constant 0 : index
    %c256 = arith.constant 256 : index
    %75 = vector.load %arg8[%c0_28, %c256] : memref<64x1024xbf16, #tpu.memory_space<vmem>>, vector<64x128xbf16>
    tpu.vector_store %arg8[%c0_28, %c256], %74 {strides = array<i32>} : memref<64x1024xbf16, #tpu.memory_space<vmem>>, vector<64x128xbf16>,
    %76 = vector.extract_strided_slice %9 {offsets = [0, 384], sizes = [64, 128], strides = [1, 1]} : vector<64x1024xbf16> to vector<64x128xbf16>
    %77 = vector.extract_strided_slice %12 {offsets = [0, 384], sizes = [128, 128], strides = [1, 1]} : vector<128x1024xbf16> to vector<128x128xbf16>
    %78 = vector.extract_strided_slice %15 {offsets = [0, 384], sizes = [128, 128], strides = [1, 1]} : vector<128x1024xbf16> to vector<128x128xbf16>
    %cst_29 = arith.constant dense<0.000000e+00> : vector<64x128xf32>
    %79 = tpu.matmul %76, %77, %cst_29 {dimension_numbers = #tpu.dot_dimension_numbers<[1], [1], [0], [0], [0, 0, 1, 0], [], []>} : vector<64x128xbf16>, vector<128x128xbf16>, vector<64x128xf32> -> vector<64x128xf32>
    %cst_30 = arith.constant 0.0883883461 : f32
    %80 = vector.broadcast %cst_30 : f32 to vector<64x128xf32>
    %81 = arith.mulf %79, %80 : vector<64x128xf32>
    %cst_31 = arith.constant dense<0xFF800000> : vector<64xf32>
    %82 = vector.multi_reduction <maximumf>, %81, %cst_31 [1] : vector<64x128xf32> to vector<64xf32>
    %83 = vector.shape_cast %82 : vector<64xf32> to vector<64x1xf32>
    %84 = vector.broadcast %83 : vector<64x1xf32> to vector<64x128xf32>
    %85 = arith.subf %81, %84 : vector<64x128xf32>
    %86 = math.exp %85 : vector<64x128xf32>
    %cst_32 = arith.constant dense<0.000000e+00> : vector<64xf32>
    %87 = vector.multi_reduction <add>, %86, %cst_32 [1] : vector<64x128xf32> to vector<64xf32>
    %88 = vector.shape_cast %87 : vector<64xf32> to vector<64x1xf32>
    %89 = arith.truncf %86 : vector<64x128xf32> to vector<64x128xbf16>
    %cst_33 = arith.constant dense<0.000000e+00> : vector<64x128xf32>
    %90 = tpu.matmul %89, %78, %cst_33 {dimension_numbers = #tpu.dot_dimension_numbers<[1], [0], [0], [1], [0, 0, 1, 1], [], []>} : vector<64x128xbf16>, vector<128x128xbf16>, vector<64x128xf32> -> vector<64x128xf32>
    %91 = tpu.reciprocal %88 {approx = true} : vector<64x1xf32> -> vector<64x1xf32>
    %92 = vector.broadcast %91 : vector<64x1xf32> to vector<64x128xf32>
    %93 = arith.mulf %90, %92 : vector<64x128xf32>
    %94 = arith.truncf %93 : vector<64x128xf32> to vector<64x128xbf16>
    %c0_34 = arith.constant 0 : index
    %c384 = arith.constant 384 : index
    %95 = vector.load %arg8[%c0_34, %c384] : memref<64x1024xbf16, #tpu.memory_space<vmem>>, vector<64x128xbf16>
    tpu.vector_store %arg8[%c0_34, %c384], %94 {strides = array<i32>} : memref<64x1024xbf16, #tpu.memory_space<vmem>>, vector<64x128xbf16>,
    %96 = vector.extract_strided_slice %9 {offsets = [0, 512], sizes = [64, 128], strides = [1, 1]} : vector<64x1024xbf16> to vector<64x128xbf16>
    %97 = vector.extract_strided_slice %12 {offsets = [0, 512], sizes = [128, 128], strides = [1, 1]} : vector<128x1024xbf16> to vector<128x128xbf16>
    %98 = vector.extract_strided_slice %15 {offsets = [0, 512], sizes = [128, 128], strides = [1, 1]} : vector<128x1024xbf16> to vector<128x128xbf16>
    %cst_35 = arith.constant dense<0.000000e+00> : vector<64x128xf32>
    %99 = tpu.matmul %96, %97, %cst_35 {dimension_numbers = #tpu.dot_dimension_numbers<[1], [1], [0], [0], [0, 0, 1, 0], [], []>} : vector<64x128xbf16>, vector<128x128xbf16>, vector<64x128xf32> -> vector<64x128xf32>
    %cst_36 = arith.constant 0.0883883461 : f32
    %100 = vector.broadcast %cst_36 : f32 to vector<64x128xf32>
    %101 = arith.mulf %99, %100 : vector<64x128xf32>
    %cst_37 = arith.constant dense<0xFF800000> : vector<64xf32>
    %102 = vector.multi_reduction <maximumf>, %101, %cst_37 [1] : vector<64x128xf32> to vector<64xf32>
    %103 = vector.shape_cast %102 : vector<64xf32> to vector<64x1xf32>
    %104 = vector.broadcast %103 : vector<64x1xf32> to vector<64x128xf32>
    %105 = arith.subf %101, %104 : vector<64x128xf32>
    %106 = math.exp %105 : vector<64x128xf32>
    %cst_38 = arith.constant dense<0.000000e+00> : vector<64xf32>
    %107 = vector.multi_reduction <add>, %106, %cst_38 [1] : vector<64x128xf32> to vector<64xf32>
    %108 = vector.shape_cast %107 : vector<64xf32> to vector<64x1xf32>
    %109 = arith.truncf %106 : vector<64x128xf32> to vector<64x128xbf16>
    %cst_39 = arith.constant dense<0.000000e+00> : vector<64x128xf32>
    %110 = tpu.matmul %109, %98, %cst_39 {dimension_numbers = #tpu.dot_dimension_numbers<[1], [0], [0], [1], [0, 0, 1, 1], [], []>} : vector<64x128xbf16>, vector<128x128xbf16>, vector<64x128xf32> -> vector<64x128xf32>
    %111 = tpu.reciprocal %108 {approx = true} : vector<64x1xf32> -> vector<64x1xf32>
    %112 = vector.broadcast %111 : vector<64x1xf32> to vector<64x128xf32>
    %113 = arith.mulf %110, %112 : vector<64x128xf32>
    %114 = arith.truncf %113 : vector<64x128xf32> to vector<64x128xbf16>
    %c0_40 = arith.constant 0 : index
    %c512 = arith.constant 512 : index
    %115 = vector.load %arg8[%c0_40, %c512] : memref<64x1024xbf16, #tpu.memory_space<vmem>>, vector<64x128xbf16>
    tpu.vector_store %arg8[%c0_40, %c512], %114 {strides = array<i32>} : memref<64x1024xbf16, #tpu.memory_space<vmem>>, vector<64x128xbf16>,
    %116 = vector.extract_strided_slice %9 {offsets = [0, 640], sizes = [64, 128], strides = [1, 1]} : vector<64x1024xbf16> to vector<64x128xbf16>
    %117 = vector.extract_strided_slice %12 {offsets = [0, 640], sizes = [128, 128], strides = [1, 1]} : vector<128x1024xbf16> to vector<128x128xbf16>
    %118 = vector.extract_strided_slice %15 {offsets = [0, 640], sizes = [128, 128], strides = [1, 1]} : vector<128x1024xbf16> to vector<128x128xbf16>
    %cst_41 = arith.constant dense<0.000000e+00> : vector<64x128xf32>
    %119 = tpu.matmul %116, %117, %cst_41 {dimension_numbers = #tpu.dot_dimension_numbers<[1], [1], [0], [0], [0, 0, 1, 0], [], []>} : vector<64x128xbf16>, vector<128x128xbf16>, vector<64x128xf32> -> vector<64x128xf32>
    %cst_42 = arith.constant 0.0883883461 : f32
    %120 = vector.broadcast %cst_42 : f32 to vector<64x128xf32>
    %121 = arith.mulf %119, %120 : vector<64x128xf32>
    %cst_43 = arith.constant dense<0xFF800000> : vector<64xf32>
    %122 = vector.multi_reduction <maximumf>, %121, %cst_43 [1] : vector<64x128xf32> to vector<64xf32>
    %123 = vector.shape_cast %122 : vector<64xf32> to vector<64x1xf32>
    %124 = vector.broadcast %123 : vector<64x1xf32> to vector<64x128xf32>
    %125 = arith.subf %121, %124 : vector<64x128xf32>
    %126 = math.exp %125 : vector<64x128xf32>
    %cst_44 = arith.constant dense<0.000000e+00> : vector<64xf32>
    %127 = vector.multi_reduction <add>, %126, %cst_44 [1] : vector<64x128xf32> to vector<64xf32>
    %128 = vector.shape_cast %127 : vector<64xf32> to vector<64x1xf32>
    %129 = arith.truncf %126 : vector<64x128xf32> to vector<64x128xbf16>
    %cst_45 = arith.constant dense<0.000000e+00> : vector<64x128xf32>
    %130 = tpu.matmul %129, %118, %cst_45 {dimension_numbers = #tpu.dot_dimension_numbers<[1], [0], [0], [1], [0, 0, 1, 1], [], []>} : vector<64x128xbf16>, vector<128x128xbf16>, vector<64x128xf32> -> vector<64x128xf32>
    %131 = tpu.reciprocal %128 {approx = true} : vector<64x1xf32> -> vector<64x1xf32>
    %132 = vector.broadcast %131 : vector<64x1xf32> to vector<64x128xf32>
    %133 = arith.mulf %130, %132 : vector<64x128xf32>
    %134 = arith.truncf %133 : vector<64x128xf32> to vector<64x128xbf16>
    %c0_46 = arith.constant 0 : index
    %c640 = arith.constant 640 : index
    %135 = vector.load %arg8[%c0_46, %c640] : memref<64x1024xbf16, #tpu.memory_space<vmem>>, vector<64x128xbf16>
    tpu.vector_store %arg8[%c0_46, %c640], %134 {strides = array<i32>} : memref<64x1024xbf16, #tpu.memory_space<vmem>>, vector<64x128xbf16>,
    %136 = vector.extract_strided_slice %9 {offsets = [0, 768], sizes = [64, 128], strides = [1, 1]} : vector<64x1024xbf16> to vector<64x128xbf16>
    %137 = vector.extract_strided_slice %12 {offsets = [0, 768], sizes = [128, 128], strides = [1, 1]} : vector<128x1024xbf16> to vector<128x128xbf16>
    %138 = vector.extract_strided_slice %15 {offsets = [0, 768], sizes = [128, 128], strides = [1, 1]} : vector<128x1024xbf16> to vector<128x128xbf16>
    %cst_47 = arith.constant dense<0.000000e+00> : vector<64x128xf32>
    %139 = tpu.matmul %136, %137, %cst_47 {dimension_numbers = #tpu.dot_dimension_numbers<[1], [1], [0], [0], [0, 0, 1, 0], [], []>} : vector<64x128xbf16>, vector<128x128xbf16>, vector<64x128xf32> -> vector<64x128xf32>
    %cst_48 = arith.constant 0.0883883461 : f32
    %140 = vector.broadcast %cst_48 : f32 to vector<64x128xf32>
    %141 = arith.mulf %139, %140 : vector<64x128xf32>
    %cst_49 = arith.constant dense<0xFF800000> : vector<64xf32>
    %142 = vector.multi_reduction <maximumf>, %141, %cst_49 [1] : vector<64x128xf32> to vector<64xf32>
    %143 = vector.shape_cast %142 : vector<64xf32> to vector<64x1xf32>
    %144 = vector.broadcast %143 : vector<64x1xf32> to vector<64x128xf32>
    %145 = arith.subf %141, %144 : vector<64x128xf32>
    %146 = math.exp %145 : vector<64x128xf32>
    %cst_50 = arith.constant dense<0.000000e+00> : vector<64xf32>
    %147 = vector.multi_reduction <add>, %146, %cst_50 [1] : vector<64x128xf32> to vector<64xf32>
    %148 = vector.shape_cast %147 : vector<64xf32> to vector<64x1xf32>
    %149 = arith.truncf %146 : vector<64x128xf32> to vector<64x128xbf16>
    %cst_51 = arith.constant dense<0.000000e+00> : vector<64x128xf32>
    %150 = tpu.matmul %149, %138, %cst_51 {dimension_numbers = #tpu.dot_dimension_numbers<[1], [0], [0], [1], [0, 0, 1, 1], [], []>} : vector<64x128xbf16>, vector<128x128xbf16>, vector<64x128xf32> -> vector<64x128xf32>
    %151 = tpu.reciprocal %148 {approx = true} : vector<64x1xf32> -> vector<64x1xf32>
    %152 = vector.broadcast %151 : vector<64x1xf32> to vector<64x128xf32>
    %153 = arith.mulf %150, %152 : vector<64x128xf32>
    %154 = arith.truncf %153 : vector<64x128xf32> to vector<64x128xbf16>
    %c0_52 = arith.constant 0 : index
    %c768 = arith.constant 768 : index
    %155 = vector.load %arg8[%c0_52, %c768] : memref<64x1024xbf16, #tpu.memory_space<vmem>>, vector<64x128xbf16>
    tpu.vector_store %arg8[%c0_52, %c768], %154 {strides = array<i32>} : memref<64x1024xbf16, #tpu.memory_space<vmem>>, vector<64x128xbf16>,
    %156 = vector.extract_strided_slice %9 {offsets = [0, 896], sizes = [64, 128], strides = [1, 1]} : vector<64x1024xbf16> to vector<64x128xbf16>
    %157 = vector.extract_strided_slice %12 {offsets = [0, 896], sizes = [128, 128], strides = [1, 1]} : vector<128x1024xbf16> to vector<128x128xbf16>
    %158 = vector.extract_strided_slice %15 {offsets = [0, 896], sizes = [128, 128], strides = [1, 1]} : vector<128x1024xbf16> to vector<128x128xbf16>
    %cst_53 = arith.constant dense<0.000000e+00> : vector<64x128xf32>
    %159 = tpu.matmul %156, %157, %cst_53 {dimension_numbers = #tpu.dot_dimension_numbers<[1], [1], [0], [0], [0, 0, 1, 0], [], []>} : vector<64x128xbf16>, vector<128x128xbf16>, vector<64x128xf32> -> vector<64x128xf32>
    %cst_54 = arith.constant 0.0883883461 : f32
    %160 = vector.broadcast %cst_54 : f32 to vector<64x128xf32>
    %161 = arith.mulf %159, %160 : vector<64x128xf32>
    %cst_55 = arith.constant dense<0xFF800000> : vector<64xf32>
    %162 = vector.multi_reduction <maximumf>, %161, %cst_55 [1] : vector<64x128xf32> to vector<64xf32>
    %163 = vector.shape_cast %162 : vector<64xf32> to vector<64x1xf32>
    %164 = vector.broadcast %163 : vector<64x1xf32> to vector<64x128xf32>
    %165 = arith.subf %161, %164 : vector<64x128xf32>
    %166 = math.exp %165 : vector<64x128xf32>
    %cst_56 = arith.constant dense<0.000000e+00> : vector<64xf32>
    %167 = vector.multi_reduction <add>, %166, %cst_56 [1] : vector<64x128xf32> to vector<64xf32>
    %168 = vector.shape_cast %167 : vector<64xf32> to vector<64x1xf32>
    %169 = arith.truncf %166 : vector<64x128xf32> to vector<64x128xbf16>
    %cst_57 = arith.constant dense<0.000000e+00> : vector<64x128xf32>
    %170 = tpu.matmul %169, %158, %cst_57 {dimension_numbers = #tpu.dot_dimension_numbers<[1], [0], [0], [1], [0, 0, 1, 1], [], []>} : vector<64x128xbf16>, vector<128x128xbf16>, vector<64x128xf32> -> vector<64x128xf32>
    %171 = tpu.reciprocal %168 {approx = true} : vector<64x1xf32> -> vector<64x1xf32>
    %172 = vector.broadcast %171 : vector<64x1xf32> to vector<64x128xf32>
    %173 = arith.mulf %170, %172 : vector<64x128xf32>
    %174 = arith.truncf %173 : vector<64x128xf32> to vector<64x128xbf16>
    %c0_58 = arith.constant 0 : index
    %c896 = arith.constant 896 : index
    %175 = vector.load %arg8[%c0_58, %c896] : memref<64x1024xbf16, #tpu.memory_space<vmem>>, vector<64x128xbf16>
    tpu.vector_store %arg8[%c0_58, %c896], %174 {strides = array<i32>} : memref<64x1024xbf16, #tpu.memory_space<vmem>>, vector<64x128xbf16>,
    %c0_59 = arith.constant 0 : index
    %c0_60 = arith.constant 0 : index
    %176 = vector.load %arg8[%c0_59, %c0_60] : memref<64x1024xbf16, #tpu.memory_space<vmem>>, vector<64x1024xbf16>
    %c0_61 = arith.constant 0 : index
    %c0_62 = arith.constant 0 : index
    %177 = vector.load %arg5[%c0_61, %c0_62] : memref<1024x128xbf16, #tpu.memory_space<vmem>>, vector<1024x128xbf16>
    %cst_63 = arith.constant dense<0.000000e+00> : vector<64x128xf32>
    %178 = tpu.matmul %176, %177, %cst_63 {dimension_numbers = #tpu.dot_dimension_numbers<[1], [0], [0], [1], [0, 0, 1, 1], [], []>} : vector<64x1024xbf16>, vector<1024x128xbf16>, vector<64x128xf32> -> vector<64x128xf32>
    %c0_64 = arith.constant 0 : index
    %c0_65 = arith.constant 0 : index
    %179 = vector.load %arg6[%c0_64, %c0_65] : memref<1x128xf32, #tpu.memory_space<vmem>>, vector<1x128xf32>
    %180 = vector.broadcast %179 : vector<1x128xf32> to vector<64x128xf32>
    %181 = arith.addf %178, %180 : vector<64x128xf32>
    %182 = arith.addf %181, %4 : vector<64x128xf32>
    %c0_66 = arith.constant 0 : index
    %c0_67 = arith.constant 0 : index
    %183 = vector.load %arg7[%c0_66, %c0_67] : memref<64x128xf32, #tpu.memory_space<vmem>>, vector<64x128xf32>
    tpu.vector_store %arg7[%c0_66, %c0_67], %182 {strides = array<i32>} : memref<64x128xf32, #tpu.memory_space<vmem>>, vector<64x128xf32>,
    return
  }
  func.func @transform_0(%arg0: i32) -> (i32, i32) {
    %c0_i32 = arith.constant 0 : i32
    %c0_i32_0 = arith.constant 0 : i32
    %c0_i32_1 = arith.constant 0 : i32
    return %c0_i32, %c0_i32_0 : i32, i32
  }
  func.func @transform_1(%arg0: i32) -> (i32, i32) {
    %c0_i32 = arith.constant 0 : i32
    %c0_i32_0 = arith.constant 0 : i32
    %c0_i32_1 = arith.constant 0 : i32
    return %c0_i32, %c0_i32_0 : i32, i32
  }
  func.func @transform_2(%arg0: i32) -> (i32, i32) {
    %c0_i32 = arith.constant 0 : i32
    %c0_i32_0 = arith.constant 0 : i32
    %c0_i32_1 = arith.constant 0 : i32
    return %c0_i32, %c0_i32_0 : i32, i32
  }
  func.func @transform_3(%arg0: i32) -> (i32, i32) {
    %c0_i32 = arith.constant 0 : i32
    %c0_i32_0 = arith.constant 0 : i32
    %c0_i32_1 = arith.constant 0 : i32
    return %c0_i32, %c0_i32_0 : i32, i32
  }
  func.func @transform_4(%arg0: i32) -> (i32, i32) {
    %c0_i32 = arith.constant 0 : i32
    %c0_i32_0 = arith.constant 0 : i32
    %c0_i32_1 = arith.constant 0 : i32
    return %c0_i32, %c0_i32_0 : i32, i32
  }
  func.func @transform_5(%arg0: i32) -> (i32, i32) {
    %c0_i32 = arith.constant 0 : i32
    %c0_i32_0 = arith.constant 0 : i32
    %c0_i32_1 = arith.constant 0 : i32
    return %c0_i32, %c0_i32_0 : i32, i32
  }
  func.func @transform_6(%arg0: i32) -> (i32, i32) {
    %c0_i32 = arith.constant 0 : i32
    %c0_i32_0 = arith.constant 0 : i32
    return %arg0, %c0_i32 : i32, i32
  }
}

</mosaic_0001>

<bundles_post_ra>
// kernel: tpu_custom_call.1
= control target key start
LH: loop header
LB: loop body
LE: loop exit
PB: predicated region body
PF: predicated region fallthrough
CT: control target
= control target key end

     0   :  { %s9400_s0 = inlined_call_operand.hbm [shape: f32[128,128], index: 0, kind: input, shape index: {}]   ;;  %s9401_s1 = inlined_call_operand.hbm [shape: bf16[128,1024], index: 1, kind: input, shape index: {}]   ;;  %s9402_s2 = inlined_call_operand.hbm [shape: bf16[128,1024], index: 2, kind: input, shape index: {}]   ;;  %s9403_s3 = inlined_call_operand.hbm [shape: bf16[128,1024], index: 3, kind: input, shape index: {}]   ;;  %s9404_s4 = inlined_call_operand.hbm [shape: bf16[1024,128], index: 4, kind: input, shape index: {}]   ;;  %s9405_s5 = inlined_call_operand.vmem [shape: f32[1,128], index: 5, kind: input, shape index: {}]   ;;  %s9406_s6 = inlined_call_operand.hbm [shape: f32[128,128], index: 6, kind: output, shape index: {}]  }
   0x1   :  { %9416 = sst [smem:[#allocation75_spill]] %s9400_s0 }
   0x2   :  { %9417 = sst [smem:[#allocation76_spill]] %s9401_s1 }
   0x3   :  { %9418 = sst [smem:[#allocation77_spill]] %s9403_s3 }
   0x4   :  { %11 = vsyncpa [#allocation4], 0 }
   0x5   :  { %12 = vsyncpa [#allocation7], 0 }
   0x6   :  { %13 = vsyncpa [#allocation10], 0 }
   0x7   :  { %14 = vsyncpa [#allocation5], 0 }
   0x8   :  { %16 = vsyncpa [#allocation5 + $0x1], 0  ;;  %s7916_s21 = smov 0   ;;  %s7918_s22 = smov 0  }
   0x9   :  { %s7920_s23 = smov 0   ;;  %s7922_s24 = smov 0  }
   0xa LB: > { %s7937_s25 = sadd.s32 4294967295, %s7866_s24   ;;  %s5818_s26 = sadd.s32 4294967294, %s7866_s24   ;;  %s7866_s24 = sphi %s7922_s24, %s9581_s24   ;;  %s7862_s23 = sphi %s7920_s23, %s9580_s23   ;;  %s7858_s22 = sphi %s7918_s22, %s9579_s22   ;;  %s7854_s21 = sphi %s7916_s21, %s9578_s21  }
   0xb   : > { %s7941_s27 = sadd.s32 1, %s7866_s24   ;;  %s155_s28 = sadd.s32 1, %s7862_s23 }
   0xc   : > { %s152_s29 = ssub.s32 %s7866_s24, %s7941_s27  ;;  %p165_p0 = scmp.ne.s32.totalorder %s7862_s23, %s7858_s22 }
   0xd   : > { %p153_p1 = scmp.eq.s32.totalorder %s152_s29, 0  ;;  %p166_p2 = scmp.eq.s32.totalorder %s7937_s25, 1 }
   0xe   : > { %p171_p3 = scmp.ne.s32.totalorder %s7858_s22, %s7854_s21  ;;  %p172_p4 = scmp.eq.s32.totalorder %s5818_s26, 1 }
   0xf   : > { %s7952_s30 = scalar_select %p153_p1, %s7862_s23, %s155_s28  }
  0x10   : > { %p7954_p5 = por %p166_p2, %p165_p0  ;;  %p7958_p6 = por %p172_p4, %p171_p3 }
  0x11   : > { %9419 = sst [smem:[#allocation17_spill]] %s7952_s30  ;;  %p5819_p7 = scmp.ge.s32.totalorder %s7866_s24, 1 }
  0x12   : > { %p179_p8 = scmp.lt.s32.totalorder %s7866_s24, 3  ;;  %p7321_p9 = scmp.eq.s32.totalorder %s7937_s25, 0 }
  0x13   : > { %s9423_s1 = sld [smem:[#allocation76_spill]]  ;;  %s7868_s13 = smov [#allocation6]  }
  0x14   : > { %p7965_p10 = pnand %p5819_p7, %p179_p8  ;;  %s206_s14 = sshll.u32 %s7868_s13, 4  ;;  %s207_s14 = int_to_ptr.vmem [resolvable:$true] %s206_s14 }
  0x15   : > { %s9425_s3 = sld [smem:[#allocation77_spill]]  ;;  %s7869_s19 = smov 512  }
  0x16   : > { %p7301_p11 = pneg %p7965_p10  ;;  %s7870_s20 = smov 32  }
  0x17   : > { %s7871_s26 = smov [#allocation9]   ;;  %s9426_s0 = sld [smem:[#allocation75_spill]] }
  0x18   : > { %p7976_p12 = pnand %p7321_p9, %p7301_p11  ;;  %s234_s28 = sshll.u32 %s7871_s26, 4  ;;  %s235_s28 = int_to_ptr.vmem [resolvable:$true] %s234_s28 }
  0x19   : > { %s204_s12 = sshll.u32 %s9423_s1, 4  ;;  %s7872_s13 = smov [#allocation3]   ;;  %s205_s12 = int_to_ptr.hbm [resolvable:$true] %s204_s12 }
  0x1a   : > { %7307 = dma.hbm_to_vmem [thread:$0]  (!%p7976_p12), %s205_s12, 8192, %s207_s14, [#allocation7], %s7869_s19, %s7869_s19, %s7870_s20  }
  0x1b   : > { %s232_s18 = sshll.u32 %s9425_s3, 4  ;;  %s192_s16 = sshll.u32 %s7872_s13, 4  ;;  %s233_s18 = int_to_ptr.hbm [resolvable:$true] %s232_s18  ;;  %s193_s16 = int_to_ptr.vmem [resolvable:$true] %s192_s16 }
  0x1c   : > { %7313 = dma.hbm_to_vmem [thread:$0]  (!%p7976_p12), %s233_s18, 8192, %s235_s28, [#allocation10], %s7869_s19, %s7869_s19, %s7870_s20  }
  0x1d   : > { %s190_s11 = sshll.u32 %s9426_s0, 4  ;;  %s218_s3 = sshll.u32 %s9402_s2, 4  ;;  %s191_s11 = int_to_ptr.hbm [resolvable:$true] %s190_s11  ;;  %s219_s3 = int_to_ptr.hbm [resolvable:$true] %s218_s3 }
  0x1e   : > { %s7873_s12 = smov 128   ;;  %s7874_s14 = smov 8  }
  0x1f   : > { %7304 = dma.hbm_to_vmem [thread:$0]  (!%p7976_p12), %s191_s11, 2048, %s193_s16, [#allocation4], %s7873_s12, %s7873_s12, %s7874_s14  }
  0x20   : > { %s7875_s26 = smov [#allocation8]   ;;  %s246_s30 = sshll.u32 %s9404_s4, 4  ;;  %s247_s30 = int_to_ptr.hbm [resolvable:$true] %s246_s30 }
  0x21   : > { %s220_s29 = sshll.u32 %s7875_s26, 4  ;;  %s7876_s18 = smov [#allocation11]   ;;  %s221_s29 = int_to_ptr.vmem [resolvable:$true] %s220_s29 }
  0x22   : > { %7310 = dma.hbm_to_vmem [thread:$0]  (!%p7976_p12), %s219_s3, 8192, %s221_s29, [#allocation7], %s7869_s19, %s7869_s19, %s7870_s20  }
  0x23   : > { %s248_s28 = sshll.u32 %s7876_s18, 4  ;;  %s7877_s1 = smov 64   ;;  %s249_s28 = int_to_ptr.vmem [resolvable:$true] %s248_s28 }
  0x24   : > { %s7878_s13 = smov 4   ;;  %267 = sbr.rel (%p7965_p10) target bundleno = 1544 (0x608), region = 44 }
  0x25   : > { %7316 = dma.hbm_to_vmem [thread:$0]  (!%p7976_p12), %s247_s30, 8192, %s249_s28, [#allocation10], %s7877_s1, %s7877_s1, %s7878_s13  }
  0x29   : > { %7837 = dma.done.wait (%p7321_p9), [#allocation4], 2048  }
  0x2a   : > { %7839 = vsyncadd (%p7321_p9), [#allocation4], 4294965248 }
  0x2b   : > { %7841 = dma.done.wait (%p7321_p9), [#allocation7], 16384  }
  0x2c   : > { %7843 = vsyncadd (%p7321_p9), [#allocation7], 4294950912 }
  0x2d   : > { %7845 = dma.done.wait (%p7321_p9), [#allocation10], 16384  }
  0x2e   : > { %7847 = vsyncadd (%p7321_p9), [#allocation10], 4294950912  ;;  %v6059_v0 = vld [vmem:[#allocation6 + $0x1c0] sm:$0xf]  ;;  %v7046_v2 = vld [vmem:[#allocation6 + $0x1c4] sm:$0xf] }
  0x2f   : > { %v7050_v1 = vld [vmem:[#allocation6 + $0x1dc] sm:$0xf0]  ;;  %v6061_v4 = vld [vmem:[#allocation6 + $0x1e0] sm:$0xf0]  ;;  %v6067_v5 = vld [vmem:[#allocation6 + $0x1c8] sm:$0xf] }
  0x30   : > { %v6060_v3 = vor.u32 %v7050_v1, %v6059_v0  ;;  %v7051_v6 = vld [vmem:[#allocation6 + $0x1e4] sm:$0xf0]  ;;  %v6064_v7 = vor.u32 %v7046_v2, %v6061_v4  ;;  %v7047_v9 = vld [vmem:[#allocation6 + $0x1cc] sm:$0xf]  ;;  %v6027_v11 = vld [vmem:[#allocation6 + $0x180] sm:$0xf] }
  0x31   : > { %v6068_v8 = vor.u32 %v7051_v6, %v6067_v5  ;;  %v6069_v10 = vld [vmem:[#allocation6 + $0x1e8] sm:$0xf0]  ;;  %v7042_v13 = vld [vmem:[#allocation6 + $0x19c] sm:$0xf0]  ;;  %v7038_v14 = vld [vmem:[#allocation6 + $0x184] sm:$0xf] }
  0x32   : > { %736 = vmatpush.bf16.msra.mxu0 %v6060_v3  ;;  %v6072_v12 = vor.u32 %v7047_v9, %v6069_v10  ;;  %v6029_v15 = vld [vmem:[#allocation6 + $0x1a0] sm:$0xf0]  ;;  %765 = vmatpush.bf16.msra.mxu1 %v6064_v7  ;;  %v6028_v16 = vor.u32 %v7042_v13, %v6027_v11  ;;  %v6035_v18 = vld [vmem:[#allocation6 + $0x188] sm:$0xf]  ;;  %v7039_v20 = vld [vmem:[#allocation6 + $0x18c] sm:$0xf] }
  0x33   : > { %794 = vmatpush.bf16.msra.mxu2 %v6068_v8  ;;  %v6032_v17 = vor.u32 %v7038_v14, %v6029_v15  ;;  %v7043_v19 = vld [vmem:[#allocation6 + $0x1a4] sm:$0xf0]  ;;  %v6037_v22 = vld [vmem:[#allocation6 + $0x1a8] sm:$0xf0]  ;;  %v5995_v23 = vld [vmem:[#allocation6 + $0x140] sm:$0xf] }
  0x34   : > { %823 = vmatpush.bf16.msra.mxu3 %v6072_v12  ;;  %v6036_v21 = vor.u32 %v7043_v19, %v6035_v18  ;;  %v7034_v24 = vld [vmem:[#allocation6 + $0x15c] sm:$0xf0]  ;;  %v6040_v25 = vor.u32 %v7039_v20, %v6037_v22  ;;  %v7030_v26 = vld [vmem:[#allocation6 + $0x144] sm:$0xf]  ;;  %v6003_v28 = vld [vmem:[#allocation6 + $0x148] sm:$0xf] }
  0x35   : > { %v5997_v27 = vld [vmem:[#allocation6 + $0x160] sm:$0xf0]  ;;  %v5996_v29 = vor.u32 %v7034_v24, %v5995_v23  ;;  %v7035_v30 = vld [vmem:[#allocation6 + $0x164] sm:$0xf0]  ;;  %v7031_v31 = vld [vmem:[#allocation6 + $0x14c] sm:$0xf] }
  0x36   : > { %737 = vmatpush.bf16.msra.mxu0 %v6028_v16  ;;  %v6005_v32 = vld [vmem:[#allocation6 + $0x168] sm:$0xf0]  ;;  %766 = vmatpush.bf16.msra.mxu1 %v6032_v17  ;;  %v6000_v33 = vor.u32 %v7030_v26, %v5997_v27  ;;  %v6004_v34 = vor.u32 %v7035_v30, %v6003_v28  ;;  %v5963_v35 = vld [vmem:[#allocation6 + $0x100] sm:$0xf]  ;;  %v7022_v37 = vld [vmem:[#allocation6 + $0x104] sm:$0xf] }
  0x37   : > { %795 = vmatpush.bf16.msra.mxu2 %v6036_v21  ;;  %v7026_v36 = vld [vmem:[#allocation6 + $0x11c] sm:$0xf0]  ;;  %v6008_v38 = vor.u32 %v7031_v31, %v6005_v32  ;;  %v5965_v39 = vld [vmem:[#allocation6 + $0x120] sm:$0xf0]  ;;  %v5971_v40 = vld [vmem:[#allocation6 + $0x108] sm:$0xf] }
  0x38   : > { %824 = vmatpush.bf16.msra.mxu3 %v6040_v25  ;;  %v7027_v41 = vld [vmem:[#allocation6 + $0x124] sm:$0xf0]  ;;  %v7023_v42 = vld [vmem:[#allocation6 + $0x10c] sm:$0xf]  ;;  %v5964_v44 = vor.u32 %v7026_v36, %v5963_v35  ;;  %v5968_v45 = vor.u32 %v7022_v37, %v5965_v39  ;;  %v5931_v47 = vld [vmem:[#allocation6 + $0xc0] sm:$0xf] }
  0x39   : > { %v5973_v43 = vld [vmem:[#allocation6 + $0x128] sm:$0xf0]  ;;  %v5972_v46 = vor.u32 %v7027_v41, %v5971_v40  ;;  %v7018_v48 = vld [vmem:[#allocation6 + $0xdc] sm:$0xf0]  ;;  %v7014_v49 = vld [vmem:[#allocation6 + $0xc4] sm:$0xf] }
  0x3a   : > { %738 = vmatpush.bf16.msra.mxu0 %v5996_v29  ;;  %767 = vmatpush.bf16.msra.mxu1 %v6000_v33  ;;  %v5976_v50 = vor.u32 %v7023_v42, %v5973_v43  ;;  %v5933_v51 = vld [vmem:[#allocation6 + $0xe0] sm:$0xf0]  ;;  %v5939_v52 = vld [vmem:[#allocation6 + $0xc8] sm:$0xf]  ;;  %v7015_v54 = vld [vmem:[#allocation6 + $0xcc] sm:$0xf]  ;;  %v5932_v56 = vor.u32 %v7018_v48, %v5931_v47 }
  0x3b   : > { %796 = vmatpush.bf16.msra.mxu2 %v6004_v34  ;;  %v7019_v53 = vld [vmem:[#allocation6 + $0xe4] sm:$0xf0]  ;;  %v5941_v55 = vld [vmem:[#allocation6 + $0xe8] sm:$0xf0]  ;;  %v5936_v57 = vor.u32 %v7014_v49, %v5933_v51  ;;  %v5899_v59 = vld [vmem:[#allocation6 + $0x80] sm:$0xf] }
  0x3c   : > { %825 = vmatpush.bf16.msra.mxu3 %v6008_v38  ;;  %v5940_v58 = vor.u32 %v7019_v53, %v5939_v52  ;;  %v7010_v60 = vld [vmem:[#allocation6 + $0x9c] sm:$0xf0]  ;;  %v7006_v61 = vld [vmem:[#allocation6 + $0x84] sm:$0xf]  ;;  %v5944_v62 = vor.u32 %v7015_v54, %v5941_v55  ;;  %v5907_v0 = vld [vmem:[#allocation6 + $0x88] sm:$0xf] }
  0x3d   : > { %v5901_v63 = vld [vmem:[#allocation6 + $0xa0] sm:$0xf0]  ;;  %v7011_v1 = vld [vmem:[#allocation6 + $0xa4] sm:$0xf0]  ;;  %v7007_v2 = vld [vmem:[#allocation6 + $0x8c] sm:$0xf]  ;;  %v5900_v4 = vor.u32 %v7010_v60, %v5899_v59 }
  0x3e   : > { %739 = vmatpush.bf16.msra.mxu0 %v5964_v44  ;;  %768 = vmatpush.bf16.msra.mxu1 %v5968_v45  ;;  %v5909_v3 = vld [vmem:[#allocation6 + $0xa8] sm:$0xf0]  ;;  %s5832_s0 = sshll.u32 %s7937_s25, 6  ;;  %v5904_v5 = vor.u32 %v7006_v61, %v5901_v63  ;;  %v5908_v6 = vor.u32 %v7011_v1, %v5907_v0  ;;  %v5867_v7 = vld [vmem:[#allocation6 + $0x40] sm:$0xf]  ;;  %s310_s15 = sand.u32 1, %s7858_s22  }
  0x3f   : > { %797 = vmatpush.bf16.msra.mxu2 %v5972_v46  ;;  %v7002_v8 = vld [vmem:[#allocation6 + $0x5c] sm:$0xf0]  ;;  %v6998_v9 = vld [vmem:[#allocation6 + $0x44] sm:$0xf]  ;;  %v5912_v10 = vor.u32 %v7007_v2, %v5909_v3  ;;  %v5875_v12 = vld [vmem:[#allocation6 + $0x48] sm:$0xf]  ;;  %s5712_s17 = scalar_lea.hbm %s9406_s6, %s5832_s0 }
  0x40   : > { %826 = vmatpush.bf16.msra.mxu3 %v5976_v50  ;;  %v5869_v11 = vld [vmem:[#allocation6 + $0x60] sm:$0xf0]  ;;  %v7003_v13 = vld [vmem:[#allocation6 + $0x64] sm:$0xf0]  ;;  %v6999_v14 = vld [vmem:[#allocation6 + $0x4c] sm:$0xf]  ;;  %v5868_v16 = vor.u32 %v7002_v8, %v5867_v7 }
  0x41   : > { %v5877_v15 = vld [vmem:[#allocation6 + $0x68] sm:$0xf0]  ;;  %v5835_v17 = vld [vmem:[#allocation6] sm:$0xf]  ;;  %v5872_v18 = vor.u32 %v6998_v9, %v5869_v11  ;;  %v5876_v19 = vor.u32 %v7003_v13, %v5875_v12  ;;  %v6990_v21 = vld [vmem:[#allocation6 + $0x4] sm:$0xf] }
  0x42   : > { %740 = vmatpush.bf16.msra.mxu0 %v5932_v56  ;;  %769 = vmatpush.bf16.msra.mxu1 %v5936_v57  ;;  %v6994_v20 = vld [vmem:[#allocation6 + $0x1c] sm:$0xf0]  ;;  %v5837_v22 = vld [vmem:[#allocation6 + $0x20] sm:$0xf0]  ;;  %v5880_v23 = vor.u32 %v6999_v14, %v5877_v15  ;;  %v5843_v24 = vld [vmem:[#allocation6 + $0x8] sm:$0xf] }
  0x43   : > { %798 = vmatpush.bf16.msra.mxu2 %v5940_v58  ;;  %v6995_v25 = vld [vmem:[#allocation6 + $0x24] sm:$0xf0]  ;;  %v6991_v26 = vld [vmem:[#allocation6 + $0xc] sm:$0xf]  ;;  %v6083_v28 = vld [vmem:[#allocation6 + $0x1d8] sm:$0xf]  ;;  %v5836_v30 = vor.u32 %v6994_v20, %v5835_v17  ;;  %v5840_v33 = vor.u32 %v6990_v21, %v5837_v22 }
  0x44   : > { %827 = vmatpush.bf16.msra.mxu3 %v5944_v62  ;;  %v5845_v27 = vld [vmem:[#allocation6 + $0x28] sm:$0xf0]  ;;  %v7053_v29 = vld [vmem:[#allocation6 + $0x1f4] sm:$0xf0]  ;;  %s8019_s3 = scalar_lea.vmem [#allocation3], %s5832_s0  ;;  %v5844_v34 = vor.u32 %v6995_v25, %v5843_v24  ;;  %s5831_s19 = sshll.u32 %s310_s15, 6 }
  0x45   : > { %v332_v31 = vld [vmem:[%s8019_s3] sm:$0xff]  ;;  %v333_v32 = vld [vmem:[%s8019_s3 + $0x8] sm:$0xff]  ;;  %v5848_v35 = vor.u32 %v6991_v26, %v5845_v27  ;;  %v6084_v36 = vor.u32 %v7053_v29, %v6083_v28  ;;  %v6075_v37 = vld [vmem:[#allocation6 + $0x1d0] sm:$0xf]  ;;  %s9326_s20 = scalar_lea.vmem [#allocation12], %s5831_s19  ;;  %s5715_s14 = sshll.u32 %s5712_s17, 4  ;;  %s5716_s14 = int_to_ptr.hbm [resolvable:$true] %s5715_s14 }
  0x46   : > { %741 = vmatpush.bf16.msra.mxu0 %v5900_v4  ;;  %770 = vmatpush.bf16.msra.mxu1 %v5904_v5  ;;  %v7052_v38 = vld [vmem:[#allocation6 + $0x1ec] sm:$0xf0]  ;;  %v8023_v39 = vpack.c.bf16 %v333_v32, %v332_v31  ;;  %v6051_v40 = vld [vmem:[#allocation6 + $0x198] sm:$0xf]  ;;  %v7048_v48 = vld [vmem:[#allocation6 + $0x1d4] sm:$0xf] }
  0x47   : > { %799 = vmatpush.bf16.msra.mxu2 %v5908_v6  ;;  %v7045_v41 = vld [vmem:[#allocation6 + $0x1b4] sm:$0xf0]  ;;  %v6076_v42 = vor.u32 %v7052_v38, %v6075_v37  ;;  %v6043_v46 = vld [vmem:[#allocation6 + $0x190] sm:$0xf]  ;;  %v6077_v49 = vld [vmem:[#allocation6 + $0x1f0] sm:$0xf0] }
  0x48   : > { %828 = vmatpush.bf16.msra.mxu3 %v5912_v10  ;;  %v6019_v43 = vld [vmem:[#allocation6 + $0x158] sm:$0xf]  ;;  %v6052_v44 = vor.u32 %v7045_v41, %v6051_v40  ;;  %v7044_v47 = vld [vmem:[#allocation6 + $0x1ac] sm:$0xf0]  ;;  %v7049_v50 = vld [vmem:[#allocation6 + $0x1dc] sm:$0xf]  ;;  %v6080_v51 = vor.u32 %v7048_v48, %v6077_v49 }
  0x49   : > { %v7037_v45 = vld [vmem:[#allocation6 + $0x174] sm:$0xf0]  ;;  %v6085_v52 = vld [vmem:[#allocation6 + $0x1f8] sm:$0xf0]  ;;  %v6044_v53 = vor.u32 %v7044_v47, %v6043_v46  ;;  %v6011_v55 = vld [vmem:[#allocation6 + $0x150] sm:$0xf] }
  0x4a   : > { %742 = vmatpush.bf16.msra.mxu0 %v5868_v16  ;;  %771 = vmatpush.bf16.msra.mxu1 %v5872_v18  ;;  %v5987_v54 = vld [vmem:[#allocation6 + $0x118] sm:$0xf]  ;;  %v6088_v56 = vor.u32 %v7049_v50, %v6085_v52  ;;  %v6020_v57 = vor.u32 %v7037_v45, %v6019_v43  ;;  %v7036_v58 = vld [vmem:[#allocation6 + $0x16c] sm:$0xf0]  ;;  %v7040_v59 = vld [vmem:[#allocation6 + $0x194] sm:$0xf] }
  0x4b   : > { %800 = vmatpush.bf16.msra.mxu2 %v5876_v19  ;;  %v6045_v60 = vld [vmem:[#allocation6 + $0x1b0] sm:$0xf0]  ;;  %v7029_v61 = vld [vmem:[#allocation6 + $0x134] sm:$0xf0]  ;;  %v7041_v63 = vld [vmem:[#allocation6 + $0x19c] sm:$0xf]  ;;  %v6012_v2 = vor.u32 %v7036_v58, %v6011_v55 }
  0x4c   : > { %829 = vmatpush.bf16.msra.mxu3 %v5880_v23  ;;  %v6048_v62 = vor.u32 %v7040_v59, %v6045_v60  ;;  %v6053_v0 = vld [vmem:[#allocation6 + $0x1b8] sm:$0xf0]  ;;  %v5955_v3 = vld [vmem:[#allocation6 + $0xd8] sm:$0xf]  ;;  %v7032_v4 = vld [vmem:[#allocation6 + $0x154] sm:$0xf]  ;;  %v5988_v8 = vor.u32 %v7029_v61, %v5987_v54 }
  0x4d   : > { %v6056_v1 = vor.u32 %v7041_v63, %v6053_v0  ;;  %v6013_v5 = vld [vmem:[#allocation6 + $0x170] sm:$0xf0]  ;;  %v7033_v6 = vld [vmem:[#allocation6 + $0x15c] sm:$0xf]  ;;  %v5979_v9 = vld [vmem:[#allocation6 + $0x110] sm:$0xf] }
  0x4e   : > { %743 = vmatpush.bf16.msra.mxu0 %v5836_v30  ;;  %772 = vmatpush.bf16.msra.mxu1 %v5840_v33  ;;  %v334_v7 = vld [vmem:[%s8019_s3 + $0x10] sm:$0xff]  ;;  %v6016_v11 = vor.u32 %v7032_v4, %v6013_v5  ;;  %v6021_v12 = vld [vmem:[#allocation6 + $0x178] sm:$0xf0]  ;;  %v7021_v13 = vld [vmem:[#allocation6 + $0xf4] sm:$0xf0]  ;;  %s5713_s12 = sshll.u32 %s9326_s20, 4  ;;  %s5714_s12 = int_to_ptr.vmem [resolvable:$true] %s5713_s12 }
  0x4f   : > { %801 = vmatpush.bf16.msra.mxu2 %v5844_v34  ;;  %v7028_v10 = vld [vmem:[#allocation6 + $0x12c] sm:$0xf0]  ;;  %v6024_v14 = vor.u32 %v7033_v6, %v6021_v12  ;;  %v7024_v15 = vld [vmem:[#allocation6 + $0x114] sm:$0xf]  ;;  %v335_v17 = vld [vmem:[%s8019_s3 + $0x18] sm:$0xff]  ;;  %v5956_v21 = vor.u32 %v7021_v13, %v5955_v3  ;;  %s5701_s26 = scalar_lea.sflag [#allocation5], %s310_s15 }
  0x50   : > { %830 = vmatpush.bf16.msra.mxu3 %v5848_v35  ;;  %v5981_v16 = vld [vmem:[#allocation6 + $0x130] sm:$0xf0]  ;;  %v7025_v18 = vld [vmem:[#allocation6 + $0x11c] sm:$0xf]  ;;  %v5980_v20 = vor.u32 %v7028_v10, %v5979_v9  ;;  %v5947_v22 = vld [vmem:[#allocation6 + $0xd0] sm:$0xf]  ;;  %v8031_v25 = vpack.c.bf16 %v335_v17, %v334_v7 }
  0x51   : > { %744 = vmatmul.bf16.vlgmr.msra.gmra.mxu0 %v8023_v39  ;;  %773 = vmatmul.bf16.vlgmr.msra.gmra.mxu1 %v8023_v39  ;;  %v5989_v19 = vld [vmem:[#allocation6 + $0x138] sm:$0xf0]  ;;  %v7020_v23 = vld [vmem:[#allocation6 + $0xec] sm:$0xf0]  ;;  %v5984_v24 = vor.u32 %v7024_v15, %v5981_v16  ;;  %v5923_v26 = vld [vmem:[#allocation6 + $0x98] sm:$0xf] }
  0x52   : > { %802 = vmatmul.bf16.vlgmr.msra.gmra.mxu2 %v8023_v39  ;;  %852 = vmatpush.bf16.msrb.mxu0 %v6076_v42  ;;  %v7013_v27 = vld [vmem:[#allocation6 + $0xb4] sm:$0xf0]  ;;  %v5992_v28 = vor.u32 %v7025_v18, %v5989_v19  ;;  %v5948_v29 = vor.u32 %v7020_v23, %v5947_v22  ;;  %v7016_v31 = vld [vmem:[#allocation6 + $0xd4] sm:$0xf]  ;;  %v7017_v33 = vld [vmem:[#allocation6 + $0xdc] sm:$0xf] }
  0x53   : > { %910 = vmatpush.bf16.msrb.mxu2 %v6084_v36  ;;  %831 = vmatmul.bf16.vlgmr.msra.gmra.mxu3 %v8023_v39  ;;  %v5924_v30 = vor.u32 %v7013_v27, %v5923_v26  ;;  %v5949_v32 = vld [vmem:[#allocation6 + $0xf0] sm:$0xf0]  ;;  %v5957_v35 = vld [vmem:[#allocation6 + $0xf8] sm:$0xf0]  ;;  %v5891_v36 = vld [vmem:[#allocation6 + $0x58] sm:$0xf] }
  0x54   : > { %881 = vmatpush.bf16.msrb.mxu1 %v6080_v51  ;;  %939 = vmatpush.bf16.msrb.mxu3 %v6088_v56  ;;  %v5952_v34 = vor.u32 %v7016_v31, %v5949_v32  ;;  %v7005_v37 = vld [vmem:[#allocation6 + $0x74] sm:$0xf0]  ;;  %v5915_v38 = vld [vmem:[#allocation6 + $0x90] sm:$0xf]  ;;  %v5960_v40 = vor.u32 %v7017_v33, %v5957_v35  ;;  %v7008_v43 = vld [vmem:[#allocation6 + $0x94] sm:$0xf] }
  0x55   : > { %v5892_v41 = vor.u32 %v7005_v37, %v5891_v36  ;;  %v7012_v42 = vld [vmem:[#allocation6 + $0xac] sm:$0xf0]  ;;  %v7009_v47 = vld [vmem:[#allocation6 + $0x9c] sm:$0xf]  ;;  %v5859_v49 = vld [vmem:[#allocation6 + $0x18] sm:$0xf] }
  0x56   : > { %853 = vmatpush.bf16.msrb.mxu0 %v6044_v53  ;;  %v5916_v45 = vor.u32 %v7012_v42, %v5915_v38  ;;  %v5925_v48 = vld [vmem:[#allocation6 + $0xb8] sm:$0xf0]  ;;  %v6997_v51 = vld [vmem:[#allocation6 + $0x34] sm:$0xf0]  ;;  %v5883_v52 = vld [vmem:[#allocation6 + $0x50] sm:$0xf] }
  0x57   : > { %911 = vmatpush.bf16.msrb.mxu2 %v6052_v44  ;;  %v5917_v44 = vld [vmem:[#allocation6 + $0xb0] sm:$0xf0]  ;;  %v5928_v50 = vor.u32 %v7009_v47, %v5925_v48  ;;  %v7004_v53 = vld [vmem:[#allocation6 + $0x6c] sm:$0xf0]  ;;  %v5860_v58 = vor.u32 %v6997_v51, %v5859_v49  ;;  %v5893_v60 = vld [vmem:[#allocation6 + $0x78] sm:$0xf0] }
  0x58   : > { %882 = vmatpush.bf16.msrb.mxu1 %v6048_v62  ;;  %940 = vmatpush.bf16.msrb.mxu3 %v6056_v1  ;;  %v5920_v46 = vor.u32 %v7008_v43, %v5917_v44  ;;  %v5884_v54 = vor.u32 %v7004_v53, %v5883_v52  ;;  %v7000_v55 = vld [vmem:[#allocation6 + $0x54] sm:$0xf]  ;;  %v5851_v61 = vld [vmem:[#allocation6 + $0x10] sm:$0xf]  ;;  %v336_v63 = vld [vmem:[%s8019_s3 + $0x20] sm:$0xff]  ;;  %s7806_s29 = sshra.s32 %s5716_s14, 4  ;;  %s7807_s29 = int_to_ptr.hbm [resolvable:$true] %s7806_s29 }
  0x59   : > { %v5885_v56 = vld [vmem:[#allocation6 + $0x70] sm:$0xf0]  ;;  %v6996_v62 = vld [vmem:[#allocation6 + $0x2c] sm:$0xf0]  ;;  %v337_v3 = vld [vmem:[%s8019_s3 + $0x28] sm:$0xff]  ;;  %s7808_s25 = scalar_lea.hbm %s7807_s29, 64  ;;  %p7813_p2 = scmp.lt.s32.totalorder %s7807_s29, %s9406_s6 }
  0x5a   : > { %854 = vmatpush.bf16.msrb.mxu0 %v6012_v2  ;;  %v5888_v59 = vor.u32 %v7000_v55, %v5885_v56  ;;  %v6992_v1 = vld [vmem:[#allocation6 + $0x14] sm:$0xf]  ;;  %v6993_v4 = vld [vmem:[#allocation6 + $0x1c] sm:$0xf]  ;;  %v5852_v6 = vor.u32 %v6996_v62, %v5851_v61  ;;  %v6323_v10 = vld [vmem:[#allocation8 + $0x1c8] sm:$0xf]  ;;  %p7809_p13 = scmp.ne.s32.totalorder %s7807_s29, %s7808_s25 }
  0x5b   : > { %912 = vmatpush.bf16.msrb.mxu2 %v6020_v57  ;;  %v7001_v57 = vld [vmem:[#allocation6 + $0x5c] sm:$0xf]  ;;  %v5853_v2 = vld [vmem:[#allocation6 + $0x30] sm:$0xf0]  ;;  %v6291_v12 = vld [vmem:[#allocation8 + $0x188] sm:$0xf] }
  0x5c   : > { %883 = vmatpush.bf16.msrb.mxu1 %v6016_v11  ;;  %941 = vmatpush.bf16.msrb.mxu3 %v6024_v14  ;;  %v5896_v0 = vor.u32 %v7001_v57, %v5893_v60  ;;  %v5861_v5 = vld [vmem:[#allocation6 + $0x38] sm:$0xf0]  ;;  %v5856_v7 = vor.u32 %v6992_v1, %v5853_v2  ;;  %v7115_v11 = vld [vmem:[#allocation8 + $0x1e4] sm:$0xf0]  ;;  %v6315_v15 = vld [vmem:[#allocation8 + $0x1c0] sm:$0xf]  ;;  %p7810_p0 = pnand %p7809_p13, %p7954_p5 }
  0x5d   : > { %v5864_v9 = vor.u32 %v6993_v4, %v5861_v5  ;;  %v6324_v13 = vor.u32 %v7115_v11, %v6323_v10  ;;  %v7107_v14 = vld [vmem:[#allocation8 + $0x1a4] sm:$0xf0]  ;;  %v7114_v16 = vld [vmem:[#allocation8 + $0x1dc] sm:$0xf0]  ;;  %v338_v19 = vld [vmem:[%s8019_s3 + $0x30] sm:$0xff]  ;;  %s7812_s28 = scalar_lea.hbm %s9406_s6, 128 }
  0x5e   : > { %855 = vmatpush.bf16.msrb.mxu0 %v5980_v20  ;;  %v6316_v17 = vor.u32 %v7114_v16, %v6315_v15  ;;  %v6292_v18 = vor.u32 %v7107_v14, %v6291_v12  ;;  %v339_v20 = vld [vmem:[%s8019_s3 + $0x38] sm:$0xff]  ;;  %v6259_v22 = vld [vmem:[#allocation8 + $0x148] sm:$0xf]  ;;  %v7106_v27 = vld [vmem:[#allocation8 + $0x19c] sm:$0xf0]  ;;  %p7811_p1 = pneg %p7810_p0  ;;  %p7814_p3 = scmp.lt.s32.totalorder %s7812_s28, %s7808_s25 }
  0x5f   : > { %913 = vmatpush.bf16.msrb.mxu2 %v5988_v8  ;;  %v8039_v8 = vpack.c.bf16 %v337_v3, %v336_v63  ;;  %v7099_v23 = vld [vmem:[#allocation8 + $0x164] sm:$0xf0]  ;;  %v6251_v31 = vld [vmem:[#allocation8 + $0x140] sm:$0xf]  ;;  %v7110_v35 = vld [vmem:[#allocation8 + $0x1c4] sm:$0xf] }
  0x60   : > { %884 = vmatpush.bf16.msrb.mxu1 %v5984_v24  ;;  %942 = vmatpush.bf16.msrb.mxu3 %v5992_v28  ;;  %v6283_v24 = vld [vmem:[#allocation8 + $0x180] sm:$0xf]  ;;  %v6260_v26 = vor.u32 %v7099_v23, %v6259_v22  ;;  %v6227_v28 = vld [vmem:[#allocation8 + $0x108] sm:$0xf]  ;;  %v6317_v36 = vld [vmem:[#allocation8 + $0x1e0] sm:$0xf0]  ;;  %p7815_p4 = por %p7814_p3, %p7813_p2 }
  0x61   : > { %749 = vmatmul.bf16.gmra.mxu0 %v8031_v25  ;;  %778 = vmatmul.bf16.gmra.mxu1 %v8031_v25  ;;  %v7098_v32 = vld [vmem:[#allocation8 + $0x15c] sm:$0xf0]  ;;  %v7111_v37 = vld [vmem:[#allocation8 + $0x1cc] sm:$0xf]  ;;  %v6320_v38 = vor.u32 %v7110_v35, %v6317_v36  ;;  %v7083_v42 = vld [vmem:[#allocation8 + $0xe4] sm:$0xf0] }
  0x62   : > { %807 = vmatmul.bf16.gmra.mxu2 %v8031_v25  ;;  %856 = vmatpush.bf16.msrb.mxu0 %v5948_v29  ;;  %v7091_v29 = vld [vmem:[#allocation8 + $0x124] sm:$0xf0]  ;;  %v6219_v43 = vld [vmem:[#allocation8 + $0x100] sm:$0xf]  ;;  %v7102_v47 = vld [vmem:[#allocation8 + $0x184] sm:$0xf]  ;;  %p7816_p7 = pnand %p7815_p4, %p7811_p1 }
  0x63   : > { %914 = vmatpush.bf16.msrb.mxu2 %v5956_v21  ;;  %836 = vmatmul.bf16.gmra.mxu3 %v8031_v25  ;;  %v8047_v21 = vpack.c.bf16 %v339_v20, %v338_v19  ;;  %v6228_v33 = vor.u32 %v7091_v29, %v6227_v28  ;;  %v6285_v48 = vld [vmem:[#allocation8 + $0x1a0] sm:$0xf0]  ;;  %v7103_v51 = vld [vmem:[#allocation8 + $0x18c] sm:$0xf]  ;;  %v6163_v53 = vld [vmem:[#allocation8 + $0x88] sm:$0xf] }
  0x64   : > { %885 = vmatpush.bf16.msrb.mxu1 %v5952_v34  ;;  %943 = vmatpush.bf16.msrb.mxu3 %v5960_v40  ;;  %v6252_v34 = vor.u32 %v7098_v32, %v6251_v31  ;;  %v6325_v40 = vld [vmem:[#allocation8 + $0x1e8] sm:$0xf0]  ;;  %v7075_v55 = vld [vmem:[#allocation8 + $0xa4] sm:$0xf0]  ;;  %v6187_v56 = vld [vmem:[#allocation8 + $0xc0] sm:$0xf] }
  0x65   : > { %v6328_v44 = vor.u32 %v7111_v37, %v6325_v40  ;;  %v6293_v52 = vld [vmem:[#allocation8 + $0x1a8] sm:$0xf0]  ;;  %v6164_v57 = vor.u32 %v7075_v55, %v6163_v53  ;;  %v6253_v60 = vld [vmem:[#allocation8 + $0x160] sm:$0xf0]  ;;  %v7067_v14 = vld [vmem:[#allocation8 + $0x64] sm:$0xf0] }
  0x66   : > { %857 = vmatpush.bf16.msrb.mxu0 %v5916_v45  ;;  %v7095_v61 = vld [vmem:[#allocation8 + $0x14c] sm:$0xf]  ;;  %v7086_v1 = vld [vmem:[#allocation8 + $0x104] sm:$0xf]  ;;  %v6155_v15 = vld [vmem:[#allocation8 + $0x80] sm:$0xf] }
  0x67   : > { %915 = vmatpush.bf16.msrb.mxu2 %v5924_v30  ;;  %v6284_v30 = vor.u32 %v7106_v27, %v6283_v24  ;;  %v6261_v63 = vld [vmem:[#allocation8 + $0x168] sm:$0xf0]  ;;  %v6221_v2 = vld [vmem:[#allocation8 + $0x120] sm:$0xf0]  ;;  %v6099_v27 = vld [vmem:[#allocation8 + $0x8] sm:$0xf] }
  0x68   : > { %886 = vmatpush.bf16.msrb.mxu1 %v5920_v46  ;;  %944 = vmatpush.bf16.msrb.mxu3 %v5928_v50  ;;  %v7090_v46 = vld [vmem:[#allocation8 + $0x11c] sm:$0xf0]  ;;  %v6288_v50 = vor.u32 %v7102_v47, %v6285_v48  ;;  %v7087_v3 = vld [vmem:[#allocation8 + $0x10c] sm:$0xf]  ;;  %v6224_v5 = vor.u32 %v7086_v1, %v6221_v2  ;;  %v7070_v19 = vld [vmem:[#allocation8 + $0x84] sm:$0xf] }
  0x69   : > { %v6220_v49 = vor.u32 %v7090_v46, %v6219_v43  ;;  %v6229_v4 = vld [vmem:[#allocation8 + $0x128] sm:$0xf0]  ;;  %v6157_v20 = vld [vmem:[#allocation8 + $0xa0] sm:$0xf0]  ;;  %v7059_v29 = vld [vmem:[#allocation8 + $0x24] sm:$0xf0] }
  0x6a   : > { %858 = vmatpush.bf16.msrb.mxu0 %v5884_v54  ;;  %v6296_v54 = vor.u32 %v7103_v51, %v6293_v52  ;;  %v7079_v10 = vld [vmem:[#allocation8 + $0xcc] sm:$0xf]  ;;  %v6160_v23 = vor.u32 %v7070_v19, %v6157_v20  ;;  %v6100_v31 = vor.u32 %v7059_v29, %v6099_v27  ;;  %v6091_v40 = vld [vmem:[#allocation8] sm:$0xf]  ;;  %v6331_v52 = vld [vmem:[#allocation8 + $0x1d0] sm:$0xf] }
  0x6b   : > { %916 = vmatpush.bf16.msrb.mxu2 %v5892_v41  ;;  %v6195_v41 = vld [vmem:[#allocation8 + $0xc8] sm:$0xf]  ;;  %v6197_v12 = vld [vmem:[#allocation8 + $0xe8] sm:$0xf0]  ;;  %v7116_v53 = vld [vmem:[#allocation8 + $0x1ec] sm:$0xf0] }
  0x6c   : > { %887 = vmatpush.bf16.msrb.mxu1 %v5888_v59  ;;  %945 = vmatpush.bf16.msrb.mxu3 %v5896_v0  ;;  %v6196_v45 = vor.u32 %v7083_v42, %v6195_v41  ;;  %v7094_v59 = vld [vmem:[#allocation8 + $0x144] sm:$0xf]  ;;  %v6264_v0 = vor.u32 %v7095_v61, %v6261_v63  ;;  %v6200_v16 = vor.u32 %v7079_v10, %v6197_v12  ;;  %v7071_v24 = vld [vmem:[#allocation8 + $0x8c] sm:$0xf]  ;;  %v7058_v41 = vld [vmem:[#allocation8 + $0x1c] sm:$0xf0] }
  0x6d   : > { %v6256_v62 = vor.u32 %v7094_v59, %v6253_v60  ;;  %v7063_v35 = vld [vmem:[#allocation8 + $0x4c] sm:$0xf]  ;;  %v7054_v42 = vld [vmem:[#allocation8 + $0x4] sm:$0xf]  ;;  %v6092_v43 = vor.u32 %v7058_v41, %v6091_v40  ;;  %v6307_v55 = vld [vmem:[#allocation8 + $0x198] sm:$0xf] }
  0x6e   : > { %859 = vmatpush.bf16.msrb.mxu0 %v5852_v6  ;;  %v6232_v6 = vor.u32 %v7087_v3, %v6229_v4  ;;  %v6133_v37 = vld [vmem:[#allocation8 + $0x68] sm:$0xf0]  ;;  %v7108_v59 = vld [vmem:[#allocation8 + $0x1ac] sm:$0xf0]  ;;  %v7101_v1 = vld [vmem:[#allocation8 + $0x174] sm:$0xf0] }
  0x6f   : > { %917 = vmatpush.bf16.msrb.mxu2 %v5860_v58  ;;  %v6101_v46 = vld [vmem:[#allocation8 + $0x28] sm:$0xf0]  ;;  %v317_v12 = vld [vmem:[#allocation3 + $0x10] sm:$0xff] }
  0x70   : > { %888 = vmatpush.bf16.msrb.mxu1 %v5856_v7  ;;  %946 = vmatpush.bf16.msrb.mxu3 %v5864_v9  ;;  %v7078_v7 = vld [vmem:[#allocation8 + $0xc4] sm:$0xf] }
  0x71   : > { %754 = vmatmul.bf16.gmra.mxu0 %v8039_v8  ;;  %783 = vmatmul.bf16.gmra.mxu1 %v8039_v8  ;;  %v6189_v9 = vld [vmem:[#allocation8 + $0xe0] sm:$0xf0] }
  0x72   : > { %812 = vmatmul.bf16.gmra.mxu2 %v8039_v8  ;;  %1384 = vmatpush.bf16.msra.mxu0 %v6316_v17  ;;  %v6192_v11 = vor.u32 %v7078_v7, %v6189_v9 }
  0x73   : > { %841 = vmatmul.bf16.gmra.mxu3 %v8039_v8  ;;  %1482 = vmatpush.bf16.msra.mxu2 %v6324_v13  ;;  %v6131_v13 = vld [vmem:[#allocation8 + $0x48] sm:$0xf] }
  0x74   : > { %1433 = vmatpush.bf16.msra.mxu1 %v6320_v38  ;;  %1531 = vmatpush.bf16.msra.mxu3 %v6328_v44  ;;  %v6132_v17 = vor.u32 %v7067_v14, %v6131_v13  ;;  %v6136_v38 = vor.u32 %v7063_v35, %v6133_v37  ;;  %v6093_v44 = vld [vmem:[#allocation8 + $0x20] sm:$0xf0]  ;;  %v6243_v35 = vld [vmem:[#allocation8 + $0x118] sm:$0xf] }
  0x75   : > { %v6096_v47 = vor.u32 %v7054_v42, %v6093_v44 }
  0x76   : > { %1385 = vmatpush.bf16.msra.mxu0 %v6284_v30  ;;  %v6123_v30 = vld [vmem:[#allocation8 + $0x40] sm:$0xf] }
  0x77   : > { %1483 = vmatpush.bf16.msra.mxu2 %v6292_v18  ;;  %v7074_v18 = vld [vmem:[#allocation8 + $0x9c] sm:$0xf0] }
  0x78   : > { %1434 = vmatpush.bf16.msra.mxu1 %v6288_v50  ;;  %1532 = vmatpush.bf16.msra.mxu3 %v6296_v54  ;;  %v6156_v22 = vor.u32 %v7074_v18, %v6155_v15  ;;  %v7117_v50 = vld [vmem:[#allocation8 + $0x1f4] sm:$0xf0]  ;;  %v6332_v54 = vor.u32 %v7116_v53, %v6331_v52  ;;  %v7092_v52 = vld [vmem:[#allocation8 + $0x12c] sm:$0xf0] }
  0x79   : > { %v318_v15 = vld [vmem:[#allocation3 + $0x18] sm:$0xff] }
  0x7a   : > { %1386 = vmatpush.bf16.msra.mxu0 %v6252_v34  ;;  %v6125_v34 = vld [vmem:[#allocation8 + $0x60] sm:$0xf0] }
  0x7b   : > { %1484 = vmatpush.bf16.msra.mxu2 %v6260_v26  ;;  %v6165_v26 = vld [vmem:[#allocation8 + $0xa8] sm:$0xf0] }
  0x7c   : > { %1435 = vmatpush.bf16.msra.mxu1 %v6256_v62  ;;  %1533 = vmatpush.bf16.msra.mxu3 %v6264_v0  ;;  %v6168_v28 = vor.u32 %v7071_v24, %v6165_v26 }
  0x7e   : > { %1387 = vmatpush.bf16.msra.mxu0 %v6220_v49  ;;  %v6339_v49 = vld [vmem:[#allocation8 + $0x1d8] sm:$0xf] }
  0x7f   : > { %1485 = vmatpush.bf16.msra.mxu2 %v6228_v33  ;;  %v7062_v33 = vld [vmem:[#allocation8 + $0x44] sm:$0xf]  ;;  %v6340_v51 = vor.u32 %v7117_v50, %v6339_v49  ;;  %v320_v50 = vld [vmem:[#allocation3 + $0x28] sm:$0xff] }
  0x80   : > { %1436 = vmatpush.bf16.msra.mxu1 %v6224_v5  ;;  %1534 = vmatpush.bf16.msra.mxu3 %v6232_v6  ;;  %v6128_v36 = vor.u32 %v7062_v33, %v6125_v34 }
  0x81   : > { %759 = vmatmul.bf16.gmra.mxu0 %v8047_v21  ;;  %788 = vmatmul.bf16.gmra.mxu1 %v8047_v21 }
  0x82   : > { %817 = vmatmul.bf16.gmra.mxu2 %v8047_v21 }
  0x83   : > { %846 = vmatmul.bf16.gmra.mxu3 %v8047_v21  ;;  %1486 = vmatpush.bf16.msra.mxu2 %v6196_v45  ;;  %v7055_v45 = vld [vmem:[#allocation8 + $0xc] sm:$0xf] }
  0x84   : > { %1437 = vmatpush.bf16.msra.mxu1 %v6192_v11  ;;  %1535 = vmatpush.bf16.msra.mxu3 %v6200_v16  ;;  %v6104_v48 = vor.u32 %v7055_v45, %v6101_v46  ;;  %v6267_v16 = vld [vmem:[#allocation8 + $0x150] sm:$0xf] }
  0x87   : > { %1487 = vmatpush.bf16.msra.mxu2 %v6164_v57  ;;  %v316_v57 = vld [vmem:[#allocation3 + $0x8] sm:$0xff] }
  0x88   : > { %1438 = vmatpush.bf16.msra.mxu1 %v6160_v23  ;;  %1536 = vmatpush.bf16.msra.mxu3 %v6168_v28  ;;  %v8079_v23 = vpack.c.bf16 %v318_v15, %v317_v12 }
  0x8b   : > { %1488 = vmatpush.bf16.msra.mxu2 %v6132_v17  ;;  %v7100_v17 = vld [vmem:[#allocation8 + $0x16c] sm:$0xf0] }
  0x8c   : > { %1439 = vmatpush.bf16.msra.mxu1 %v6128_v36  ;;  %1537 = vmatpush.bf16.msra.mxu3 %v6136_v38  ;;  %v6268_v18 = vor.u32 %v7100_v17, %v6267_v16  ;;  %v7093_v36 = vld [vmem:[#allocation8 + $0x134] sm:$0xf0]  ;;  %v321_v17 = vld [vmem:[#allocation3 + $0x30] sm:$0xff] }
  0x8d   : > { %v6244_v37 = vor.u32 %v7093_v36, %v6243_v35 }
  0x8f   : > { %1489 = vmatpush.bf16.msra.mxu2 %v6100_v31 }
  0x90   : > { %1440 = vmatpush.bf16.msra.mxu1 %v6096_v47  ;;  %1538 = vmatpush.bf16.msra.mxu3 %v6104_v48  ;;  %v319_v47 = vld [vmem:[#allocation3 + $0x20] sm:$0xff] }
  0x91   : > { %860 = vmatmul.bf16.vlgmr.msrb.gmra.mxu0 %v8023_v39  ;;  %889 = vmatmul.bf16.vlgmr.msrb.gmra.mxu1 %v8023_v39 }
  0x92   : > { %918 = vmatmul.bf16.vlgmr.msrb.gmra.mxu2 %v8023_v39 }
  0x93   : > { %947 = vmatmul.bf16.vlgmr.msrb.gmra.mxu3 %v8023_v39  ;;  %v7082_v39 = vld [vmem:[#allocation8 + $0xdc] sm:$0xf0]  ;;  %1678 = vmatpush.bf16.msrb.mxu2 %v6340_v51  ;;  %v6235_v51 = vld [vmem:[#allocation8 + $0x110] sm:$0xf] }
  0x94   : > { %v6188_v58 = vor.u32 %v7082_v39, %v6187_v56  ;;  %v7109_v56 = vld [vmem:[#allocation8 + $0x1b4] sm:$0xf0]  ;;  %v315_v39 = vld [vmem:[#allocation3] sm:$0xff]  ;;  %v6236_v53 = vor.u32 %v7092_v52, %v6235_v51 }
  0x95   : > { %v8069_v61 = vpack.c.bf16 %v316_v57, %v315_v39 }
  0x96   : > { %1388 = vmatpush.bf16.msra.mxu0 %v6188_v58  ;;  %v6299_v58 = vld [vmem:[#allocation8 + $0x190] sm:$0xf] }
  0x97   : > { %v6300_v60 = vor.u32 %v7108_v59, %v6299_v58 }
  0x9a   : > { %1389 = vmatpush.bf16.msra.mxu0 %v6156_v22 }
  0xa1   : > { %865 = vmatmul.bf16.gmra.mxu0 %v8031_v25  ;;  %894 = vmatmul.bf16.gmra.mxu1 %v8031_v25 }
  0xa2   : > { %923 = vmatmul.bf16.gmra.mxu2 %v8031_v25 }
  0xa3   : > { %952 = vmatmul.bf16.gmra.mxu3 %v8031_v25  ;;  %v7066_v25 = vld [vmem:[#allocation8 + $0x5c] sm:$0xf0] }
  0xa4   : > { %v6124_v32 = vor.u32 %v7066_v25, %v6123_v30 }
  0xa6   : > { %1390 = vmatpush.bf16.msra.mxu0 %v6124_v32 }
  0xaa   : > { %1391 = vmatpush.bf16.msra.mxu0 %v6092_v43 }
  0xae   : > { %1580 = vmatpush.bf16.msrb.mxu0 %v6332_v54 }
  0xb1   : > { %870 = vmatmul.bf16.gmra.mxu0 %v8039_v8  ;;  %899 = vmatmul.bf16.gmra.mxu1 %v8039_v8 }
  0xb2   : > { %928 = vmatmul.bf16.gmra.mxu2 %v8039_v8  ;;  %1581 = vmatpush.bf16.msrb.mxu0 %v6300_v60 }
  0xb3   : > { %957 = vmatmul.bf16.gmra.mxu3 %v8039_v8  ;;  %v6308_v8 = vor.u32 %v7109_v56, %v6307_v55 }
  0xb5   : > { %1679 = vmatpush.bf16.msrb.mxu2 %v6308_v8  ;;  %v8093_v8 = vpack.c.bf16 %v320_v50, %v319_v47 }
  0xb6   : > { %1582 = vmatpush.bf16.msrb.mxu0 %v6268_v18  ;;  %v322_v18 = vld [vmem:[#allocation3 + $0x38] sm:$0xff] }
  0xba   : > { %1583 = vmatpush.bf16.msrb.mxu0 %v6236_v53 }
  0xc1   : > { %875 = vmatmul.bf16.gmra.mxu0 %v8047_v21  ;;  %904 = vmatmul.bf16.gmra.mxu1 %v8047_v21 }
  0xc2   : > { %933 = vmatmul.bf16.gmra.mxu2 %v8047_v21 }
  0xc3   : > { %962 = vmatmul.bf16.gmra.mxu3 %v8047_v21  ;;  %v6275_v21 = vld [vmem:[#allocation8 + $0x158] sm:$0xf] }
  0xc4   : > { %v6276_v2 = vor.u32 %v7101_v1, %v6275_v21  ;;  %v6211_v1 = vld [vmem:[#allocation8 + $0xd8] sm:$0xf] }
  0xc6   : > { %1680 = vmatpush.bf16.msrb.mxu2 %v6276_v2  ;;  %v7085_v2 = vld [vmem:[#allocation8 + $0xf4] sm:$0xf0] }
  0xca   : > { %1681 = vmatpush.bf16.msrb.mxu2 %v6244_v37 }
  0xce   : > { %v745_v62 = vpop.f32.mrf.mxu0  ;;  %v774_v63 = vpop.f32.mrf.mxu1 }
  0xcf   : > { %v968_v0 = vpack.c.bf16 %v774_v63, %v745_v62 }
  0xd1   : > { %1392 = vmatmul.bf16.vlgmr.msra.gmra.mxu0 %v8069_v61  ;;  %1441 = vmatmul.bf16.vlgmr.msra.gmra.mxu1 %v8069_v61  ;;  %v2688_v9 = vunpack.c.l.b16 %v968_v0  ;;  %v2958_v10 = vunpack.c.h.b16 %v968_v0 }
  0xd2   : > { %1490 = vmatmul.bf16.vlgmr.msra.gmra.mxu2 %v8069_v61 }
  0xd3   : > { %1539 = vmatmul.bf16.vlgmr.msra.gmra.mxu3 %v8069_v61 }
  0xd5   : > { %v803_v3 = vpop.f32.mrf.mxu2 }
  0xd6   : > { %v832_v4 = vpop.f32.mrf.mxu3  ;;  %v747_v5 = vpop.f32.mrf.mxu0 }
  0xd7   : > { %v969_v6 = vpack.c.bf16 %v832_v4, %v803_v3  ;;  %v776_v7 = vpop.f32.mrf.mxu1 }
  0xd8   : > { %v972_v11 = vpack.c.bf16 %v776_v7, %v747_v5  ;;  %v6212_v5 = vor.u32 %v7085_v2, %v6211_v1 }
  0xd9   : > { %v3204_v30 = vunpack.c.l.b16 %v969_v6  ;;  %v3474_v25 = vunpack.c.h.b16 %v969_v6 }
  0xda   : > { %v2689_v13 = vunpack.c.l.b16 %v972_v11  ;;  %v2959_v14 = vunpack.c.h.b16 %v972_v11  ;;  %1682 = vmatpush.bf16.msrb.mxu2 %v6212_v5 }
  0xdc   : > { %v8075_v19 = vpack.c.b16 %v2689_v13, %v2688_v9  ;;  %v8077_v20 = vpack.c.b16 %v2959_v14, %v2958_v10 }
  0xdd   : > { %v805_v22 = vpop.f32.mrf.mxu2 }
  0xde   : > { %9427 = vst [vmem:[#allocation18_spill] sm:$0xff] %v8077_v20  ;;  %v834_v24 = vpop.f32.mrf.mxu3  ;;  %v750_v26 = vpop.f32.mrf.mxu0 }
  0xdf   : > { %v973_v27 = vpack.c.bf16 %v834_v24, %v805_v22  ;;  %v779_v28 = vpop.f32.mrf.mxu1  ;;  %v6203_v22 = vld [vmem:[#allocation8 + $0xd0] sm:$0xf] }
  0xe0   : > { %v976_v29 = vpack.c.bf16 %v779_v28, %v750_v26  ;;  %v7084_v24 = vld [vmem:[#allocation8 + $0xec] sm:$0xf0] }
  0xe1   : > { %v3205_v31 = vunpack.c.l.b16 %v973_v27  ;;  %v3475_v32 = vunpack.c.h.b16 %v973_v27  ;;  %1397 = vmatmul.bf16.gmra.mxu0 %v8079_v23  ;;  %1446 = vmatmul.bf16.gmra.mxu1 %v8079_v23 }
  0xe2   : > { %1495 = vmatmul.bf16.gmra.mxu2 %v8079_v23  ;;  %v2690_v44 = vunpack.c.l.b16 %v976_v29  ;;  %v2960_v45 = vunpack.c.h.b16 %v976_v29  ;;  %v8107_v29 = vpack.c.bf16 %v322_v18, %v321_v17  ;;  %v7113_v17 = vld [vmem:[#allocation8 + $0x1dc] sm:$0xf] }
  0xe3   : > { %v8084_v33 = vpack.c.b16 %v3205_v31, %v3204_v30  ;;  %v8086_v34 = vpack.c.b16 %v3475_v32, %v3474_v25  ;;  %1544 = vmatmul.bf16.gmra.mxu3 %v8079_v23  ;;  %v6204_v30 = vor.u32 %v7084_v24, %v6203_v22  ;;  %v6341_v22 = vld [vmem:[#allocation8 + $0x1f8] sm:$0xf0]  ;;  %v6147_v24 = vld [vmem:[#allocation8 + $0x58] sm:$0xf] }
  0xe5   : > { %9428 = vst [vmem:[#allocation19_spill] sm:$0xff] %v8084_v33  ;;  %v808_v38 = vpop.f32.mrf.mxu2  ;;  %1584 = vmatpush.bf16.msrb.mxu0 %v6204_v30  ;;  %v6344_v30 = vor.u32 %v7113_v17, %v6341_v22  ;;  %v7132_v33 = vld [vmem:[#allocation9 + $0x6c] sm:$0xf0] }
  0xe6   : > { %9429 = vst [vmem:[#allocation20_spill] sm:$0xff] %v8086_v34  ;;  %v837_v40 = vpop.f32.mrf.mxu3  ;;  %v752_v41 = vpop.f32.mrf.mxu0 }
  0xe7   : > { %v977_v42 = vpack.c.bf16 %v837_v40, %v808_v38  ;;  %v781_v43 = vpop.f32.mrf.mxu1  ;;  %1727 = vmatpush.bf16.msrb.mxu3 %v6344_v30 }
  0xe8   : > { %v980_v46 = vpack.c.bf16 %v781_v43, %v752_v41  ;;  %v7077_v43 = vld [vmem:[#allocation8 + $0xb4] sm:$0xf0] }
  0xe9   : > { %v3206_v62 = vunpack.c.l.b16 %v977_v42  ;;  %v3476_v63 = vunpack.c.h.b16 %v977_v42  ;;  %v6179_v42 = vld [vmem:[#allocation8 + $0x98] sm:$0xf] }
  0xea   : > { %v2691_v48 = vunpack.c.l.b16 %v980_v46  ;;  %v2961_v49 = vunpack.c.h.b16 %v980_v46  ;;  %v6180_v46 = vor.u32 %v7077_v43, %v6179_v42  ;;  %v6309_v43 = vld [vmem:[#allocation8 + $0x1b8] sm:$0xf0] }
  0xec   : > { %v8089_v54 = vpack.c.b16 %v2691_v48, %v2690_v44  ;;  %v8091_v55 = vpack.c.b16 %v2961_v49, %v2960_v45  ;;  %1683 = vmatpush.bf16.msrb.mxu2 %v6180_v46 }
  0xed   : > { %v810_v56 = vpop.f32.mrf.mxu2 }
  0xee   : > { %9430 = vst [vmem:[#allocation21_spill] sm:$0xff] %v8089_v54  ;;  %v839_v39 = vpop.f32.mrf.mxu3  ;;  %v755_v57 = vpop.f32.mrf.mxu0 }
  0xef   : > { %9431 = vst [vmem:[#allocation22_spill] sm:$0xff] %v8091_v55  ;;  %v981_v58 = vpack.c.bf16 %v839_v39, %v810_v56  ;;  %v784_v59 = vpop.f32.mrf.mxu1  ;;  %v323_v39 = vld [vmem:[#allocation3 + $0x40] sm:$0xff] }
  0xf0   : > { %v984_v60 = vpack.c.bf16 %v784_v59, %v755_v57  ;;  %v324_v59 = vld [vmem:[#allocation3 + $0x48] sm:$0xff] }
  0xf1   : > { %v3207_v0 = vunpack.c.l.b16 %v981_v58  ;;  %v3477_v21 = vunpack.c.h.b16 %v981_v58  ;;  %1402 = vmatmul.bf16.gmra.mxu0 %v8093_v8  ;;  %1451 = vmatmul.bf16.gmra.mxu1 %v8093_v8  ;;  %v8121_v2 = vpack.c.bf16 %v324_v59, %v323_v39  ;;  %v6269_v39 = vld [vmem:[#allocation8 + $0x170] sm:$0xf0] }
  0xf2   : > { %1500 = vmatmul.bf16.gmra.mxu2 %v8093_v8  ;;  %v2692_v12 = vunpack.c.l.b16 %v984_v60  ;;  %v2962_v13 = vunpack.c.h.b16 %v984_v60  ;;  %v6171_v60 = vld [vmem:[#allocation8 + $0x90] sm:$0xf] }
  0xf3   : > { %1549 = vmatmul.bf16.gmra.mxu3 %v8093_v8  ;;  %v8099_v3 = vpack.c.b16 %v3207_v0, %v3206_v62  ;;  %v8101_v4 = vpack.c.b16 %v3477_v21, %v3476_v63  ;;  %v7076_v62 = vld [vmem:[#allocation8 + $0xac] sm:$0xf0] }
  0xf4   : > { %v6172_v63 = vor.u32 %v7076_v62, %v6171_v60  ;;  %v6139_v60 = vld [vmem:[#allocation8 + $0x50] sm:$0xf] }
  0xf5   : > { %9432 = vst [vmem:[#allocation23_spill] sm:$0xff] %v8099_v3  ;;  %v813_v6 = vpop.f32.mrf.mxu2  ;;  %v7068_v62 = vld [vmem:[#allocation8 + $0x6c] sm:$0xf0]  ;;  %v7135_v3 = vld [vmem:[#allocation9 + $0x8c] sm:$0xf] }
  0xf6   : > { %9433 = vst [vmem:[#allocation24_spill] sm:$0xff] %v8101_v4  ;;  %v842_v7 = vpop.f32.mrf.mxu3  ;;  %v757_v9 = vpop.f32.mrf.mxu0  ;;  %1585 = vmatpush.bf16.msrb.mxu0 %v6172_v63  ;;  %v6413_v4 = vld [vmem:[#allocation9 + $0xa0] sm:$0xf0] }
  0xf7   : > { %v985_v10 = vpack.c.bf16 %v842_v7, %v813_v6  ;;  %v786_v11 = vpop.f32.mrf.mxu1 }
  0xf8   : > { %v988_v14 = vpack.c.bf16 %v786_v11, %v757_v9 }
  0xf9   : > { %v3208_v37 = vunpack.c.l.b16 %v985_v10  ;;  %v3478_v38 = vunpack.c.h.b16 %v985_v10 }
  0xfa   : > { %v2693_v15 = vunpack.c.l.b16 %v988_v14  ;;  %v2963_v16 = vunpack.c.h.b16 %v988_v14 }
  0xfc   : > { %v8103_v26 = vpack.c.b16 %v2693_v15, %v2692_v12  ;;  %v8105_v27 = vpack.c.b16 %v2963_v16, %v2962_v13  ;;  %v7112_v15 = vld [vmem:[#allocation8 + $0x1d4] sm:$0xf] }
  0xfd   : > { %v815_v28 = vpop.f32.mrf.mxu2  ;;  %v6333_v16 = vld [vmem:[#allocation8 + $0x1f0] sm:$0xf0] }
  0xfe   : > { %9434 = vst [vmem:[#allocation25_spill] sm:$0xff] %v8103_v26  ;;  %v844_v25 = vpop.f32.mrf.mxu3  ;;  %v760_v31 = vpop.f32.mrf.mxu0  ;;  %v6336_v18 = vor.u32 %v7112_v15, %v6333_v16 }
  0xff   : > { %9435 = vst [vmem:[#allocation26_spill] sm:$0xff] %v8105_v27  ;;  %v989_v32 = vpack.c.bf16 %v844_v25, %v815_v28  ;;  %v789_v35 = vpop.f32.mrf.mxu1  ;;  %v7069_v28 = vld [vmem:[#allocation8 + $0x74] sm:$0xf0] }
 0x100   : > { %v992_v36 = vpack.c.bf16 %v789_v35, %v760_v31  ;;  %1629 = vmatpush.bf16.msrb.mxu1 %v6336_v18  ;;  %v6245_v18 = vld [vmem:[#allocation8 + $0x138] sm:$0xf0] }
 0x101   : > { %v3209_v40 = vunpack.c.l.b16 %v989_v32  ;;  %v3479_v41 = vunpack.c.h.b16 %v989_v32  ;;  %1407 = vmatmul.bf16.gmra.mxu0 %v8107_v29  ;;  %1456 = vmatmul.bf16.gmra.mxu1 %v8107_v29  ;;  %v6148_v32 = vor.u32 %v7069_v28, %v6147_v24 }
 0x102   : > { %1505 = vmatmul.bf16.gmra.mxu2 %v8107_v29  ;;  %v2694_v52 = vunpack.c.l.b16 %v992_v36  ;;  %v2964_v53 = vunpack.c.h.b16 %v992_v36  ;;  %v7104_v36 = vld [vmem:[#allocation8 + $0x194] sm:$0xf] }
 0x103   : > { %1554 = vmatmul.bf16.gmra.mxu3 %v8107_v29  ;;  %v8113_v44 = vpack.c.b16 %v3209_v40, %v3208_v37  ;;  %v8115_v45 = vpack.c.b16 %v3479_v41, %v3478_v38  ;;  %v6301_v37 = vld [vmem:[#allocation8 + $0x1b0] sm:$0xf0]  ;;  %v7105_v38 = vld [vmem:[#allocation8 + $0x19c] sm:$0xf]  ;;  %1684 = vmatpush.bf16.msrb.mxu2 %v6148_v32 }
 0x104   : > { %v6304_v42 = vor.u32 %v7104_v36, %v6301_v37 }
 0x105   : > { %9436 = vst [vmem:[#allocation27_spill] sm:$0xff] %v8113_v44  ;;  %v818_v47 = vpop.f32.mrf.mxu2  ;;  %v7164_v44 = vld [vmem:[#allocation9 + $0x16c] sm:$0xf0] }
 0x106   : > { %9437 = vst [vmem:[#allocation28_spill] sm:$0xff] %v8115_v45  ;;  %v847_v48 = vpop.f32.mrf.mxu3  ;;  %v762_v49 = vpop.f32.mrf.mxu0  ;;  %1630 = vmatpush.bf16.msrb.mxu1 %v6304_v42  ;;  %v6523_v45 = vld [vmem:[#allocation9 + $0x150] sm:$0xf] }
 0x107   : > { %v993_v50 = vpack.c.bf16 %v847_v48, %v818_v47  ;;  %v791_v51 = vpop.f32.mrf.mxu1  ;;  %v6312_v48 = vor.u32 %v7105_v38, %v6309_v43  ;;  %v7080_v38 = vld [vmem:[#allocation8 + $0xd4] sm:$0xf]  ;;  %v6213_v43 = vld [vmem:[#allocation8 + $0xf8] sm:$0xf0] }
 0x108   : > { %v996_v56 = vpack.c.bf16 %v791_v51, %v762_v49 }
 0x109   : > { %v3210_v11 = vunpack.c.l.b16 %v993_v50  ;;  %v3480_v12 = vunpack.c.h.b16 %v993_v50  ;;  %1728 = vmatpush.bf16.msrb.mxu3 %v6312_v48 }
 0x10a   : > { %v2695_v57 = vunpack.c.l.b16 %v996_v56  ;;  %v2965_v58 = vunpack.c.h.b16 %v996_v56  ;;  %v7096_v56 = vld [vmem:[#allocation8 + $0x154] sm:$0xf] }
 0x10b   : > { %v6272_v63 = vor.u32 %v7096_v56, %v6269_v39  ;;  %v6173_v56 = vld [vmem:[#allocation8 + $0xb0] sm:$0xf0]  ;;  %v7073_v39 = vld [vmem:[#allocation8 + $0x9c] sm:$0xf] }
 0x10c   : > { %v8117_v0 = vpack.c.b16 %v2695_v57, %v2694_v52  ;;  %v8119_v21 = vpack.c.b16 %v2965_v58, %v2964_v53  ;;  %v325_v52 = vld [vmem:[#allocation3 + $0x50] sm:$0xff]  ;;  %v326_v53 = vld [vmem:[#allocation3 + $0x58] sm:$0xff] }
 0x10d   : > { %v820_v1 = vpop.f32.mrf.mxu2  ;;  %v7097_v57 = vld [vmem:[#allocation8 + $0x15c] sm:$0xf]  ;;  %1631 = vmatpush.bf16.msrb.mxu1 %v6272_v63 }
 0x10e   : > { %9438 = vst [vmem:[#allocation29_spill] sm:$0xff] %v8117_v0  ;;  %v849_v5 = vpop.f32.mrf.mxu3  ;;  %v861_v6 = vpop.f32.mrf.mxu0 }
 0x10f   : > { %9439 = vst [vmem:[#allocation30_spill] sm:$0xff] %v8119_v21  ;;  %v997_v7 = vpack.c.bf16 %v849_v5, %v820_v1  ;;  %v890_v9 = vpop.f32.mrf.mxu1  ;;  %v6277_v1 = vld [vmem:[#allocation8 + $0x178] sm:$0xf0]  ;;  %v6140_v5 = vor.u32 %v7068_v62, %v6139_v60 }
 0x110   : > { %v970_v10 = vpack.c.bf16 %v890_v9, %v861_v6  ;;  %v6280_v6 = vor.u32 %v7097_v57, %v6277_v1  ;;  %v6181_v60 = vld [vmem:[#allocation8 + $0xb8] sm:$0xf0] }
 0x111   : > { %v3211_v13 = vunpack.c.l.b16 %v997_v7  ;;  %v3481_v14 = vunpack.c.h.b16 %v997_v7  ;;  %1412 = vmatmul.bf16.gmra.mxu0 %v8121_v2  ;;  %1461 = vmatmul.bf16.gmra.mxu1 %v8121_v2  ;;  %v6184_v1 = vor.u32 %v7073_v39, %v6181_v60 }
 0x112   : > { %1510 = vmatmul.bf16.gmra.mxu2 %v8121_v2  ;;  %v3720_v49 = vunpack.c.l.b16 %v970_v10  ;;  %v3990_v50 = vunpack.c.h.b16 %v970_v10  ;;  %1586 = vmatpush.bf16.msrb.mxu0 %v6140_v5 }
 0x113   : > { %1559 = vmatmul.bf16.gmra.mxu3 %v8121_v2  ;;  %v8127_v25 = vpack.c.b16 %v3211_v13, %v3210_v11  ;;  %v8129_v31 = vpack.c.b16 %v3481_v14, %v3480_v12  ;;  %v8135_v11 = vpack.c.bf16 %v326_v53, %v325_v52  ;;  %v7088_v12 = vld [vmem:[#allocation8 + $0x114] sm:$0xf]  ;;  %v7089_v14 = vld [vmem:[#allocation8 + $0x11c] sm:$0xf] }
 0x114   : > { %1729 = vmatpush.bf16.msrb.mxu3 %v6280_v6  ;;  %v6237_v13 = vld [vmem:[#allocation8 + $0x130] sm:$0xf0]  ;;  %v6248_v28 = vor.u32 %v7089_v14, %v6245_v18 }
 0x115   : > { %9440 = vst [vmem:[#allocation31_spill] sm:$0xff] %v8127_v25  ;;  %v919_v35 = vpop.f32.mrf.mxu2  ;;  %v6240_v17 = vor.u32 %v7088_v12, %v6237_v13  ;;  %v7072_v53 = vld [vmem:[#allocation8 + $0x94] sm:$0xf]  ;;  %v327_v12 = vld [vmem:[#allocation3 + $0x60] sm:$0xff]  ;;  %v328_v13 = vld [vmem:[#allocation3 + $0x68] sm:$0xff] }
 0x116   : > { %9441 = vst [vmem:[#allocation32_spill] sm:$0xff] %v8129_v31  ;;  %v948_v40 = vpop.f32.mrf.mxu3  ;;  %v863_v41 = vpop.f32.mrf.mxu0  ;;  %v7064_v14 = vld [vmem:[#allocation8 + $0x54] sm:$0xf] }
 0x117   : > { %v971_v46 = vpack.c.bf16 %v948_v40, %v919_v35  ;;  %v892_v47 = vpop.f32.mrf.mxu1  ;;  %1632 = vmatpush.bf16.msrb.mxu1 %v6240_v17  ;;  %v6205_v40 = vld [vmem:[#allocation8 + $0xf0] sm:$0xf0] }
 0x118   : > { %v974_v51 = vpack.c.bf16 %v892_v47, %v863_v41  ;;  %1730 = vmatpush.bf16.msrb.mxu3 %v6248_v28  ;;  %v7081_v41 = vld [vmem:[#allocation8 + $0xdc] sm:$0xf]  ;;  %v6208_v42 = vor.u32 %v7080_v38, %v6205_v40  ;;  %v8149_v40 = vpack.c.bf16 %v328_v13, %v327_v12 }
 0x119   : > { %v4236_v32 = vunpack.c.l.b16 %v971_v46  ;;  %v4506_v35 = vunpack.c.h.b16 %v971_v46  ;;  %v6115_v46 = vld [vmem:[#allocation8 + $0x18] sm:$0xf] }
 0x11a   : > { %v3721_v58 = vunpack.c.l.b16 %v974_v51  ;;  %v3991_v59 = vunpack.c.h.b16 %v974_v51 }
 0x11b   : > { %1633 = vmatpush.bf16.msrb.mxu1 %v6208_v42  ;;  %v6109_v42 = vld [vmem:[#allocation8 + $0x30] sm:$0xf0] }
 0x11c   : > { %v8131_v7 = vpack.c.b16 %v3721_v58, %v3720_v49  ;;  %v8133_v9 = vpack.c.b16 %v3991_v59, %v3990_v50  ;;  %v7061_v49 = vld [vmem:[#allocation8 + $0x34] sm:$0xf0]  ;;  %v6216_v50 = vor.u32 %v7081_v41, %v6213_v43  ;;  %v6176_v59 = vor.u32 %v7072_v53, %v6173_v56  ;;  %v7056_v41 = vld [vmem:[#allocation8 + $0x14] sm:$0xf]  ;;  %v7057_v43 = vld [vmem:[#allocation8 + $0x1c] sm:$0xf] }
 0x11d   : > { %v921_v10 = vpop.f32.mrf.mxu2  ;;  %v6116_v51 = vor.u32 %v7061_v49, %v6115_v46 }
 0x11e   : > { %9442 = vst [vmem:[#allocation33_spill] sm:$0xff] %v8131_v7  ;;  %v950_v15 = vpop.f32.mrf.mxu3  ;;  %v866_v16 = vpop.f32.mrf.mxu0  ;;  %1731 = vmatpush.bf16.msrb.mxu3 %v6216_v50  ;;  %v6112_v50 = vor.u32 %v7056_v41, %v6109_v42 }
 0x11f   : > { %9443 = vst [vmem:[#allocation34_spill] sm:$0xff] %v8133_v9  ;;  %v975_v22 = vpack.c.bf16 %v950_v15, %v921_v10  ;;  %v895_v24 = vpop.f32.mrf.mxu1  ;;  %1685 = vmatpush.bf16.msrb.mxu2 %v6116_v51  ;;  %1634 = vmatpush.bf16.msrb.mxu1 %v6176_v59  ;;  %v6141_v15 = vld [vmem:[#allocation8 + $0x70] sm:$0xf0]  ;;  %v6117_v51 = vld [vmem:[#allocation8 + $0x38] sm:$0xf0] }
 0x120   : > { %v978_v30 = vpack.c.bf16 %v895_v24, %v866_v16  ;;  %v7065_v16 = vld [vmem:[#allocation8 + $0x5c] sm:$0xf]  ;;  %v7060_v24 = vld [vmem:[#allocation8 + $0x2c] sm:$0xf0]  ;;  %v6144_v28 = vor.u32 %v7064_v14, %v6141_v15  ;;  %v6120_v56 = vor.u32 %v7057_v43, %v6117_v51 }
 0x121   : > { %v4237_v36 = vunpack.c.l.b16 %v975_v22  ;;  %v4507_v37 = vunpack.c.h.b16 %v975_v22  ;;  %1417 = vmatmul.bf16.gmra.mxu0 %v8135_v11  ;;  %1466 = vmatmul.bf16.gmra.mxu1 %v8135_v11  ;;  %v6107_v22 = vld [vmem:[#allocation8 + $0x10] sm:$0xf] }
 0x122   : > { %1515 = vmatmul.bf16.gmra.mxu2 %v8135_v11  ;;  %v3722_v5 = vunpack.c.l.b16 %v978_v30  ;;  %v3992_v6 = vunpack.c.h.b16 %v978_v30  ;;  %1732 = vmatpush.bf16.msrb.mxu3 %v6184_v1  ;;  %v7179_v1 = vld [vmem:[#allocation9 + $0x1e4] sm:$0xf0] }
 0x123   : > { %v8140_v47 = vpack.c.b16 %v4237_v36, %v4236_v32  ;;  %v8142_v48 = vpack.c.b16 %v4507_v37, %v4506_v35  ;;  %1564 = vmatmul.bf16.gmra.mxu3 %v8135_v11  ;;  %v6149_v32 = vld [vmem:[#allocation8 + $0x78] sm:$0xf0]  ;;  %v6108_v35 = vor.u32 %v7060_v24, %v6107_v22  ;;  %1635 = vmatpush.bf16.msrb.mxu1 %v6144_v28  ;;  %v329_v22 = vld [vmem:[#allocation3 + $0x70] sm:$0xff] }
 0x124   : > { %v6152_v36 = vor.u32 %v7065_v16, %v6149_v32  ;;  %v330_v32 = vld [vmem:[#allocation3 + $0x78] sm:$0xff] }
 0x125   : > { %9444 = vst [vmem:[#allocation35_spill] sm:$0xff] %v8140_v47  ;;  %v924_v52 = vpop.f32.mrf.mxu2  ;;  %1587 = vmatpush.bf16.msrb.mxu0 %v6108_v35  ;;  %v6571_v35 = vld [vmem:[#allocation9 + $0x1c0] sm:$0xf] }
 0x126   : > { %9445 = vst [vmem:[#allocation36_spill] sm:$0xff] %v8142_v48  ;;  %v953_v57 = vpop.f32.mrf.mxu3  ;;  %v868_v58 = vpop.f32.mrf.mxu0  ;;  %1733 = vmatpush.bf16.msrb.mxu3 %v6152_v36  ;;  %v7178_v36 = vld [vmem:[#allocation9 + $0x1dc] sm:$0xf0] }
 0x127   : > { %v979_v62 = vpack.c.bf16 %v953_v57, %v924_v52  ;;  %v897_v63 = vpop.f32.mrf.mxu1  ;;  %1636 = vmatpush.bf16.msrb.mxu1 %v6112_v50  ;;  %v6411_v48 = vld [vmem:[#allocation9 + $0x80] sm:$0xf] }
 0x128   : > { %v982_v10 = vpack.c.bf16 %v897_v63, %v868_v58  ;;  %v6579_v63 = vld [vmem:[#allocation9 + $0x1c8] sm:$0xf]  ;;  %v7138_v47 = vld [vmem:[#allocation9 + $0x9c] sm:$0xf0] }
 0x129   : > { %v4238_v57 = vunpack.c.l.b16 %v979_v62  ;;  %v4508_v58 = vunpack.c.h.b16 %v979_v62 }
 0x12a   : > { %v3723_v17 = vunpack.c.l.b16 %v982_v10  ;;  %v3993_v18 = vunpack.c.h.b16 %v982_v10  ;;  %1734 = vmatpush.bf16.msrb.mxu3 %v6120_v56  ;;  %v6580_v10 = vor.u32 %v7179_v1, %v6579_v63 }
 0x12c   : > { %v8145_v37 = vpack.c.b16 %v3723_v17, %v3722_v5  ;;  %v8147_v30 = vpack.c.b16 %v3993_v18, %v3992_v6  ;;  %2322 = vmatpush.bf16.msra.mxu2 %v6580_v10 }
 0x12d   : > { %v926_v38 = vpop.f32.mrf.mxu2 }
 0x12e   : > { %9446 = vst [vmem:[#allocation37_spill] sm:$0xff] %v8145_v37  ;;  %v955_v46 = vpop.f32.mrf.mxu3  ;;  %v871_v49 = vpop.f32.mrf.mxu0  ;;  %v7181_v37 = vld [vmem:[#allocation9 + $0x1f4] sm:$0xf0] }
 0x12f   : > { %9447 = vst [vmem:[#allocation38_spill] sm:$0xff] %v8147_v30  ;;  %v983_v52 = vpack.c.bf16 %v955_v46, %v926_v38  ;;  %v900_v53 = vpop.f32.mrf.mxu1  ;;  %v6572_v38 = vor.u32 %v7178_v36, %v6571_v35  ;;  %v8163_v46 = vpack.c.bf16 %v330_v32, %v329_v22  ;;  %v7170_v32 = vld [vmem:[#allocation9 + $0x19c] sm:$0xf0]  ;;  %v6595_v30 = vld [vmem:[#allocation9 + $0x1d8] sm:$0xf] }
 0x130   : > { %v986_v39 = vpack.c.bf16 %v900_v53, %v871_v49  ;;  %v6596_v7 = vor.u32 %v7181_v37, %v6595_v30 }
 0x131   : > { %v4239_v59 = vunpack.c.l.b16 %v983_v52  ;;  %v4509_v60 = vunpack.c.h.b16 %v983_v52  ;;  %1422 = vmatmul.bf16.gmra.mxu0 %v8149_v40  ;;  %1471 = vmatmul.bf16.gmra.mxu1 %v8149_v40 }
 0x132   : > { %1520 = vmatmul.bf16.gmra.mxu2 %v8149_v40  ;;  %v3724_v16 = vunpack.c.l.b16 %v986_v39  ;;  %v3994_v17 = vunpack.c.h.b16 %v986_v39  ;;  %2224 = vmatpush.bf16.msra.mxu0 %v6572_v38 }
 0x133   : > { %1569 = vmatmul.bf16.gmra.mxu3 %v8149_v40  ;;  %v8155_v5 = vpack.c.b16 %v4239_v59, %v4238_v57  ;;  %v8157_v6 = vpack.c.b16 %v4509_v60, %v4508_v58  ;;  %v6547_v59 = vld [vmem:[#allocation9 + $0x188] sm:$0xf] }
 0x134   : > { %v7171_v60 = vld [vmem:[#allocation9 + $0x1a4] sm:$0xf0] }
 0x135   : > { %9448 = vst [vmem:[#allocation39_spill] sm:$0xff] %v8155_v5  ;;  %v929_v12 = vpop.f32.mrf.mxu2  ;;  %v6548_v10 = vor.u32 %v7171_v60, %v6547_v59  ;;  %v6515_v59 = vld [vmem:[#allocation9 + $0x148] sm:$0xf] }
 0x136   : > { %9449 = vst [vmem:[#allocation40_spill] sm:$0xff] %v8157_v6  ;;  %v958_v62 = vpop.f32.mrf.mxu3  ;;  %v873_v13 = vpop.f32.mrf.mxu0  ;;  %v7163_v60 = vld [vmem:[#allocation9 + $0x164] sm:$0xf0] }
 0x137   : > { %v987_v14 = vpack.c.bf16 %v958_v62, %v929_v12  ;;  %v902_v15 = vpop.f32.mrf.mxu1  ;;  %2323 = vmatpush.bf16.msra.mxu2 %v6548_v10 }
 0x138   : > { %v990_v18 = vpack.c.bf16 %v902_v15, %v873_v13 }
 0x139   : > { %v4240_v56 = vunpack.c.l.b16 %v987_v14  ;;  %v4510_v39 = vunpack.c.h.b16 %v987_v14 }
 0x13a   : > { %v3725_v24 = vunpack.c.l.b16 %v990_v18  ;;  %v3995_v28 = vunpack.c.h.b16 %v990_v18 }
 0x13c   : > { %v8159_v41 = vpack.c.b16 %v3725_v24, %v3724_v16  ;;  %v8161_v42 = vpack.c.b16 %v3995_v28, %v3994_v17  ;;  %v6539_v28 = vld [vmem:[#allocation9 + $0x180] sm:$0xf] }
 0x13d   : > { %v931_v43 = vpop.f32.mrf.mxu2  ;;  %v6540_v35 = vor.u32 %v7170_v32, %v6539_v28 }
 0x13e   : > { %9450 = vst [vmem:[#allocation41_spill] sm:$0xff] %v8159_v41  ;;  %v960_v49 = vpop.f32.mrf.mxu3  ;;  %v876_v50 = vpop.f32.mrf.mxu0  ;;  %v7180_v41 = vld [vmem:[#allocation9 + $0x1ec] sm:$0xf0] }
 0x13f   : > { %9451 = vst [vmem:[#allocation42_spill] sm:$0xff] %v8161_v42  ;;  %v991_v51 = vpack.c.bf16 %v960_v49, %v931_v43  ;;  %v905_v52 = vpop.f32.mrf.mxu1  ;;  %2225 = vmatpush.bf16.msra.mxu0 %v6540_v35  ;;  %v6507_v35 = vld [vmem:[#allocation9 + $0x140] sm:$0xf] }
 0x140   : > { %v994_v53 = vpack.c.bf16 %v905_v52, %v876_v50 }
 0x141   : > { %v4241_v57 = vunpack.c.l.b16 %v991_v51  ;;  %v4511_v58 = vunpack.c.h.b16 %v991_v51  ;;  %1427 = vmatmul.bf16.gmra.mxu0 %v8163_v46  ;;  %1476 = vmatmul.bf16.gmra.mxu1 %v8163_v46 }
 0x142   : > { %1525 = vmatmul.bf16.gmra.mxu2 %v8163_v46  ;;  %v3726_v16 = vunpack.c.l.b16 %v994_v53  ;;  %v3996_v17 = vunpack.c.h.b16 %v994_v53 }
 0x143   : > { %1574 = vmatmul.bf16.gmra.mxu3 %v8163_v46  ;;  %v8169_v63 = vpack.c.b16 %v4241_v57, %v4240_v56  ;;  %v8171_v1 = vpack.c.b16 %v4511_v58, %v4510_v39 }
 0x145   : > { %9452 = vst [vmem:[#allocation43_spill] sm:$0xff] %v8169_v63  ;;  %v934_v12 = vpop.f32.mrf.mxu2  ;;  %v7146_v63 = vld [vmem:[#allocation9 + $0xdc] sm:$0xf0] }
 0x146   : > { %9453 = vst [vmem:[#allocation44_spill] sm:$0xff] %v8171_v1  ;;  %v963_v62 = vpop.f32.mrf.mxu3  ;;  %v878_v13 = vpop.f32.mrf.mxu0  ;;  %v6443_v1 = vld [vmem:[#allocation9 + $0xc0] sm:$0xf] }
 0x147   : > { %v995_v14 = vpack.c.bf16 %v963_v62, %v934_v12  ;;  %v907_v15 = vpop.f32.mrf.mxu1  ;;  %v6516_v62 = vor.u32 %v7163_v60, %v6515_v59  ;;  %v6444_v6 = vor.u32 %v7146_v63, %v6443_v1  ;;  %v6419_v63 = vld [vmem:[#allocation9 + $0x88] sm:$0xf] }
 0x148   : > { %v998_v18 = vpack.c.bf16 %v907_v15, %v878_v13  ;;  %v7139_v1 = vld [vmem:[#allocation9 + $0xa4] sm:$0xf0] }
 0x149   : > { %v4242_v39 = vunpack.c.l.b16 %v995_v14  ;;  %v4512_v57 = vunpack.c.h.b16 %v995_v14  ;;  %2324 = vmatpush.bf16.msra.mxu2 %v6516_v62 }
 0x14a   : > { %v3727_v22 = vunpack.c.l.b16 %v998_v18  ;;  %v3997_v24 = vunpack.c.h.b16 %v998_v18 }
 0x14c   : > { %v8173_v36 = vpack.c.b16 %v3727_v22, %v3726_v16  ;;  %v8175_v38 = vpack.c.b16 %v3997_v24, %v3996_v17 }
 0x14d   : > { %v936_v43 = vpop.f32.mrf.mxu2 }
 0x14e   : > { %9454 = vst [vmem:[#allocation45_spill] sm:$0xff] %v8173_v36  ;;  %v965_v49 = vpop.f32.mrf.mxu3  ;;  %v1393_v50 = vpop.f32.mrf.mxu0 }
 0x14f   : > { %9455 = vst [vmem:[#allocation46_spill] sm:$0xff] %v8175_v38  ;;  %v999_v51 = vpack.c.bf16 %v965_v49, %v936_v43  ;;  %v1442_v52 = vpop.f32.mrf.mxu1  ;;  %v7162_v43 = vld [vmem:[#allocation9 + $0x15c] sm:$0xf0]  ;;  %v6412_v38 = vor.u32 %v7138_v47, %v6411_v48 }
 0x150   : > { %v1776_v56 = vpack.c.bf16 %v1442_v52, %v1393_v50  ;;  %v6508_v49 = vor.u32 %v7162_v43, %v6507_v35 }
 0x151   : > { %v4243_v53 = vunpack.c.l.b16 %v999_v51  ;;  %v4513_v58 = vunpack.c.h.b16 %v999_v51  ;;  %1588 = vmatmul.bf16.vlgmr.msrb.gmra.mxu0 %v8069_v61  ;;  %1637 = vmatmul.bf16.vlgmr.msrb.gmra.mxu1 %v8069_v61 }
 0x152   : > { %1686 = vmatmul.bf16.vlgmr.msrb.gmra.mxu2 %v8069_v61  ;;  %v2720_v18 = vunpack.c.l.b16 %v1776_v56  ;;  %v2974_v22 = vunpack.c.h.b16 %v1776_v56  ;;  %2226 = vmatpush.bf16.msra.mxu0 %v6508_v49 }
 0x153   : > { %1735 = vmatmul.bf16.vlgmr.msrb.gmra.mxu3 %v8069_v61  ;;  %v8181_v10 = vpack.c.b16 %v4243_v53, %v4242_v39  ;;  %v8183_v12 = vpack.c.b16 %v4513_v58, %v4512_v57 }
 0x155   : > { %9456 = vst [vmem:[#allocation47_spill] sm:$0xff] %v8181_v10  ;;  %v1491_v13 = vpop.f32.mrf.mxu2 }
 0x156   : > { %9457 = vst [vmem:[#allocation48_spill] sm:$0xff] %v8183_v12  ;;  %v1540_v15 = vpop.f32.mrf.mxu3  ;;  %v1395_v14 = vpop.f32.mrf.mxu0 }
 0x157   : > { %v1777_v16 = vpack.c.bf16 %v1540_v15, %v1491_v13  ;;  %v1444_v17 = vpop.f32.mrf.mxu1  ;;  %v6483_v15 = vld [vmem:[#allocation9 + $0x108] sm:$0xf] }
 0x158   : > { %v1780_v24 = vpack.c.bf16 %v1444_v17, %v1395_v14  ;;  %v7155_v14 = vld [vmem:[#allocation9 + $0x124] sm:$0xf0] }
 0x159   : > { %v3236_v60 = vunpack.c.l.b16 %v1777_v16  ;;  %v3490_v62 = vunpack.c.h.b16 %v1777_v16 }
 0x15a   : > { %v2721_v28 = vunpack.c.l.b16 %v1780_v24  ;;  %v2975_v32 = vunpack.c.h.b16 %v1780_v24 }
 0x15c   : > { %v8185_v50 = vpack.c.b16 %v2721_v28, %v2720_v18  ;;  %v8187_v51 = vpack.c.b16 %v2975_v32, %v2974_v22  ;;  %v6484_v22 = vor.u32 %v7155_v14, %v6483_v15 }
 0x15d   : > { %v1493_v52 = vpop.f32.mrf.mxu2 }
 0x15e   : > { %v1542_v39 = vpop.f32.mrf.mxu3  ;;  %v1398_v57 = vpop.f32.mrf.mxu0  ;;  %2325 = vmatpush.bf16.msra.mxu2 %v6484_v22 }
 0x15f   : > { %v1781_v53 = vpack.c.bf16 %v1542_v39, %v1493_v52  ;;  %v1447_v58 = vpop.f32.mrf.mxu1 }
 0x160   : > { %v1784_v59 = vpack.c.bf16 %v1447_v58, %v1398_v57  ;;  %v7154_v58 = vld [vmem:[#allocation9 + $0x11c] sm:$0xf0] }
 0x161   : > { %v3237_v56 = vunpack.c.l.b16 %v1781_v53  ;;  %v3491_v13 = vunpack.c.h.b16 %v1781_v53  ;;  %1593 = vmatmul.bf16.gmra.mxu0 %v8079_v23  ;;  %1642 = vmatmul.bf16.gmra.mxu1 %v8079_v23  ;;  %v6475_v53 = vld [vmem:[#allocation9 + $0x100] sm:$0xf] }
 0x162   : > { %1691 = vmatmul.bf16.gmra.mxu2 %v8079_v23  ;;  %v2722_v43 = vunpack.c.l.b16 %v1784_v59  ;;  %v2976_v49 = vunpack.c.h.b16 %v1784_v59  ;;  %v6476_v12 = vor.u32 %v7154_v58, %v6475_v53 }
 0x163   : > { %1740 = vmatmul.bf16.gmra.mxu3 %v8079_v23  ;;  %v8193_v17 = vpack.c.b16 %v3237_v56, %v3236_v60  ;;  %v8195_v18 = vpack.c.b16 %v3491_v13, %v3490_v62 }
 0x164   : > { %2227 = vmatpush.bf16.msra.mxu0 %v6476_v12 }
 0x165   : > { %v1496_v24 = vpop.f32.mrf.mxu2 }
 0x166   : > { %v1545_v28 = vpop.f32.mrf.mxu3  ;;  %v1400_v16 = vpop.f32.mrf.mxu0 }
 0x167   : > { %v1785_v32 = vpack.c.bf16 %v1545_v28, %v1496_v24  ;;  %v1449_v35 = vpop.f32.mrf.mxu1 }
 0x168   : > { %v1788_v52 = vpack.c.bf16 %v1449_v35, %v1400_v16  ;;  %v6451_v35 = vld [vmem:[#allocation9 + $0xc8] sm:$0xf]  ;;  %2228 = vmatpush.bf16.msra.mxu0 %v6444_v6 }
 0x169   : > { %v3238_v24 = vunpack.c.l.b16 %v1785_v32  ;;  %v3492_v28 = vunpack.c.h.b16 %v1785_v32 }
 0x16a   : > { %v2723_v39 = vunpack.c.l.b16 %v1788_v52  ;;  %v2977_v57 = vunpack.c.h.b16 %v1788_v52 }
 0x16c   : > { %v8197_v10 = vpack.c.b16 %v2723_v39, %v2722_v43  ;;  %v8199_v60 = vpack.c.b16 %v2977_v57, %v2976_v49  ;;  %v7147_v43 = vld [vmem:[#allocation9 + $0xe4] sm:$0xf0]  ;;  %2229 = vmatpush.bf16.msra.mxu0 %v6412_v38  ;;  %v7175_v38 = vld [vmem:[#allocation9 + $0x1cc] sm:$0xf] }
 0x16d   : > { %v1498_v62 = vpop.f32.mrf.mxu2  ;;  %v6452_v52 = vor.u32 %v7147_v43, %v6451_v35 }
 0x16e   : > { %v1547_v56 = vpop.f32.mrf.mxu3  ;;  %v1403_v13 = vpop.f32.mrf.mxu0 }
 0x16f   : > { %v1789_v15 = vpack.c.bf16 %v1547_v56, %v1498_v62  ;;  %v1452_v14 = vpop.f32.mrf.mxu1  ;;  %2326 = vmatpush.bf16.msra.mxu2 %v6452_v52 }
 0x170   : > { %v1792_v22 = vpack.c.bf16 %v1452_v14, %v1403_v13 }
 0x171   : > { %v3239_v59 = vunpack.c.l.b16 %v1789_v15  ;;  %v3493_v16 = vunpack.c.h.b16 %v1789_v15  ;;  %1598 = vmatmul.bf16.gmra.mxu0 %v8093_v8  ;;  %1647 = vmatmul.bf16.gmra.mxu1 %v8093_v8 }
 0x172   : > { %1696 = vmatmul.bf16.gmra.mxu2 %v8093_v8  ;;  %v2724_v62 = vunpack.c.l.b16 %v1792_v22  ;;  %v2978_v56 = vunpack.c.h.b16 %v1792_v22 }
 0x173   : > { %1745 = vmatmul.bf16.gmra.mxu3 %v8093_v8  ;;  %v8205_v12 = vpack.c.b16 %v3239_v59, %v3238_v24  ;;  %v8207_v49 = vpack.c.b16 %v3493_v16, %v3492_v28 }
 0x175   : > { %v1501_v39 = vpop.f32.mrf.mxu2 }
 0x176   : > { %v1550_v57 = vpop.f32.mrf.mxu3  ;;  %v1405_v32 = vpop.f32.mrf.mxu0 }
 0x177   : > { %v1793_v53 = vpack.c.bf16 %v1550_v57, %v1501_v39  ;;  %v1454_v58 = vpop.f32.mrf.mxu1 }
 0x178   : > { %v1796_v13 = vpack.c.bf16 %v1454_v58, %v1405_v32 }
 0x179   : > { %v3240_v39 = vunpack.c.l.b16 %v1793_v53  ;;  %v3494_v57 = vunpack.c.h.b16 %v1793_v53 }
 0x17a   : > { %v2725_v15 = vunpack.c.l.b16 %v1796_v13  ;;  %v2979_v14 = vunpack.c.h.b16 %v1796_v13 }
 0x17c   : > { %v8209_v5 = vpack.c.b16 %v2725_v15, %v2724_v62  ;;  %v8211_v24 = vpack.c.b16 %v2979_v14, %v2978_v56  ;;  %v6420_v62 = vor.u32 %v7139_v1, %v6419_v63  ;;  %v6379_v63 = vld [vmem:[#allocation9 + $0x40] sm:$0xf] }
 0x17d   : > { %v1503_v28 = vpop.f32.mrf.mxu2  ;;  %v7130_v1 = vld [vmem:[#allocation9 + $0x5c] sm:$0xf0] }
 0x17e   : > { %v1552_v59 = vpop.f32.mrf.mxu3  ;;  %v1408_v16 = vpop.f32.mrf.mxu0  ;;  %2327 = vmatpush.bf16.msra.mxu2 %v6420_v62  ;;  %v6387_v62 = vld [vmem:[#allocation9 + $0x48] sm:$0xf] }
 0x17f   : > { %v1797_v35 = vpack.c.bf16 %v1552_v59, %v1503_v28  ;;  %v1457_v43 = vpop.f32.mrf.mxu1 }
 0x180   : > { %v1800_v52 = vpack.c.bf16 %v1457_v43, %v1408_v16 }
 0x181   : > { %v3241_v22 = vunpack.c.l.b16 %v1797_v35  ;;  %v3495_v32 = vunpack.c.h.b16 %v1797_v35  ;;  %1603 = vmatmul.bf16.gmra.mxu0 %v8107_v29  ;;  %1652 = vmatmul.bf16.gmra.mxu1 %v8107_v29 }
 0x182   : > { %1701 = vmatmul.bf16.gmra.mxu2 %v8107_v29  ;;  %v2726_v28 = vunpack.c.l.b16 %v1800_v52  ;;  %v2980_v59 = vunpack.c.h.b16 %v1800_v52  ;;  %v6380_v52 = vor.u32 %v7130_v1, %v6379_v63  ;;  %v7122_v63 = vld [vmem:[#allocation9 + $0x1c] sm:$0xf0] }
 0x183   : > { %1750 = vmatmul.bf16.gmra.mxu3 %v8107_v29  ;;  %v8217_v6 = vpack.c.b16 %v3241_v22, %v3240_v39  ;;  %v8219_v58 = vpack.c.b16 %v3495_v32, %v3494_v57 }
 0x184   : > { %2230 = vmatpush.bf16.msra.mxu0 %v6380_v52  ;;  %v7166_v52 = vld [vmem:[#allocation9 + $0x184] sm:$0xf] }
 0x185   : > { %v1506_v56 = vpop.f32.mrf.mxu2 }
 0x186   : > { %v1555_v13 = vpop.f32.mrf.mxu3  ;;  %v1410_v53 = vpop.f32.mrf.mxu0 }
 0x187   : > { %v1801_v15 = vpack.c.bf16 %v1555_v13, %v1506_v56  ;;  %v1459_v14 = vpop.f32.mrf.mxu1 }
 0x188   : > { %v1804_v16 = vpack.c.bf16 %v1459_v14, %v1410_v53  ;;  %v7131_v53 = vld [vmem:[#allocation9 + $0x64] sm:$0xf0] }
 0x189   : > { %v3242_v42 = vunpack.c.l.b16 %v1801_v15 }
 0x18a   : > { %v2727_v35 = vunpack.c.l.b16 %v1804_v16  ;;  %v2981_v43 = vunpack.c.h.b16 %v1804_v16  ;;  %v6388_v16 = vor.u32 %v7131_v53, %v6387_v62  ;;  %v6355_v62 = vld [vmem:[#allocation9 + $0x8] sm:$0xf] }
 0x18c   : > { %v8221_v36 = vpack.c.b16 %v2727_v35, %v2726_v28  ;;  %v8223_v39 = vpack.c.b16 %v2981_v43, %v2980_v59  ;;  %v7174_v28 = vld [vmem:[#allocation9 + $0x1c4] sm:$0xf]  ;;  %v3496_v35 = vunpack.c.h.b16 %v1801_v15  ;;  %2328 = vmatpush.bf16.msra.mxu2 %v6388_v16 }
 0x18d   : > { %v1508_v57 = vpop.f32.mrf.mxu2  ;;  %v6573_v59 = vld [vmem:[#allocation9 + $0x1e0] sm:$0xf0] }
 0x18e   : > { %v1557_v22 = vpop.f32.mrf.mxu3  ;;  %v1413_v32 = vpop.f32.mrf.mxu0  ;;  %v6576_v43 = vor.u32 %v7174_v28, %v6573_v59 }
 0x18f   : > { %v1805_v56 = vpack.c.bf16 %v1557_v22, %v1508_v57  ;;  %v1462_v13 = vpop.f32.mrf.mxu1  ;;  %v6581_v57 = vld [vmem:[#allocation9 + $0x1e8] sm:$0xf0]  ;;  %v6347_v22 = vld [vmem:[#allocation9] sm:$0xf] }
 0x190   : > { %v8225_v14 = vpack.c.bf16 %v1462_v13, %v1413_v32  ;;  %v6584_v32 = vor.u32 %v7175_v38, %v6581_v57  ;;  %v6348_v1 = vor.u32 %v7122_v63, %v6347_v22  ;;  %v6587_v13 = vld [vmem:[#allocation9 + $0x1d0] sm:$0xf]  ;;  %2273 = vmatpush.bf16.msra.mxu1 %v6576_v43  ;;  %v6541_v38 = vld [vmem:[#allocation9 + $0x1a0] sm:$0xf0]  ;;  %v7167_v57 = vld [vmem:[#allocation9 + $0x18c] sm:$0xf] }
 0x191   : > { %v3243_v47 = vunpack.c.l.b16 %v1805_v56  ;;  %v3497_v48 = vunpack.c.h.b16 %v1805_v56  ;;  %1608 = vmatmul.bf16.gmra.mxu0 %v8121_v2  ;;  %1657 = vmatmul.bf16.gmra.mxu1 %v8121_v2  ;;  %v7123_v56 = vld [vmem:[#allocation9 + $0x24] sm:$0xf0]  ;;  %v6588_v9 = vor.u32 %v7180_v41, %v6587_v13  ;;  %v6544_v31 = vor.u32 %v7166_v52, %v6541_v38  ;;  %v6509_v52 = vld [vmem:[#allocation9 + $0x160] sm:$0xf0]  ;;  %v7159_v38 = vld [vmem:[#allocation9 + $0x14c] sm:$0xf] }
 0x192   : > { %1706 = vmatmul.bf16.gmra.mxu2 %v8121_v2  ;;  %v6356_v15 = vor.u32 %v7123_v56, %v6355_v62  ;;  %2371 = vmatpush.bf16.msra.mxu3 %v6584_v32  ;;  %v6555_v62 = vld [vmem:[#allocation9 + $0x190] sm:$0xf]  ;;  %v2982_v41 = vunpack.c.h.b16 %v8225_v14  ;;  %v7173_v32 = vld [vmem:[#allocation9 + $0x1b4] sm:$0xf0] }
 0x193   : > { %1755 = vmatmul.bf16.gmra.mxu3 %v8121_v2  ;;  %v8231_v53 = vpack.c.b16 %v3243_v47, %v3242_v42  ;;  %v8233_v28 = vpack.c.b16 %v3497_v48, %v3496_v35  ;;  %v6549_v42 = vld [vmem:[#allocation9 + $0x1a8] sm:$0xf0]  ;;  %2231 = vmatpush.bf16.msra.mxu0 %v6348_v1  ;;  %v7172_v56 = vld [vmem:[#allocation9 + $0x1ac] sm:$0xf0]  ;;  %v6563_v48 = vld [vmem:[#allocation9 + $0x198] sm:$0xf]  ;;  %v2728_v35 = vunpack.c.l.b16 %v8225_v14 }
 0x194   : > { %v6552_v43 = vor.u32 %v7167_v57, %v6549_v42  ;;  %2329 = vmatpush.bf16.msra.mxu2 %v6356_v15  ;;  %v6556_v30 = vor.u32 %v7172_v56, %v6555_v62  ;;  %2274 = vmatpush.bf16.msra.mxu1 %v6544_v31  ;;  %v6564_v13 = vor.u32 %v7173_v32, %v6563_v48  ;;  %v6517_v42 = vld [vmem:[#allocation9 + $0x168] sm:$0xf0]  ;;  %v6531_v14 = vld [vmem:[#allocation9 + $0x158] sm:$0xf]  ;;  %v7150_v62 = vld [vmem:[#allocation9 + $0x104] sm:$0xf] }
 0x195   : > { %v1511_v59 = vpop.f32.mrf.mxu2  ;;  %v6520_v25 = vor.u32 %v7159_v38, %v6517_v42  ;;  %v6524_v15 = vor.u32 %v7164_v44, %v6523_v45  ;;  %v6477_v56 = vld [vmem:[#allocation9 + $0x120] sm:$0xf0]  ;;  %v6485_v32 = vld [vmem:[#allocation9 + $0x128] sm:$0xf0]  ;;  %v6491_v45 = vld [vmem:[#allocation9 + $0x110] sm:$0xf] }
 0x196   : > { %v1560_v22 = vpop.f32.mrf.mxu3  ;;  %v1415_v63 = vpop.f32.mrf.mxu0  ;;  %2372 = vmatpush.bf16.msra.mxu3 %v6552_v43  ;;  %v7151_v43 = vld [vmem:[#allocation9 + $0x10c] sm:$0xf]  ;;  %v6480_v44 = vor.u32 %v7150_v62, %v6477_v56  ;;  %v6459_v56 = vld [vmem:[#allocation9 + $0xd0] sm:$0xf] }
 0x197   : > { %v8235_v47 = vpack.c.bf16 %v1560_v22, %v1511_v59  ;;  %v1464_v16 = vpop.f32.mrf.mxu1  ;;  %2420 = vmatpush.bf16.msrb.mxu0 %v6588_v9  ;;  %v7158_v59 = vld [vmem:[#allocation9 + $0x144] sm:$0xf]  ;;  %v7165_v9 = vld [vmem:[#allocation9 + $0x174] sm:$0xf0]  ;;  %v6453_v62 = vld [vmem:[#allocation9 + $0xe8] sm:$0xf0] }
 0x198   : > { %v1812_v37 = vpack.c.bf16 %v1464_v16, %v1415_v63  ;;  %2518 = vmatpush.bf16.msrb.mxu2 %v6596_v7  ;;  %v6512_v22 = vor.u32 %v7158_v59, %v6509_v52  ;;  %v6532_v16 = vor.u32 %v7165_v9, %v6531_v14  ;;  %v7142_v14 = vld [vmem:[#allocation9 + $0xc4] sm:$0xf] }
 0x199   : > { %v3244_v52 = vunpack.c.l.b16 %v8235_v47  ;;  %v6445_v9 = vld [vmem:[#allocation9 + $0xe0] sm:$0xf0] }
 0x19a   : > { %v2729_v1 = vunpack.c.l.b16 %v1812_v37  ;;  %v2983_v57 = vunpack.c.h.b16 %v1812_v37  ;;  %2275 = vmatpush.bf16.msra.mxu1 %v6512_v22  ;;  %2373 = vmatpush.bf16.msra.mxu3 %v6520_v25 }
 0x19b   : > { %2421 = vmatpush.bf16.msrb.mxu0 %v6556_v30 }
 0x19c   : > { %v8239_v63 = vpack.c.b16 %v2729_v1, %v2728_v35  ;;  %v8241_v7 = vpack.c.b16 %v2983_v57, %v2982_v41  ;;  %2519 = vmatpush.bf16.msrb.mxu2 %v6564_v13  ;;  %v7156_v35 = vld [vmem:[#allocation9 + $0x12c] sm:$0xf0]  ;;  %v6499_v41 = vld [vmem:[#allocation9 + $0x118] sm:$0xf]  ;;  %v6488_v13 = vor.u32 %v7151_v43, %v6485_v32  ;;  %v3498_v57 = vunpack.c.h.b16 %v8235_v47 }
 0x19d   : > { %v1513_v31 = vpop.f32.mrf.mxu2  ;;  %v6492_v38 = vor.u32 %v7156_v35, %v6491_v45  ;;  %v7157_v1 = vld [vmem:[#allocation9 + $0x134] sm:$0xf0]  ;;  %v7148_v47 = vld [vmem:[#allocation9 + $0xec] sm:$0xf0] }
 0x19e   : > { %v1562_v48 = vpop.f32.mrf.mxu3  ;;  %v8243_v37 = vpop.f32.mrf.mxu0  ;;  %v6500_v25 = vor.u32 %v7157_v1, %v6499_v41  ;;  %2276 = vmatpush.bf16.msra.mxu1 %v6480_v44  ;;  %v6467_v43 = vld [vmem:[#allocation9 + $0xd8] sm:$0xf]  ;;  %2374 = vmatpush.bf16.msra.mxu3 %v6488_v13  ;;  %v7134_v1 = vld [vmem:[#allocation9 + $0x84] sm:$0xf]  ;;  %v6427_v13 = vld [vmem:[#allocation9 + $0x90] sm:$0xf] }
 0x19f   : > { %v1813_v59 = vpack.c.bf16 %v1562_v48, %v1513_v31  ;;  %v8245_v30 = vpop.f32.mrf.mxu1  ;;  %2422 = vmatpush.bf16.msrb.mxu0 %v6524_v15  ;;  %v7143_v31 = vld [vmem:[#allocation9 + $0xcc] sm:$0xf]  ;;  %v6448_v15 = vor.u32 %v7142_v14, %v6445_v9  ;;  %v7149_v45 = vld [vmem:[#allocation9 + $0xf4] sm:$0xf0] }
 0x1a0   : > { %2520 = vmatpush.bf16.msrb.mxu2 %v6532_v16  ;;  %v6456_v16 = vor.u32 %v7143_v31, %v6453_v62  ;;  %v6468_v41 = vor.u32 %v7149_v45, %v6467_v43  ;;  %v6421_v9 = vld [vmem:[#allocation9 + $0xa8] sm:$0xf0]  ;;  %v7141_v31 = vld [vmem:[#allocation9 + $0xb4] sm:$0xf0] }
 0x1a1   : > { %v3245_v22 = vunpack.c.l.b16 %v1813_v59  ;;  %v3499_v42 = vunpack.c.h.b16 %v1813_v59  ;;  %1613 = vmatmul.bf16.gmra.mxu0 %v8135_v11  ;;  %1662 = vmatmul.bf16.gmra.mxu1 %v8135_v11  ;;  %v6460_v59 = vor.u32 %v7148_v47, %v6459_v56  ;;  %v7126_v56 = vld [vmem:[#allocation9 + $0x44] sm:$0xf]  ;;  %v7127_v43 = vld [vmem:[#allocation9 + $0x4c] sm:$0xf] }
 0x1a2   : > { %1711 = vmatmul.bf16.gmra.mxu2 %v8135_v11  ;;  %2277 = vmatpush.bf16.msra.mxu1 %v6448_v15  ;;  %v6381_v47 = vld [vmem:[#allocation9 + $0x60] sm:$0xf0]  ;;  %v6389_v45 = vld [vmem:[#allocation9 + $0x68] sm:$0xf0]  ;;  %v6403_v15 = vld [vmem:[#allocation9 + $0x58] sm:$0xf] }
 0x1a3   : > { %1760 = vmatmul.bf16.gmra.mxu3 %v8135_v11  ;;  %v8253_v48 = vpack.c.b16 %v3245_v22, %v3244_v52  ;;  %v8255_v32 = vpack.c.b16 %v3499_v42, %v3498_v57  ;;  %2423 = vmatpush.bf16.msrb.mxu0 %v6492_v38  ;;  %v6416_v57 = vor.u32 %v7134_v1, %v6413_v4  ;;  %v7140_v38 = vld [vmem:[#allocation9 + $0xac] sm:$0xf0]  ;;  %v6435_v22 = vld [vmem:[#allocation9 + $0x98] sm:$0xf] }
 0x1a4   : > { %2521 = vmatpush.bf16.msrb.mxu2 %v6500_v25  ;;  %2375 = vmatpush.bf16.msra.mxu3 %v6456_v16  ;;  %v6424_v42 = vor.u32 %v7135_v3, %v6421_v9  ;;  %v6428_v25 = vor.u32 %v7140_v38, %v6427_v13  ;;  %v6436_v62 = vor.u32 %v7141_v31, %v6435_v22  ;;  %v7133_v16 = vld [vmem:[#allocation9 + $0x74] sm:$0xf0]  ;;  %v7118_v9 = vld [vmem:[#allocation9 + $0x4] sm:$0xf]  ;;  %v7119_v13 = vld [vmem:[#allocation9 + $0xc] sm:$0xf] }
 0x1a5   : > { %v1516_v35 = vpop.f32.mrf.mxu2  ;;  %v6392_v4 = vor.u32 %v7127_v43, %v6389_v45  ;;  %v6404_v3 = vor.u32 %v7133_v16, %v6403_v15  ;;  %v6357_v31 = vld [vmem:[#allocation9 + $0x28] sm:$0xf0]  ;;  %v6371_v43 = vld [vmem:[#allocation9 + $0x18] sm:$0xf] }
 0x1a6   : > { %v1565_v44 = vpop.f32.mrf.mxu3  ;;  %v8257_v14 = vpop.f32.mrf.mxu0  ;;  %2278 = vmatpush.bf16.msra.mxu1 %v6416_v57 }
 0x1a7   : > { %v1817_v34 = vpack.c.bf16 %v1565_v44, %v1516_v35  ;;  %v8259_v52 = vpop.f32.mrf.mxu1  ;;  %2424 = vmatpush.bf16.msrb.mxu0 %v6460_v59  ;;  %v6384_v35 = vor.u32 %v7126_v56, %v6381_v47  ;;  %v6395_v44 = vld [vmem:[#allocation9 + $0x50] sm:$0xf] }
 0x1a8   : > { %2522 = vmatpush.bf16.msrb.mxu2 %v6468_v41  ;;  %2376 = vmatpush.bf16.msra.mxu3 %v6424_v42  ;;  %v6396_v1 = vor.u32 %v7132_v33, %v6395_v44  ;;  %v6349_v41 = vld [vmem:[#allocation9 + $0x20] sm:$0xf0]  ;;  %v6363_v42 = vld [vmem:[#allocation9 + $0x10] sm:$0xf]  ;;  %v7125_v44 = vld [vmem:[#allocation9 + $0x34] sm:$0xf0] }
 0x1a9   : > { %v6352_v47 = vor.u32 %v7118_v9, %v6349_v41  ;;  %v3246_v33 = vunpack.c.l.b16 %v1817_v34  ;;  %v3500_v15 = vunpack.c.h.b16 %v1817_v34 }
 0x1aa   : > { %2279 = vmatpush.bf16.msra.mxu1 %v6384_v35 }
 0x1ab   : > { %2425 = vmatpush.bf16.msrb.mxu0 %v6428_v25  ;;  %v7124_v25 = vld [vmem:[#allocation9 + $0x2c] sm:$0xf0] }
 0x1ac   : > { %2523 = vmatpush.bf16.msrb.mxu2 %v6436_v62  ;;  %2377 = vmatpush.bf16.msra.mxu3 %v6392_v4  ;;  %v6360_v62 = vor.u32 %v7119_v13, %v6357_v31  ;;  %v6364_v45 = vor.u32 %v7124_v25, %v6363_v42 }
 0x1ad   : > { %v1518_v59 = vpop.f32.mrf.mxu2 }
 0x1ae   : > { %v1567_v38 = vpop.f32.mrf.mxu3  ;;  %v8261_v22 = vpop.f32.mrf.mxu0  ;;  %2280 = vmatpush.bf16.msra.mxu1 %v6352_v47 }
 0x1af   : > { %v1821_v57 = vpack.c.bf16 %v1567_v38, %v1518_v59  ;;  %v8263_v56 = vpop.f32.mrf.mxu1  ;;  %2426 = vmatpush.bf16.msrb.mxu0 %v6396_v1  ;;  %v6372_v59 = vor.u32 %v7125_v44, %v6371_v43 }
 0x1b0   : > { %2524 = vmatpush.bf16.msrb.mxu2 %v6404_v3  ;;  %2378 = vmatpush.bf16.msra.mxu3 %v6360_v62 }
 0x1b1   : > { %v3247_v16 = vunpack.c.l.b16 %v1821_v57  ;;  %v3501_v21 = vunpack.c.h.b16 %v1821_v57  ;;  %1618 = vmatmul.bf16.gmra.mxu0 %v8149_v40  ;;  %1667 = vmatmul.bf16.gmra.mxu1 %v8149_v40 }
 0x1b2   : > { %1716 = vmatmul.bf16.gmra.mxu2 %v8149_v40 }
 0x1b3   : > { %1765 = vmatmul.bf16.gmra.mxu3 %v8149_v40  ;;  %v8269_v35 = vpack.c.b16 %v3247_v16, %v3246_v33  ;;  %v8271_v4 = vpack.c.b16 %v3501_v21, %v3500_v15  ;;  %2427 = vmatpush.bf16.msrb.mxu0 %v6364_v45 }
 0x1b4   : > { %2525 = vmatpush.bf16.msrb.mxu2 %v6372_v59 }
 0x1b5   : > { %v1521_v34 = vpop.f32.mrf.mxu2 }
 0x1b6   : > { %v1570_v1 = vpop.f32.mrf.mxu3  ;;  %v1425_v9 = vpop.f32.mrf.mxu0 }
 0x1b7   : > { %v1825_v41 = vpack.c.bf16 %v1570_v1, %v1521_v34  ;;  %v1474_v3 = vpop.f32.mrf.mxu1 }
 0x1b9   : > { %v3248_v25 = vunpack.c.l.b16 %v1825_v41  ;;  %v3502_v43 = vunpack.c.h.b16 %v1825_v41 }
 0x1bd   : > { %v1523_v13 = vpop.f32.mrf.mxu2 }
 0x1be   : > { %v1572_v38 = vpop.f32.mrf.mxu3  ;;  %v1428_v31 = vpop.f32.mrf.mxu0 }
 0x1bf   : > { %v1829_v57 = vpack.c.bf16 %v1572_v38, %v1523_v13  ;;  %v1477_v42 = vpop.f32.mrf.mxu1 }
 0x1c0   : > { %v1832_v34 = vpack.c.bf16 %v1477_v42, %v1428_v31 }
 0x1c1   : > { %v3249_v47 = vunpack.c.l.b16 %v1829_v57  ;;  %v3503_v33 = vunpack.c.h.b16 %v1829_v57  ;;  %1623 = vmatmul.bf16.gmra.mxu0 %v8163_v46  ;;  %1672 = vmatmul.bf16.gmra.mxu1 %v8163_v46 }
 0x1c2   : > { %1721 = vmatmul.bf16.gmra.mxu2 %v8163_v46  ;;  %v2734_v41 = vunpack.c.l.b16 %v1832_v34  ;;  %v2988_v57 = vunpack.c.h.b16 %v1832_v34 }
 0x1c3   : > { %1770 = vmatmul.bf16.gmra.mxu3 %v8163_v46  ;;  %v8277_v21 = vpack.c.b16 %v3249_v47, %v3248_v25  ;;  %v8279_v62 = vpack.c.b16 %v3503_v33, %v3502_v43  ;;  %v1824_v25 = vpack.c.bf16 %v8263_v56, %v8261_v22  ;;  %v1828_v43 = vpack.c.bf16 %v1474_v3, %v1425_v9 }
 0x1c5   : > { %v1526_v45 = vpop.f32.mrf.mxu2  ;;  %v2986_v56 = vunpack.c.h.b16 %v1824_v25 }
 0x1c6   : > { %v1575_v44 = vpop.f32.mrf.mxu3  ;;  %v1430_v15 = vpop.f32.mrf.mxu0 }
 0x1c7   : > { %v1833_v16 = vpack.c.bf16 %v1575_v44, %v1526_v45  ;;  %v1479_v59 = vpop.f32.mrf.mxu1 }
 0x1c8   : > { %v1836_v1 = vpack.c.bf16 %v1479_v59, %v1430_v15 }
 0x1c9   : > { %v3250_v47 = vunpack.c.l.b16 %v1833_v16  ;;  %v3504_v20 = vunpack.c.h.b16 %v1833_v16 }
 0x1ca   : > { %v2735_v13 = vunpack.c.l.b16 %v1836_v1  ;;  %v2989_v0 = vunpack.c.h.b16 %v1836_v1 }
 0x1cc   : > { %v2743_v45 = vpack.c.b16 %v2735_v13, %v2734_v41  ;;  %v2997_v42 = vpack.c.b16 %v2989_v0, %v2988_v57  ;;  %v1816_v0 = vpack.c.bf16 %v8245_v30, %v8243_v37 }
 0x1cd   : > { %v1528_v38 = vpop.f32.mrf.mxu2 }
 0x1ce   : > { %v1577_v27 = vpop.f32.mrf.mxu3  ;;  %v1589_v26 = vpop.f32.mrf.mxu0  ;;  %v2984_v30 = vunpack.c.h.b16 %v1816_v0 }
 0x1cf   : > { %v1837_v55 = vpack.c.bf16 %v1577_v27, %v1528_v38  ;;  %v1638_v54 = vpop.f32.mrf.mxu1 }
 0x1d0   : > { %v1778_v33 = vpack.c.bf16 %v1638_v54, %v1589_v26  ;;  %v2732_v54 = vunpack.c.l.b16 %v1824_v25  ;;  %v2733_v26 = vunpack.c.l.b16 %v1828_v43  ;;  %v2730_v25 = vunpack.c.l.b16 %v1816_v0 }
 0x1d1   : > { %v3251_v44 = vunpack.c.l.b16 %v1837_v55  ;;  %v3505_v31 = vunpack.c.h.b16 %v1837_v55  ;;  %2232 = vmatmul.bf16.vlgmr.msra.gmra.mxu0 %v8069_v61  ;;  %2281 = vmatmul.bf16.vlgmr.msra.gmra.mxu1 %v8069_v61  ;;  %v2987_v55 = vunpack.c.h.b16 %v1828_v43 }
 0x1d2   : > { %2330 = vmatmul.bf16.vlgmr.msra.gmra.mxu2 %v8069_v61  ;;  %2752 = vmatpush.bf16.xpose.msra.mxu0 %v2743_v45  ;;  %v3752_v34 = vunpack.c.l.b16 %v1778_v33  ;;  %v4006_v1 = vunpack.c.h.b16 %v1778_v33  ;;  %v2742_v13 = vpack.c.b16 %v2733_v26, %v2732_v54 }
 0x1d3   : > { %v8286_v15 = vpack.c.b16 %v3251_v44, %v3250_v47  ;;  %v8288_v27 = vpack.c.b16 %v3505_v31, %v3504_v20  ;;  %2379 = vmatmul.bf16.vlgmr.msra.gmra.mxu3 %v8069_v61  ;;  %3006 = vmatpush.bf16.xpose.msra.mxu2 %v2997_v42  ;;  %v1820_v20 = vpack.c.bf16 %v8259_v52, %v8257_v14 }
 0x1d4   : > { %v2996_v47 = vpack.c.b16 %v2987_v55, %v2986_v56 }
 0x1d5   : > { %v1687_v22 = vpop.f32.mrf.mxu2  ;;  %v2731_v43 = vunpack.c.l.b16 %v1820_v20  ;;  %v2985_v31 = vunpack.c.h.b16 %v1820_v20 }
 0x1d6   : > { %v1736_v9 = vpop.f32.mrf.mxu3  ;;  %v1591_v3 = vpop.f32.mrf.mxu0 }
 0x1d7   : > { %v1779_v16 = vpack.c.bf16 %v1736_v9, %v1687_v22  ;;  %v1640_v59 = vpop.f32.mrf.mxu1  ;;  %v2741_v54 = vpack.c.b16 %v2731_v43, %v2730_v25 }
 0x1d8   : > { %v1782_v41 = vpack.c.bf16 %v1640_v59, %v1591_v3  ;;  %v2995_v3 = vpack.c.b16 %v2985_v31, %v2984_v30 }
 0x1d9   : > { %v4268_v26 = vunpack.c.l.b16 %v1779_v16  ;;  %v4522_v9 = vunpack.c.h.b16 %v1779_v16 }
 0x1da   : > { %v3753_v38 = vunpack.c.l.b16 %v1782_v41  ;;  %v4007_v57 = vunpack.c.h.b16 %v1782_v41  ;;  %2753 = vmatpush.bf16.xpose.msra.mxu0 %v2742_v13 }
 0x1db   : > { %3007 = vmatpush.bf16.xpose.msra.mxu2 %v2996_v47 }
 0x1dc   : > { %v8295_v45 = vpack.c.b16 %v3753_v38, %v3752_v34  ;;  %v8297_v44 = vpack.c.b16 %v4007_v57, %v4006_v1 }
 0x1dd   : > { %v1689_v37 = vpop.f32.mrf.mxu2 }
 0x1de   : > { %9458 = vst [vmem:[#allocation49_spill] sm:$0xff] %v8295_v45  ;;  %v1738_v42 = vpop.f32.mrf.mxu3  ;;  %v1594_v14 = vpop.f32.mrf.mxu0 }
 0x1df   : > { %9459 = vst [vmem:[#allocation50_spill] sm:$0xff] %v8297_v44  ;;  %v1783_v52 = vpack.c.bf16 %v1738_v42, %v1689_v37  ;;  %v1643_v33 = vpop.f32.mrf.mxu1 }
 0x1e0   : > { %v1786_v22 = vpack.c.bf16 %v1643_v33, %v1594_v14 }
 0x1e1   : > { %v4269_v56 = vunpack.c.l.b16 %v1783_v52  ;;  %v4523_v55 = vunpack.c.h.b16 %v1783_v52  ;;  %2237 = vmatmul.bf16.gmra.mxu0 %v8079_v23  ;;  %2286 = vmatmul.bf16.gmra.mxu1 %v8079_v23 }
 0x1e2   : > { %2335 = vmatmul.bf16.gmra.mxu2 %v8079_v23  ;;  %2754 = vmatpush.bf16.xpose.msra.mxu0 %v2741_v54  ;;  %v3754_v13 = vunpack.c.l.b16 %v1786_v22  ;;  %v4008_v38 = vunpack.c.h.b16 %v1786_v22 }
 0x1e3   : > { %2384 = vmatmul.bf16.gmra.mxu3 %v8079_v23  ;;  %v8303_v0 = vpack.c.b16 %v4269_v56, %v4268_v26  ;;  %v8305_v59 = vpack.c.b16 %v4523_v55, %v4522_v9  ;;  %3008 = vmatpush.bf16.xpose.msra.mxu2 %v2995_v3 }
 0x1e5   : > { %9460 = vst [vmem:[#allocation51_spill] sm:$0xff] %v8303_v0  ;;  %v1692_v20 = vpop.f32.mrf.mxu2  ;;  %v7136_v0 = vld [vmem:[#allocation9 + $0x94] sm:$0xf] }
 0x1e6   : > { %9461 = vst [vmem:[#allocation52_spill] sm:$0xff] %v8305_v59  ;;  %v1741_v34 = vpop.f32.mrf.mxu3  ;;  %v1596_v16 = vpop.f32.mrf.mxu0 }
 0x1e7   : > { %v1787_v1 = vpack.c.bf16 %v1741_v34, %v1692_v20  ;;  %v1645_v41 = vpop.f32.mrf.mxu1 }
 0x1e8   : > { %v1790_v57 = vpack.c.bf16 %v1645_v41, %v1596_v16 }
 0x1e9   : > { %v4270_v54 = vunpack.c.l.b16 %v1787_v1  ;;  %v4524_v26 = vunpack.c.h.b16 %v1787_v1 }
 0x1ea   : > { %v3755_v47 = vunpack.c.l.b16 %v1790_v57  ;;  %v4009_v25 = vunpack.c.h.b16 %v1790_v57  ;;  %2755 = vmatpush.bf16.xpose.msra.mxu0 %v8239_v63 }
 0x1eb   : > { %3009 = vmatpush.bf16.xpose.msra.mxu2 %v8241_v7 }
 0x1ec   : > { %v8309_v43 = vpack.c.b16 %v3755_v47, %v3754_v13  ;;  %v8311_v37 = vpack.c.b16 %v4009_v25, %v4008_v38 }
 0x1ed   : > { %v1694_v30 = vpop.f32.mrf.mxu2 }
 0x1ee   : > { %9462 = vst [vmem:[#allocation53_spill] sm:$0xff] %v8309_v43  ;;  %v1743_v31 = vpop.f32.mrf.mxu3  ;;  %v1599_v42 = vpop.f32.mrf.mxu0 }
 0x1ef   : > { %9463 = vst [vmem:[#allocation54_spill] sm:$0xff] %v8311_v37  ;;  %v1791_v14 = vpack.c.bf16 %v1743_v31, %v1694_v30  ;;  %v1648_v52 = vpop.f32.mrf.mxu1 }
 0x1f0   : > { %v1794_v33 = vpack.c.bf16 %v1648_v52, %v1599_v42 }
 0x1f1   : > { %v4271_v22 = vunpack.c.l.b16 %v1791_v14  ;;  %v4525_v9 = vunpack.c.h.b16 %v1791_v14  ;;  %2242 = vmatmul.bf16.gmra.mxu0 %v8093_v8  ;;  %2291 = vmatmul.bf16.gmra.mxu1 %v8093_v8 }
 0x1f2   : > { %2340 = vmatmul.bf16.gmra.mxu2 %v8093_v8  ;;  %2756 = vmatpush.bf16.xpose.msra.mxu0 %v8221_v36  ;;  %v3756_v16 = vunpack.c.l.b16 %v1794_v33  ;;  %v4010_v1 = vunpack.c.h.b16 %v1794_v33 }
 0x1f3   : > { %2389 = vmatmul.bf16.gmra.mxu3 %v8093_v8  ;;  %v8318_v63 = vpack.c.b16 %v4271_v22, %v4270_v54  ;;  %v8320_v7 = vpack.c.b16 %v4525_v9, %v4524_v26  ;;  %3010 = vmatpush.bf16.xpose.msra.mxu2 %v8223_v39 }
 0x1f5   : > { %9464 = vst [vmem:[#allocation55_spill] sm:$0xff] %v8318_v63  ;;  %v1697_v56 = vpop.f32.mrf.mxu2  ;;  %v6397_v63 = vld [vmem:[#allocation9 + $0x70] sm:$0xf0] }
 0x1f6   : > { %9465 = vst [vmem:[#allocation56_spill] sm:$0xff] %v8320_v7  ;;  %v1746_v55 = vpop.f32.mrf.mxu3  ;;  %v1601_v3 = vpop.f32.mrf.mxu0 }
 0x1f7   : > { %v1795_v20 = vpack.c.bf16 %v1746_v55, %v1697_v56  ;;  %v1650_v34 = vpop.f32.mrf.mxu1 }
 0x1f8   : > { %v1798_v41 = vpack.c.bf16 %v1650_v34, %v1601_v3 }
 0x1f9   : > { %v4272_v14 = vunpack.c.l.b16 %v1795_v20  ;;  %v4526_v52 = vunpack.c.h.b16 %v1795_v20 }
 0x1fa   : > { %v3757_v13 = vunpack.c.l.b16 %v1798_v41  ;;  %v4011_v38 = vunpack.c.h.b16 %v1798_v41  ;;  %2757 = vmatpush.bf16.xpose.msra.mxu0 %v8209_v5 }
 0x1fb   : > { %3011 = vmatpush.bf16.xpose.msra.mxu2 %v8211_v24 }
 0x1fc   : > { %v8325_v36 = vpack.c.b16 %v3757_v13, %v3756_v16  ;;  %v8327_v57 = vpack.c.b16 %v4011_v38, %v4010_v1 }
 0x1fd   : > { %v1699_v47 = vpop.f32.mrf.mxu2 }
 0x1fe   : > { %v1748_v39 = vpop.f32.mrf.mxu3  ;;  %v1604_v25 = vpop.f32.mrf.mxu0 }
 0x1ff   : > { %v1799_v30 = vpack.c.bf16 %v1748_v39, %v1699_v47  ;;  %v1653_v31 = vpop.f32.mrf.mxu1 }
 0x200   : > { %v1802_v42 = vpack.c.bf16 %v1653_v31, %v1604_v25 }
 0x201   : > { %v4273_v33 = vunpack.c.l.b16 %v1799_v30  ;;  %v4527_v54 = vunpack.c.h.b16 %v1799_v30  ;;  %2247 = vmatmul.bf16.gmra.mxu0 %v8107_v29  ;;  %2296 = vmatmul.bf16.gmra.mxu1 %v8107_v29 }
 0x202   : > { %2345 = vmatmul.bf16.gmra.mxu2 %v8107_v29  ;;  %2758 = vmatpush.bf16.xpose.msra.mxu0 %v8197_v10  ;;  %v3758_v3 = vunpack.c.l.b16 %v1802_v42  ;;  %v4012_v20 = vunpack.c.h.b16 %v1802_v42 }
 0x203   : > { %2394 = vmatmul.bf16.gmra.mxu3 %v8107_v29  ;;  %v8334_v5 = vpack.c.b16 %v4273_v33, %v4272_v14  ;;  %v8336_v24 = vpack.c.b16 %v4527_v54, %v4526_v52  ;;  %3012 = vmatpush.bf16.xpose.msra.mxu2 %v8199_v60  ;;  %v7176_v33 = vld [vmem:[#allocation9 + $0x1d4] sm:$0xf] }
 0x204   : > { %v6589_v54 = vld [vmem:[#allocation9 + $0x1f0] sm:$0xf0] }
 0x205   : > { %9466 = vst [vmem:[#allocation57_spill] sm:$0xff] %v8334_v5  ;;  %v1702_v26 = vpop.f32.mrf.mxu2 }
 0x206   : > { %9467 = vst [vmem:[#allocation58_spill] sm:$0xff] %v8336_v24  ;;  %v1751_v22 = vpop.f32.mrf.mxu3  ;;  %v1606_v9 = vpop.f32.mrf.mxu0 }
 0x207   : > { %v1803_v56 = vpack.c.bf16 %v1751_v22, %v1702_v26  ;;  %v1655_v55 = vpop.f32.mrf.mxu1 }
 0x208   : > { %v1806_v34 = vpack.c.bf16 %v1655_v55, %v1606_v9  ;;  %v6592_v9 = vor.u32 %v7176_v33, %v6589_v54  ;;  %v6525_v54 = vld [vmem:[#allocation9 + $0x170] sm:$0xf0] }
 0x209   : > { %v4274_v30 = vunpack.c.l.b16 %v1803_v56  ;;  %v4528_v31 = vunpack.c.h.b16 %v1803_v56 }
 0x20a   : > { %v3759_v16 = vunpack.c.l.b16 %v1806_v34  ;;  %v4013_v1 = vunpack.c.h.b16 %v1806_v34  ;;  %2759 = vmatpush.bf16.xpose.msra.mxu0 %v8185_v50  ;;  %v7177_v50 = vld [vmem:[#allocation9 + $0x1dc] sm:$0xf]  ;;  %2469 = vmatpush.bf16.msrb.mxu1 %v6592_v9 }
 0x20b   : > { %3013 = vmatpush.bf16.xpose.msra.mxu2 %v8187_v51  ;;  %v6597_v51 = vld [vmem:[#allocation9 + $0x1f8] sm:$0xf0] }
 0x20c   : > { %v8341_v10 = vpack.c.b16 %v3759_v16, %v3758_v3  ;;  %v8343_v41 = vpack.c.b16 %v4013_v1, %v4012_v20  ;;  %v6600_v52 = vor.u32 %v7177_v50, %v6597_v51  ;;  %v7169_v20 = vld [vmem:[#allocation9 + $0x19c] sm:$0xf] }
 0x20d   : > { %v1704_v13 = vpop.f32.mrf.mxu2  ;;  %v6565_v34 = vld [vmem:[#allocation9 + $0x1b8] sm:$0xf0] }
 0x20e   : > { %v1753_v60 = vpop.f32.mrf.mxu3  ;;  %v1609_v38 = vpop.f32.mrf.mxu0  ;;  %2567 = vmatpush.bf16.msrb.mxu3 %v6600_v52  ;;  %v6533_v51 = vld [vmem:[#allocation9 + $0x178] sm:$0xf0]  ;;  %v7160_v52 = vld [vmem:[#allocation9 + $0x154] sm:$0xf] }
 0x20f   : > { %v1807_v47 = vpack.c.bf16 %v1753_v60, %v1704_v13  ;;  %v1658_v39 = vpop.f32.mrf.mxu1  ;;  %v6568_v13 = vor.u32 %v7169_v20, %v6565_v34  ;;  %v7168_v60 = vld [vmem:[#allocation9 + $0x194] sm:$0xf]  ;;  %v6528_v9 = vor.u32 %v7160_v52, %v6525_v54  ;;  %v6501_v34 = vld [vmem:[#allocation9 + $0x138] sm:$0xf0] }
 0x210   : > { %v1810_v25 = vpack.c.bf16 %v1658_v39, %v1609_v38  ;;  %v6557_v38 = vld [vmem:[#allocation9 + $0x1b0] sm:$0xf0] }
 0x211   : > { %v4275_v42 = vunpack.c.l.b16 %v1807_v47  ;;  %v4529_v14 = vunpack.c.h.b16 %v1807_v47  ;;  %2252 = vmatmul.bf16.gmra.mxu0 %v8121_v2  ;;  %2301 = vmatmul.bf16.gmra.mxu1 %v8121_v2  ;;  %v7144_v54 = vld [vmem:[#allocation9 + $0xd4] sm:$0xf] }
 0x212   : > { %2350 = vmatmul.bf16.gmra.mxu2 %v8121_v2  ;;  %v3760_v47 = vunpack.c.l.b16 %v1810_v25  ;;  %v4014_v39 = vunpack.c.h.b16 %v1810_v25  ;;  %2568 = vmatpush.bf16.msrb.mxu3 %v6568_v13 }
 0x213   : > { %2399 = vmatmul.bf16.gmra.mxu3 %v8121_v2  ;;  %v8349_v26 = vpack.c.b16 %v4275_v42, %v4274_v30  ;;  %v8351_v22 = vpack.c.b16 %v4529_v14, %v4528_v31  ;;  %v6560_v30 = vor.u32 %v7168_v60, %v6557_v38  ;;  %v7161_v14 = vld [vmem:[#allocation9 + $0x15c] sm:$0xf]  ;;  %v7152_v38 = vld [vmem:[#allocation9 + $0x114] sm:$0xf] }
 0x214   : > { %v6536_v33 = vor.u32 %v7161_v14, %v6533_v51 }
 0x215   : > { %9468 = vst [vmem:[#allocation59_spill] sm:$0xff] %v8349_v26  ;;  %v1707_v56 = vpop.f32.mrf.mxu2  ;;  %2470 = vmatpush.bf16.msrb.mxu1 %v6560_v30 }
 0x216   : > { %9469 = vst [vmem:[#allocation60_spill] sm:$0xff] %v8351_v22  ;;  %v1756_v55 = vpop.f32.mrf.mxu3  ;;  %v1611_v3 = vpop.f32.mrf.mxu0  ;;  %2569 = vmatpush.bf16.msrb.mxu3 %v6536_v33 }
 0x217   : > { %v1811_v16 = vpack.c.bf16 %v1756_v55, %v1707_v56  ;;  %v1660_v1 = vpop.f32.mrf.mxu1 }
 0x218   : > { %v1814_v50 = vpack.c.bf16 %v1660_v1, %v1611_v3  ;;  %v7153_v3 = vld [vmem:[#allocation9 + $0x11c] sm:$0xf] }
 0x219   : > { %2471 = vmatpush.bf16.msrb.mxu1 %v6528_v9  ;;  %v6504_v60 = vor.u32 %v7153_v3, %v6501_v34  ;;  %v4276_v51 = vunpack.c.l.b16 %v1811_v16  ;;  %v4530_v52 = vunpack.c.h.b16 %v1811_v16  ;;  %v6461_v9 = vld [vmem:[#allocation9 + $0xf0] sm:$0xf0] }
 0x21a   : > { %v3761_v31 = vunpack.c.l.b16 %v1814_v50  ;;  %v4015_v42 = vunpack.c.h.b16 %v1814_v50  ;;  %v6493_v50 = vld [vmem:[#allocation9 + $0x130] sm:$0xf0] }
 0x21b   : > { %v6496_v14 = vor.u32 %v7152_v38, %v6493_v50  ;;  %2570 = vmatpush.bf16.msrb.mxu3 %v6504_v60 }
 0x21c   : > { %v8353_v59 = vpack.c.b16 %v3761_v31, %v3760_v47  ;;  %v8355_v56 = vpack.c.b16 %v4015_v42, %v4014_v39  ;;  %v7145_v39 = vld [vmem:[#allocation9 + $0xdc] sm:$0xf] }
 0x21d   : > { %v1709_v55 = vpop.f32.mrf.mxu2  ;;  %v6469_v42 = vld [vmem:[#allocation9 + $0xf8] sm:$0xf0]  ;;  %2472 = vmatpush.bf16.msrb.mxu1 %v6496_v14  ;;  %v6429_v14 = vld [vmem:[#allocation9 + $0xb0] sm:$0xf0] }
 0x21e   : > { %v1758_v20 = vpop.f32.mrf.mxu3  ;;  %v1614_v25 = vpop.f32.mrf.mxu0  ;;  %v6472_v33 = vor.u32 %v7145_v39, %v6469_v42 }
 0x21f   : > { %v1815_v1 = vpack.c.bf16 %v1758_v20, %v1709_v55  ;;  %v1663_v13 = vpop.f32.mrf.mxu1  ;;  %v6464_v20 = vor.u32 %v7144_v54, %v6461_v9  ;;  %v6405_v54 = vld [vmem:[#allocation9 + $0x78] sm:$0xf0]  ;;  %v7128_v9 = vld [vmem:[#allocation9 + $0x54] sm:$0xf] }
 0x220   : > { %v1818_v30 = vpack.c.bf16 %v1663_v13, %v1614_v25  ;;  %2571 = vmatpush.bf16.msrb.mxu3 %v6472_v33  ;;  %v6437_v13 = vld [vmem:[#allocation9 + $0xb8] sm:$0xf0]  ;;  %v6400_v24 = vor.u32 %v7128_v9, %v6397_v63 }
 0x221   : > { %v4277_v47 = vunpack.c.l.b16 %v1815_v1  ;;  %v4531_v31 = vunpack.c.h.b16 %v1815_v1  ;;  %2257 = vmatmul.bf16.gmra.mxu0 %v8135_v11  ;;  %2306 = vmatmul.bf16.gmra.mxu1 %v8135_v11  ;;  %v7137_v1 = vld [vmem:[#allocation9 + $0x9c] sm:$0xf] }
 0x222   : > { %2355 = vmatmul.bf16.gmra.mxu2 %v8135_v11  ;;  %2473 = vmatpush.bf16.msrb.mxu1 %v6464_v20  ;;  %v6440_v50 = vor.u32 %v7137_v1, %v6437_v13  ;;  %v3762_v39 = vunpack.c.l.b16 %v1818_v30  ;;  %v4016_v42 = vunpack.c.h.b16 %v1818_v30 }
 0x223   : > { %2404 = vmatmul.bf16.gmra.mxu3 %v8135_v11  ;;  %v8361_v55 = vpack.c.b16 %v4277_v47, %v4276_v51  ;;  %v8363_v16 = vpack.c.b16 %v4531_v31, %v4530_v52  ;;  %v6432_v51 = vor.u32 %v7136_v0, %v6429_v14  ;;  %v7129_v31 = vld [vmem:[#allocation9 + $0x5c] sm:$0xf]  ;;  %v6365_v14 = vld [vmem:[#allocation9 + $0x30] sm:$0xf0] }
 0x224   : > { %2572 = vmatpush.bf16.msrb.mxu3 %v6440_v50  ;;  %v6408_v33 = vor.u32 %v7129_v31, %v6405_v54  ;;  %v6373_v0 = vld [vmem:[#allocation9 + $0x38] sm:$0xf0]  ;;  %v7120_v50 = vld [vmem:[#allocation9 + $0x14] sm:$0xf] }
 0x225   : > { %9470 = vst [vmem:[#allocation61_spill] sm:$0xff] %v8361_v55  ;;  %v1712_v25 = vpop.f32.mrf.mxu2  ;;  %v6368_v31 = vor.u32 %v7120_v50, %v6365_v14 }
 0x226   : > { %9471 = vst [vmem:[#allocation62_spill] sm:$0xff] %v8363_v16  ;;  %v1761_v3 = vpop.f32.mrf.mxu3  ;;  %v1616_v34 = vpop.f32.mrf.mxu0  ;;  %2474 = vmatpush.bf16.msrb.mxu1 %v6432_v51 }
 0x227   : > { %v1819_v60 = vpack.c.bf16 %v1761_v3, %v1712_v25  ;;  %v1665_v38 = vpop.f32.mrf.mxu1 }
 0x228   : > { %v1822_v7 = vpack.c.bf16 %v1665_v38, %v1616_v34  ;;  %2573 = vmatpush.bf16.msrb.mxu3 %v6408_v33  ;;  %v7121_v34 = vld [vmem:[#allocation9 + $0x1c] sm:$0xf] }
 0x229   : > { %v4278_v54 = vunpack.c.l.b16 %v1819_v60  ;;  %v4532_v63 = vunpack.c.h.b16 %v1819_v60 }
 0x22a   : > { %v3763_v52 = vunpack.c.l.b16 %v1822_v7  ;;  %v4017_v47 = vunpack.c.h.b16 %v1822_v7  ;;  %2475 = vmatpush.bf16.msrb.mxu1 %v6400_v24  ;;  %v6376_v7 = vor.u32 %v7121_v34, %v6373_v0 }
 0x22c   : > { %v8365_v25 = vpack.c.b16 %v3763_v52, %v3762_v39  ;;  %v8367_v20 = vpack.c.b16 %v4017_v47, %v4016_v42  ;;  %2574 = vmatpush.bf16.msrb.mxu3 %v6376_v7 }
 0x22d   : > { %v1714_v3 = vpop.f32.mrf.mxu2 }
 0x22e   : > { %v1763_v1 = vpop.f32.mrf.mxu3  ;;  %v1619_v30 = vpop.f32.mrf.mxu0  ;;  %2476 = vmatpush.bf16.msrb.mxu1 %v6368_v31 }
 0x22f   : > { %v1823_v13 = vpack.c.bf16 %v1763_v1, %v1714_v3  ;;  %v1668_v38 = vpop.f32.mrf.mxu1 }
 0x230   : > { %v1826_v51 = vpack.c.bf16 %v1668_v38, %v1619_v30 }
 0x231   : > { %v4279_v39 = vunpack.c.l.b16 %v1823_v13  ;;  %v4533_v52 = vunpack.c.h.b16 %v1823_v13  ;;  %2262 = vmatmul.bf16.gmra.mxu0 %v8149_v40  ;;  %2311 = vmatmul.bf16.gmra.mxu1 %v8149_v40 }
 0x232   : > { %2360 = vmatmul.bf16.gmra.mxu2 %v8149_v40  ;;  %v3764_v1 = vunpack.c.l.b16 %v1826_v51  ;;  %v4018_v30 = vunpack.c.h.b16 %v1826_v51 }
 0x233   : > { %2409 = vmatmul.bf16.gmra.mxu3 %v8149_v40  ;;  %v8373_v24 = vpack.c.b16 %v4279_v39, %v4278_v54  ;;  %v8375_v42 = vpack.c.b16 %v4533_v52, %v4532_v63 }
 0x235   : > { %9472 = vst [vmem:[#allocation63_spill] sm:$0xff] %v8373_v24  ;;  %v1717_v47 = vpop.f32.mrf.mxu2 }
 0x236   : > { %9473 = vst [vmem:[#allocation64_spill] sm:$0xff] %v8375_v42  ;;  %v1766_v33 = vpop.f32.mrf.mxu3  ;;  %v1621_v9 = vpop.f32.mrf.mxu0 }
 0x237   : > { %v1827_v60 = vpack.c.bf16 %v1766_v33, %v1717_v47  ;;  %v1670_v3 = vpop.f32.mrf.mxu1 }
 0x238   : > { %v1830_v34 = vpack.c.bf16 %v1670_v3, %v1621_v9 }
 0x239   : > { %v4280_v52 = vunpack.c.l.b16 %v1827_v60  ;;  %v4534_v5 = vunpack.c.h.b16 %v1827_v60 }
 0x23a   : > { %v3765_v0 = vunpack.c.l.b16 %v1830_v34  ;;  %v4019_v13 = vunpack.c.h.b16 %v1830_v34 }
 0x23c   : > { %v8377_v38 = vpack.c.b16 %v3765_v0, %v3764_v1  ;;  %v8379_v7 = vpack.c.b16 %v4019_v13, %v4018_v30 }
 0x23d   : > { %v1719_v50 = vpop.f32.mrf.mxu2 }
 0x23e   : > { %v1768_v14 = vpop.f32.mrf.mxu3  ;;  %v1624_v31 = vpop.f32.mrf.mxu0 }
 0x23f   : > { %v1831_v54 = vpack.c.bf16 %v1768_v14, %v1719_v50  ;;  %v1673_v63 = vpop.f32.mrf.mxu1 }
 0x240   : > { %v1834_v39 = vpack.c.bf16 %v1673_v63, %v1624_v31 }
 0x241   : > { %v4281_v22 = vunpack.c.l.b16 %v1831_v54  ;;  %v4535_v47 = vunpack.c.h.b16 %v1831_v54  ;;  %2267 = vmatmul.bf16.gmra.mxu0 %v8163_v46  ;;  %2316 = vmatmul.bf16.gmra.mxu1 %v8163_v46 }
 0x242   : > { %2365 = vmatmul.bf16.gmra.mxu2 %v8163_v46  ;;  %v3766_v60 = vunpack.c.l.b16 %v1834_v39  ;;  %v4020_v0 = vunpack.c.h.b16 %v1834_v39 }
 0x243   : > { %2414 = vmatmul.bf16.gmra.mxu3 %v8163_v46  ;;  %v8385_v51 = vpack.c.b16 %v4281_v22, %v4280_v52  ;;  %v8387_v33 = vpack.c.b16 %v4535_v47, %v4534_v5 }
 0x245   : > { %9474 = vst [vmem:[#allocation65_spill] sm:$0xff] %v8385_v51  ;;  %v1722_v9 = vpop.f32.mrf.mxu2 }
 0x246   : > { %9475 = vst [vmem:[#allocation66_spill] sm:$0xff] %v8387_v33  ;;  %v1771_v3 = vpop.f32.mrf.mxu3  ;;  %v1626_v1 = vpop.f32.mrf.mxu0 }
 0x247   : > { %v1835_v30 = vpack.c.bf16 %v1771_v3, %v1722_v9  ;;  %v1675_v34 = vpop.f32.mrf.mxu1 }
 0x248   : > { %v1838_v13 = vpack.c.bf16 %v1675_v34, %v1626_v1 }
 0x249   : > { %v4282_v16 = vunpack.c.l.b16 %v1835_v30  ;;  %v4536_v55 = vunpack.c.h.b16 %v1835_v30 }
 0x24a   : > { %v3767_v50 = vunpack.c.l.b16 %v1838_v13  ;;  %v4021_v14 = vunpack.c.h.b16 %v1838_v13 }
 0x24c   : > { %v8389_v31 = vpack.c.b16 %v3767_v50, %v3766_v60  ;;  %v8391_v54 = vpack.c.b16 %v4021_v14, %v4020_v0 }
 0x24d   : > { %v1724_v63 = vpop.f32.mrf.mxu2 }
 0x24e   : > { %v1773_v26 = vpop.f32.mrf.mxu3  ;;  %v2233_v22 = vpop.f32.mrf.mxu0 }
 0x24f   : > { %v1839_v52 = vpack.c.bf16 %v1773_v26, %v1724_v63  ;;  %v2282_v5 = vpop.f32.mrf.mxu1 }
 0x250   : > { %v2616_v47 = vpack.c.bf16 %v2282_v5, %v2233_v22 }
 0x251   : > { %v4283_v42 = vunpack.c.l.b16 %v1839_v52  ;;  %v4537_v9 = vunpack.c.h.b16 %v1839_v52  ;;  %2428 = vmatmul.bf16.vlgmr.msrb.gmra.mxu0 %v8069_v61  ;;  %2477 = vmatmul.bf16.vlgmr.msrb.gmra.mxu1 %v8069_v61 }
 0x252   : > { %2526 = vmatmul.bf16.vlgmr.msrb.gmra.mxu2 %v8069_v61  ;;  %3268 = vmatpush.bf16.xpose.msrb.mxu0 %v8286_v15  ;;  %v2865_v0 = vunpack.c.l.b16 %v2616_v47  ;;  %v3103_v13 = vunpack.c.h.b16 %v2616_v47 }
 0x253   : > { %v8396_v39 = vpack.c.b16 %v4283_v42, %v4282_v16  ;;  %v8398_v3 = vpack.c.b16 %v4537_v9, %v4536_v55  ;;  %2575 = vmatmul.bf16.vlgmr.msrb.gmra.mxu3 %v8069_v61  ;;  %3522 = vmatpush.bf16.xpose.msrb.mxu2 %v8288_v27 }
 0x255   : > { %9476 = vst [vmem:[#allocation67_spill] sm:$0xff] %v8396_v39  ;;  %v2331_v26 = vpop.f32.mrf.mxu2 }
 0x256   : > { %9477 = vst [vmem:[#allocation68_spill] sm:$0xff] %v8398_v3  ;;  %v2380_v1 = vpop.f32.mrf.mxu3  ;;  %v2235_v30 = vpop.f32.mrf.mxu0 }
 0x257   : > { %v2617_v34 = vpack.c.bf16 %v2380_v1, %v2331_v26  ;;  %v2284_v60 = vpop.f32.mrf.mxu1 }
 0x258   : > { %v2620_v50 = vpack.c.bf16 %v2284_v60, %v2235_v30 }
 0x259   : > { %v3381_v5 = vunpack.c.l.b16 %v2617_v34  ;;  %v3619_v9 = vunpack.c.h.b16 %v2617_v34 }
 0x25a   : > { %v2866_v14 = vunpack.c.l.b16 %v2620_v50  ;;  %v3104_v15 = vunpack.c.h.b16 %v2620_v50  ;;  %3269 = vmatpush.bf16.xpose.msrb.mxu0 %v8277_v21 }
 0x25b   : > { %3523 = vmatpush.bf16.xpose.msrb.mxu2 %v8279_v62 }
 0x25c   : > { %v8405_v55 = vpack.c.b16 %v2866_v14, %v2865_v0  ;;  %v8407_v16 = vpack.c.b16 %v3104_v15, %v3103_v13 }
 0x25d   : > { %v2333_v27 = vpop.f32.mrf.mxu2 }
 0x25e   : > { %v2382_v61 = vpop.f32.mrf.mxu3  ;;  %v2238_v42 = vpop.f32.mrf.mxu0 }
 0x25f   : > { %v2621_v63 = vpack.c.bf16 %v2382_v61, %v2333_v27  ;;  %v2287_v22 = vpop.f32.mrf.mxu1 }
 0x260   : > { %v2624_v52 = vpack.c.bf16 %v2287_v22, %v2238_v42 }
 0x261   : > { %v3382_v47 = vunpack.c.l.b16 %v2621_v63  ;;  %v3620_v26 = vunpack.c.h.b16 %v2621_v63  ;;  %2433 = vmatmul.bf16.gmra.mxu0 %v8079_v23  ;;  %2482 = vmatmul.bf16.gmra.mxu1 %v8079_v23 }
 0x262   : > { %2531 = vmatmul.bf16.gmra.mxu2 %v8079_v23  ;;  %3270 = vmatpush.bf16.xpose.msrb.mxu0 %v8269_v35  ;;  %v2867_v13 = vunpack.c.l.b16 %v2624_v52  ;;  %v3105_v50 = vunpack.c.h.b16 %v2624_v52 }
 0x263   : > { %2580 = vmatmul.bf16.gmra.mxu3 %v8079_v23  ;;  %3524 = vmatpush.bf16.xpose.msrb.mxu2 %v8271_v4  ;;  %v8414_v21 = vpack.c.b16 %v3382_v47, %v3381_v5  ;;  %v8416_v62 = vpack.c.b16 %v3620_v26, %v3619_v9 }
 0x265   : > { %9478 = vst [vmem:[#allocation69_spill] sm:$0xff] %v8414_v21  ;;  %v2336_v1 = vpop.f32.mrf.mxu2 }
 0x266   : > { %9479 = vst [vmem:[#allocation70_spill] sm:$0xff] %v8416_v62  ;;  %v2385_v30 = vpop.f32.mrf.mxu3  ;;  %v2240_v34 = vpop.f32.mrf.mxu0 }
 0x267   : > { %v2625_v60 = vpack.c.bf16 %v2385_v30, %v2336_v1  ;;  %v2289_v0 = vpop.f32.mrf.mxu1 }
 0x268   : > { %v2628_v14 = vpack.c.bf16 %v2289_v0, %v2240_v34 }
 0x269   : > { %v3383_v9 = vunpack.c.l.b16 %v2625_v60  ;;  %v3621_v47 = vunpack.c.h.b16 %v2625_v60 }
 0x26a   : > { %v2868_v15 = vunpack.c.l.b16 %v2628_v14  ;;  %v3106_v35 = vunpack.c.h.b16 %v2628_v14  ;;  %3271 = vmatpush.bf16.xpose.msrb.mxu0 %v8253_v48 }
 0x26b   : > { %3525 = vmatpush.bf16.xpose.msrb.mxu2 %v8255_v32 }
 0x26c   : > { %v8421_v4 = vpack.c.b16 %v2868_v15, %v2867_v13  ;;  %v8423_v27 = vpack.c.b16 %v3106_v35, %v3105_v50 }
 0x26d   : > { %v2338_v61 = vpop.f32.mrf.mxu2 }
 0x26e   : > { %v2387_v23 = vpop.f32.mrf.mxu3  ;;  %v2243_v42 = vpop.f32.mrf.mxu0 }
 0x26f   : > { %v2629_v63 = vpack.c.bf16 %v2387_v23, %v2338_v61  ;;  %v2292_v22 = vpop.f32.mrf.mxu1 }
 0x270   : > { %v2632_v5 = vpack.c.bf16 %v2292_v22, %v2243_v42 }
 0x271   : > { %v3384_v52 = vunpack.c.l.b16 %v2629_v63  ;;  %v3622_v26 = vunpack.c.h.b16 %v2629_v63  ;;  %2438 = vmatmul.bf16.gmra.mxu0 %v8093_v8  ;;  %2487 = vmatmul.bf16.gmra.mxu1 %v8093_v8 }
 0x272   : > { %2536 = vmatmul.bf16.gmra.mxu2 %v8093_v8  ;;  %3272 = vmatpush.bf16.xpose.msrb.mxu0 %v8231_v53  ;;  %v2869_v13 = vunpack.c.l.b16 %v2632_v5  ;;  %v3107_v50 = vunpack.c.h.b16 %v2632_v5 }
 0x273   : > { %2585 = vmatmul.bf16.gmra.mxu3 %v8093_v8  ;;  %3526 = vmatpush.bf16.xpose.msrb.mxu2 %v8233_v28  ;;  %v8430_v48 = vpack.c.b16 %v3384_v52, %v3383_v9  ;;  %v8432_v32 = vpack.c.b16 %v3622_v26, %v3621_v47 }
 0x275   : > { %9480 = vst [vmem:[#allocation71_spill] sm:$0xff] %v8430_v48  ;;  %v2341_v1 = vpop.f32.mrf.mxu2 }
 0x276   : > { %9481 = vst [vmem:[#allocation72_spill] sm:$0xff] %v8432_v32  ;;  %v2390_v30 = vpop.f32.mrf.mxu3  ;;  %v2245_v34 = vpop.f32.mrf.mxu0 }
 0x277   : > { %v2633_v60 = vpack.c.bf16 %v2390_v30, %v2341_v1  ;;  %v2294_v0 = vpop.f32.mrf.mxu1 }
 0x278   : > { %v2636_v14 = vpack.c.bf16 %v2294_v0, %v2245_v34 }
 0x279   : > { %v3385_v9 = vunpack.c.l.b16 %v2633_v60  ;;  %v3623_v47 = vunpack.c.h.b16 %v2633_v60 }
 0x27a   : > { %v2870_v15 = vunpack.c.l.b16 %v2636_v14  ;;  %v3108_v53 = vunpack.c.h.b16 %v2636_v14  ;;  %3273 = vmatpush.bf16.xpose.msrb.mxu0 %v8217_v6 }
 0x27b   : > { %3527 = vmatpush.bf16.xpose.msrb.mxu2 %v8219_v58 }
 0x27c   : > { %v8437_v28 = vpack.c.b16 %v2870_v15, %v2869_v13  ;;  %v8439_v35 = vpack.c.b16 %v3108_v53, %v3107_v50 }
 0x27d   : > { %v2343_v61 = vpop.f32.mrf.mxu2 }
 0x27e   : > { %v2392_v8 = vpop.f32.mrf.mxu3  ;;  %v2248_v23 = vpop.f32.mrf.mxu0 }
 0x27f   : > { %v2637_v42 = vpack.c.bf16 %v2392_v8, %v2343_v61  ;;  %v2297_v63 = vpop.f32.mrf.mxu1 }
 0x280   : > { %v2640_v22 = vpack.c.bf16 %v2297_v63, %v2248_v23 }
 0x281   : > { %v3386_v5 = vunpack.c.l.b16 %v2637_v42  ;;  %v3624_v52 = vunpack.c.h.b16 %v2637_v42  ;;  %2443 = vmatmul.bf16.gmra.mxu0 %v8107_v29  ;;  %2492 = vmatmul.bf16.gmra.mxu1 %v8107_v29 }
 0x282   : > { %2541 = vmatmul.bf16.gmra.mxu2 %v8107_v29  ;;  %3274 = vmatpush.bf16.xpose.msrb.mxu0 %v8205_v12  ;;  %v2871_v0 = vunpack.c.l.b16 %v2640_v22  ;;  %v3109_v13 = vunpack.c.h.b16 %v2640_v22 }
 0x283   : > { %2590 = vmatmul.bf16.gmra.mxu3 %v8107_v29  ;;  %3528 = vmatpush.bf16.xpose.msrb.mxu2 %v8207_v49  ;;  %v8446_v6 = vpack.c.b16 %v3386_v5, %v3385_v9  ;;  %v8448_v58 = vpack.c.b16 %v3624_v52, %v3623_v47 }
 0x285   : > { %9482 = vst [vmem:[#allocation73_spill] sm:$0xff] %v8446_v6  ;;  %v2346_v26 = vpop.f32.mrf.mxu2 }
 0x286   : > { %9483 = vst [vmem:[#allocation74_spill] sm:$0xff] %v8448_v58  ;;  %v2395_v1 = vpop.f32.mrf.mxu3  ;;  %v2250_v30 = vpop.f32.mrf.mxu0 }
 0x287   : > { %v2641_v34 = vpack.c.bf16 %v2395_v1, %v2346_v26  ;;  %v2299_v60 = vpop.f32.mrf.mxu1 }
 0x288   : > { %v2644_v50 = vpack.c.bf16 %v2299_v60, %v2250_v30 }
 0x289   : > { %v3387_v63 = vunpack.c.l.b16 %v2641_v34  ;;  %v3625_v22 = vunpack.c.h.b16 %v2641_v34 }
 0x28a   : > { %v2872_v14 = vunpack.c.l.b16 %v2644_v50  ;;  %v3110_v12 = vunpack.c.h.b16 %v2644_v50  ;;  %3275 = vmatpush.bf16.xpose.msrb.mxu0 %v8193_v17 }
 0x28b   : > { %3529 = vmatpush.bf16.xpose.msrb.mxu2 %v8195_v18 }
 0x28c   : > { %v8453_v49 = vpack.c.b16 %v2872_v14, %v2871_v0  ;;  %v8455_v15 = vpack.c.b16 %v3110_v12, %v3109_v13 }
 0x28d   : > { %v2348_v53 = vpop.f32.mrf.mxu2 }
 0x28e   : > { %v2397_v29 = vpop.f32.mrf.mxu3  ;;  %v2253_v61 = vpop.f32.mrf.mxu0 }
 0x28f   : > { %v2645_v8 = vpack.c.bf16 %v2397_v29, %v2348_v53  ;;  %v2302_v23 = vpop.f32.mrf.mxu1 }
 0x290   : > { %v8457_v42 = vpack.c.bf16 %v2302_v23, %v2253_v61 }
 0x291   : > { %v3388_v9 = vunpack.c.l.b16 %v2645_v8  ;;  %v3626_v47 = vunpack.c.h.b16 %v2645_v8  ;;  %2448 = vmatmul.bf16.gmra.mxu0 %v8121_v2  ;;  %2497 = vmatmul.bf16.gmra.mxu1 %v8121_v2 }
 0x292   : > { %2546 = vmatmul.bf16.gmra.mxu2 %v8121_v2 }
 0x293   : > { %2595 = vmatmul.bf16.gmra.mxu3 %v8121_v2  ;;  %v8462_v17 = vpack.c.b16 %v3388_v9, %v3387_v63  ;;  %v8464_v18 = vpack.c.b16 %v3626_v47, %v3625_v22 }
 0x295   : > { %v2351_v5 = vpop.f32.mrf.mxu2 }
 0x296   : > { %v2400_v52 = vpop.f32.mrf.mxu3  ;;  %v8467_v26 = vpop.f32.mrf.mxu0 }
 0x297   : > { %v2649_v1 = vpack.c.bf16 %v2400_v52, %v2351_v5  ;;  %v8469_v30 = vpop.f32.mrf.mxu1 }
 0x299   : > { %v3389_v14 = vunpack.c.l.b16 %v2649_v1  ;;  %v3627_v12 = vunpack.c.h.b16 %v2649_v1 }
 0x29d   : > { %v2353_v34 = vpop.f32.mrf.mxu2 }
 0x29e   : > { %v2402_v60 = vpop.f32.mrf.mxu3  ;;  %v2258_v0 = vpop.f32.mrf.mxu0 }
 0x29f   : > { %v2653_v13 = vpack.c.bf16 %v2402_v60, %v2353_v34  ;;  %v2307_v50 = vpop.f32.mrf.mxu1 }
 0x2a0   : > { %v2656_v21 = vpack.c.bf16 %v2307_v50, %v2258_v0 }
 0x2a1   : > { %v3390_v53 = vunpack.c.l.b16 %v2653_v13  ;;  %v3628_v29 = vunpack.c.h.b16 %v2653_v13  ;;  %2453 = vmatmul.bf16.gmra.mxu0 %v8135_v11  ;;  %2502 = vmatmul.bf16.gmra.mxu1 %v8135_v11 }
 0x2a2   : > { %2551 = vmatmul.bf16.gmra.mxu2 %v8135_v11 }
 0x2a3   : > { %2600 = vmatmul.bf16.gmra.mxu3 %v8135_v11  ;;  %v8474_v2 = vpack.c.b16 %v3390_v53, %v3389_v14  ;;  %v8476_v61 = vpack.c.b16 %v3628_v29, %v3627_v12 }
 0x2a5   : > { %v2356_v8 = vpop.f32.mrf.mxu2 }
 0x2a6   : > { %v2405_v23 = vpop.f32.mrf.mxu3  ;;  %v2260_v63 = vpop.f32.mrf.mxu0 }
 0x2a7   : > { %v2309_v22 = vpop.f32.mrf.mxu1  ;;  %v2657_v9 = vpack.c.bf16 %v2405_v23, %v2356_v8 }
 0x2a8   : > { %v2660_v32 = vpack.c.bf16 %v2309_v22, %v2260_v63 }
 0x2a9   : > { %v3391_v60 = vunpack.c.l.b16 %v2657_v9  ;;  %v3629_v13 = vunpack.c.h.b16 %v2657_v9 }
 0x2aa   : > { %v3114_v0 = vunpack.c.h.b16 %v2660_v32 }
 0x2ad   : > { %v2358_v47 = vpop.f32.mrf.mxu2 }
 0x2ae   : > { %v2407_v5 = vpop.f32.mrf.mxu3  ;;  %v2263_v52 = vpop.f32.mrf.mxu0 }
 0x2af   : > { %v2661_v1 = vpack.c.bf16 %v2407_v5, %v2358_v47  ;;  %v2312_v34 = vpop.f32.mrf.mxu1 }
 0x2b1   : > { %v3392_v24 = vunpack.c.l.b16 %v2661_v1  ;;  %v3630_v33 = vunpack.c.h.b16 %v2661_v1  ;;  %2458 = vmatmul.bf16.gmra.mxu0 %v8149_v40  ;;  %2507 = vmatmul.bf16.gmra.mxu1 %v8149_v40 }
 0x2b2   : > { %2556 = vmatmul.bf16.gmra.mxu2 %v8149_v40 }
 0x2b3   : > { %2605 = vmatmul.bf16.gmra.mxu3 %v8149_v40  ;;  %v8482_v11 = vpack.c.b16 %v3392_v24, %v3391_v60  ;;  %v8484_v14 = vpack.c.b16 %v3630_v33, %v3629_v13  ;;  %v2664_v60 = vpack.c.bf16 %v2312_v34, %v2263_v52  ;;  %v2652_v34 = vpack.c.bf16 %v8469_v30, %v8467_v26 }
 0x2b5   : > { %v8487_v12 = vpop.f32.mrf.mxu2  ;;  %v2877_v48 = vunpack.c.l.b16 %v2664_v60 }
 0x2b6   : > { %v8489_v53 = vpop.f32.mrf.mxu3  ;;  %v2265_v29 = vpop.f32.mrf.mxu0 }
 0x2b7   : > { %v2314_v8 = vpop.f32.mrf.mxu1 }
 0x2b8   : > { %v2668_v51 = vpack.c.bf16 %v2314_v8, %v2265_v29  ;;  %v2875_v29 = vunpack.c.l.b16 %v2656_v21  ;;  %v2876_v8 = vunpack.c.l.b16 %v2660_v32 }
 0x2ba   : > { %v2878_v37 = vunpack.c.l.b16 %v2668_v51  ;;  %v3116_v43 = vunpack.c.h.b16 %v2668_v51  ;;  %v9484_v51 = vld [vmem:[#allocation18_spill] sm:$0xff]  ;;  %v2886_v26 = vpack.c.b16 %v2876_v8, %v2875_v29 }
 0x2bd   : > { %v8491_v23 = vpop.f32.mrf.mxu2 }
 0x2be   : > { %v8493_v9 = vpop.f32.mrf.mxu3  ;;  %v2268_v47 = vpop.f32.mrf.mxu0 }
 0x2bf   : > { %v2317_v5 = vpop.f32.mrf.mxu1 }
 0x2c0   : > { %v2672_v24 = vpack.c.bf16 %v2317_v5, %v2268_v47 }
 0x2c1   : > { %2463 = vmatmul.bf16.gmra.mxu0 %v8163_v46  ;;  %2512 = vmatmul.bf16.gmra.mxu1 %v8163_v46 }
 0x2c2   : > { %2561 = vmatmul.bf16.gmra.mxu2 %v8163_v46  ;;  %v2879_v3 = vunpack.c.l.b16 %v2672_v24  ;;  %v3117_v39 = vunpack.c.h.b16 %v2672_v24  ;;  %v2887_v24 = vpack.c.b16 %v2878_v37, %v2877_v48  ;;  %v3111_v37 = vunpack.c.h.b16 %v8457_v42 }
 0x2c3   : > { %2610 = vmatmul.bf16.gmra.mxu3 %v8163_v46  ;;  %v3115_v46 = vunpack.c.h.b16 %v2664_v60 }
 0x2c5   : > { %v8499_v40 = vpop.f32.mrf.mxu2 }
 0x2c6   : > { %v8501_v33 = vpop.f32.mrf.mxu3  ;;  %v2270_v1 = vpop.f32.mrf.mxu0 }
 0x2c7   : > { %v2319_v13 = vpop.f32.mrf.mxu1 }
 0x2c8   : > { %v2676_v44 = vpack.c.bf16 %v2319_v13, %v2270_v1 }
 0x2ca   : > { %v2880_v45 = vunpack.c.l.b16 %v2676_v44  ;;  %v3118_v62 = vunpack.c.h.b16 %v2676_v44  ;;  %v3113_v44 = vunpack.c.h.b16 %v2656_v21  ;;  %v3112_v21 = vunpack.c.h.b16 %v2652_v34 }
 0x2cc   : > { %v2888_v47 = vpack.c.b16 %v2880_v45, %v2879_v3  ;;  %v3126_v5 = vpack.c.b16 %v3118_v62, %v3117_v39  ;;  %v3125_v45 = vpack.c.b16 %v3116_v43, %v3115_v46  ;;  %v2873_v3 = vunpack.c.l.b16 %v8457_v42 }
 0x2cd   : > { %v2368_v58 = vpop.f32.mrf.mxu2  ;;  %v2874_v62 = vunpack.c.l.b16 %v2652_v34  ;;  %v3124_v32 = vpack.c.b16 %v3114_v0, %v3113_v44  ;;  %v3123_v1 = vpack.c.b16 %v3112_v21, %v3111_v37 }
 0x2ce   : > { %v2417_v6 = vpop.f32.mrf.mxu3  ;;  %2897 = vmatpush.bf16.msra.mxu1 %v2888_v47  ;;  %3135 = vmatpush.bf16.msra.mxu3 %v3126_v5  ;;  %v2429_v52 = vpop.f32.mrf.mxu0 }
 0x2cf   : > { %v2478_v50 = vpop.f32.mrf.mxu1  ;;  %v2885_v63 = vpack.c.b16 %v2874_v62, %v2873_v3 }
 0x2d0   : > { %v2618_v39 = vpack.c.bf16 %v2478_v50, %v2429_v52  ;;  %v9485_v50 = vld [vmem:[#allocation21_spill] sm:$0xff] }
 0x2d1   : > { %2760 = vmatmul.bf16.vlgmr.msra.gmra.mxu0 %v8075_v19 }
 0x2d2   : > { %2898 = vmatpush.bf16.msra.mxu1 %v2887_v24  ;;  %3014 = vmatmul.bf16.vlgmr.msra.gmra.mxu2 %v9484_v51  ;;  %v4135_v60 = vunpack.c.h.b16 %v2618_v39  ;;  %v2673_v51 = vpack.c.bf16 %v8501_v33, %v8499_v40 }
 0x2d3   : > { %3136 = vmatpush.bf16.msra.mxu3 %v3125_v45  ;;  %3784 = vmatpush.bf16.xpose.msra.mxu0 %v8389_v31  ;;  %v3897_v31 = vunpack.c.l.b16 %v2618_v39 }
 0x2d4   : > { %4038 = vmatpush.bf16.xpose.msra.mxu2 %v8391_v54  ;;  %v3395_v37 = vunpack.c.l.b16 %v2673_v51  ;;  %v3633_v33 = vunpack.c.h.b16 %v2673_v51 }
 0x2d5   : > { %v2527_v48 = vpop.f32.mrf.mxu2 }
 0x2d6   : > { %v2576_v19 = vpop.f32.mrf.mxu3  ;;  %2899 = vmatpush.bf16.msra.mxu1 %v2886_v26  ;;  %v2431_v43 = vpop.f32.mrf.mxu0  ;;  %v2665_v26 = vpack.c.bf16 %v8489_v53, %v8487_v12 }
 0x2d7   : > { %v2619_v30 = vpack.c.bf16 %v2576_v19, %v2527_v48  ;;  %3137 = vmatpush.bf16.msra.mxu3 %v3124_v32  ;;  %v2480_v22 = vpop.f32.mrf.mxu1 }
 0x2d8   : > { %v2622_v13 = vpack.c.bf16 %v2480_v22, %v2431_v43  ;;  %v3631_v12 = vunpack.c.h.b16 %v2665_v26 }
 0x2d9   : > { %v4413_v8 = vunpack.c.l.b16 %v2619_v30  ;;  %v4651_v24 = vunpack.c.h.b16 %v2619_v30 }
 0x2da   : > { %2900 = vmatpush.bf16.msra.mxu1 %v2885_v63  ;;  %v3898_v54 = vunpack.c.l.b16 %v2622_v13  ;;  %v4136_v42 = vunpack.c.h.b16 %v2622_v13 }
 0x2db   : > { %3138 = vmatpush.bf16.msra.mxu3 %v3123_v1  ;;  %3785 = vmatpush.bf16.xpose.msra.mxu0 %v8377_v38 }
 0x2dc   : > { %4039 = vmatpush.bf16.xpose.msra.mxu2 %v8379_v7  ;;  %v8514_v52 = vpack.c.b16 %v3898_v54, %v3897_v31  ;;  %v8516_v34 = vpack.c.b16 %v4136_v42, %v4135_v60  ;;  %v2677_v7 = vpack.c.bf16 %v2417_v6, %v2368_v58  ;;  %v2669_v6 = vpack.c.bf16 %v8493_v9, %v8491_v23  ;;  %v9489_v42 = vld [vmem:[#allocation25_spill] sm:$0xff] }
 0x2dd   : > { %v2529_v47 = vpop.f32.mrf.mxu2 }
 0x2de   : > { %v2578_v5 = vpop.f32.mrf.mxu3  ;;  %2901 = vmatpush.bf16.msra.mxu1 %v8453_v49  ;;  %v2434_v46 = vpop.f32.mrf.mxu0  ;;  %v9486_v49 = vld [vmem:[#allocation22_spill] sm:$0xff]  ;;  %v3634_v62 = vunpack.c.h.b16 %v2677_v7  ;;  %v3394_v40 = vunpack.c.l.b16 %v2669_v6  ;;  %v3632_v32 = vunpack.c.h.b16 %v2669_v6  ;;  %v9493_v6 = vld [vmem:[#allocation73_spill] sm:$0xff] }
 0x2df   : > { %v2623_v29 = vpack.c.bf16 %v2578_v5, %v2529_v47  ;;  %3139 = vmatpush.bf16.msra.mxu3 %v8455_v15  ;;  %v2483_v0 = vpop.f32.mrf.mxu1  ;;  %v9490_v5 = vld [vmem:[#allocation26_spill] sm:$0xff] }
 0x2e0   : > { %v2626_v45 = vpack.c.bf16 %v2483_v0, %v2434_v46 }
 0x2e1   : > { %v4414_v44 = vunpack.c.l.b16 %v2623_v29  ;;  %v4652_v38 = vunpack.c.h.b16 %v2623_v29  ;;  %2765 = vmatmul.bf16.gmra.mxu0 %v9485_v50 }
 0x2e2   : > { %2902 = vmatpush.bf16.msra.mxu1 %v8437_v28  ;;  %3019 = vmatmul.bf16.gmra.mxu2 %v9486_v49  ;;  %v3396_v28 = vunpack.c.l.b16 %v2677_v7  ;;  %v3899_v48 = vunpack.c.l.b16 %v2626_v45  ;;  %v4137_v23 = vunpack.c.h.b16 %v2626_v45 }
 0x2e3   : > { %3140 = vmatpush.bf16.msra.mxu3 %v8439_v35  ;;  %3786 = vmatpush.bf16.xpose.msra.mxu0 %v8365_v25  ;;  %v8524_v39 = vpack.c.b16 %v4414_v44, %v4413_v8  ;;  %v8526_v15 = vpack.c.b16 %v4652_v38, %v4651_v24 }
 0x2e4   : > { %4040 = vmatpush.bf16.xpose.msra.mxu2 %v8367_v20  ;;  %v3404_v21 = vpack.c.b16 %v3396_v28, %v3395_v37 }
 0x2e5   : > { %9487 = vst [vmem:[#allocation18_spill] sm:$0xff] %v8524_v39  ;;  %v2532_v58 = vpop.f32.mrf.mxu2 }
 0x2e6   : > { %9488 = vst [vmem:[#allocation21_spill] sm:$0xff] %v8526_v15  ;;  %v2581_v3 = vpop.f32.mrf.mxu3  ;;  %2903 = vmatpush.bf16.msra.mxu1 %v8421_v4  ;;  %v2436_v35 = vpop.f32.mrf.mxu0  ;;  %v3642_v4 = vpack.c.b16 %v3634_v62, %v3633_v33  ;;  %v9496_v62 = vld [vmem:[#allocation30_spill] sm:$0xff]  ;;  %v9501_v33 = vld [vmem:[#allocation71_spill] sm:$0xff] }
 0x2e7   : > { %v2627_v25 = vpack.c.bf16 %v2581_v3, %v2532_v58  ;;  %3141 = vmatpush.bf16.msra.mxu3 %v8423_v27  ;;  %v2485_v20 = vpop.f32.mrf.mxu1  ;;  %v3393_v27 = vunpack.c.l.b16 %v2665_v26 }
 0x2e8   : > { %v2630_v9 = vpack.c.bf16 %v2485_v20, %v2436_v35  ;;  %v9494_v35 = vld [vmem:[#allocation74_spill] sm:$0xff]  ;;  %v9502_v20 = vld [vmem:[#allocation72_spill] sm:$0xff] }
 0x2e9   : > { %v3403_v22 = vpack.c.b16 %v3394_v40, %v3393_v27  ;;  %v4653_v60 = vunpack.c.h.b16 %v2627_v25  ;;  %v9500_v40 = vld [vmem:[#allocation54_spill] sm:$0xff] }
 0x2ea   : > { %2904 = vmatpush.bf16.msra.mxu1 %v8405_v55  ;;  %v3900_v19 = vunpack.c.l.b16 %v2630_v9  ;;  %v4138_v43 = vunpack.c.h.b16 %v2630_v9 }
 0x2eb   : > { %3142 = vmatpush.bf16.msra.mxu3 %v8407_v16  ;;  %3787 = vmatpush.bf16.xpose.msra.mxu0 %v8353_v59  ;;  %v3641_v16 = vpack.c.b16 %v3632_v32, %v3631_v12  ;;  %v4415_v59 = vunpack.c.l.b16 %v2627_v25  ;;  %v9497_v25 = vld [vmem:[#allocation53_spill] sm:$0xff] }
 0x2ec   : > { %4041 = vmatpush.bf16.xpose.msra.mxu2 %v8355_v56  ;;  %v8541_v1 = vpack.c.b16 %v3900_v19, %v3899_v48  ;;  %v8543_v55 = vpack.c.b16 %v4138_v43, %v4137_v23  ;;  %v9503_v32 = vld [vmem:[#allocation69_spill] sm:$0xff] }
 0x2ed   : > { %v2534_v53 = vpop.f32.mrf.mxu2 }
 0x2ee   : > { %3413 = vmatpush.bf16.msrb.mxu1 %v3404_v21  ;;  %v2583_v30 = vpop.f32.mrf.mxu3  ;;  %v2439_v63 = vpop.f32.mrf.mxu0 }
 0x2ef   : > { %3651 = vmatpush.bf16.msrb.mxu3 %v3642_v4  ;;  %v2631_v31 = vpack.c.bf16 %v2583_v30, %v2534_v53  ;;  %v2488_v56 = vpop.f32.mrf.mxu1  ;;  %v9504_v4 = vld [vmem:[#allocation70_spill] sm:$0xff]  ;;  %v9505_v53 = vld [vmem:[#allocation49_spill] sm:$0xff] }
 0x2f0   : > { %v2634_v47 = vpack.c.bf16 %v2488_v56, %v2439_v63 }
 0x2f1   : > { %v4416_v13 = vunpack.c.l.b16 %v2631_v31  ;;  %v4654_v54 = vunpack.c.h.b16 %v2631_v31  ;;  %2770 = vmatmul.bf16.gmra.mxu0 %v9489_v42 }
 0x2f2   : > { %3414 = vmatpush.bf16.msrb.mxu1 %v3403_v22  ;;  %3024 = vmatmul.bf16.gmra.mxu2 %v9490_v5  ;;  %v4139_v50 = vunpack.c.h.b16 %v2634_v47  ;;  %v9506_v22 = vld [vmem:[#allocation50_spill] sm:$0xff] }
 0x2f3   : > { %3652 = vmatpush.bf16.msrb.mxu3 %v3641_v16  ;;  %3788 = vmatpush.bf16.xpose.msra.mxu0 %v8341_v10  ;;  %v8548_v46 = vpack.c.b16 %v4416_v13, %v4415_v59  ;;  %v8550_v29 = vpack.c.b16 %v4654_v54, %v4653_v60  ;;  %v3901_v10 = vunpack.c.l.b16 %v2634_v47 }
 0x2f4   : > { %4042 = vmatpush.bf16.xpose.msra.mxu2 %v8343_v41 }
 0x2f5   : > { %9491 = vst [vmem:[#allocation22_spill] sm:$0xff] %v8548_v46  ;;  %v2537_v8 = vpop.f32.mrf.mxu2 }
 0x2f6   : > { %9492 = vst [vmem:[#allocation25_spill] sm:$0xff] %v8550_v29  ;;  %3415 = vmatpush.bf16.msrb.mxu1 %v8482_v11  ;;  %v2586_v24 = vpop.f32.mrf.mxu3  ;;  %v2441_v44 = vpop.f32.mrf.mxu0 }
 0x2f7   : > { %3653 = vmatpush.bf16.msrb.mxu3 %v8484_v14  ;;  %v2635_v38 = vpack.c.bf16 %v2586_v24, %v2537_v8  ;;  %v2490_v0 = vpop.f32.mrf.mxu1  ;;  %v9507_v24 = vld [vmem:[#allocation19_spill] sm:$0xff] }
 0x2f8   : > { %v2638_v7 = vpack.c.bf16 %v2490_v0, %v2441_v44  ;;  %v9509_v0 = vld [vmem:[#allocation67_spill] sm:$0xff] }
 0x2f9   : > { %v4417_v58 = vunpack.c.l.b16 %v2635_v38 }
 0x2fa   : > { %3416 = vmatpush.bf16.msrb.mxu1 %v8474_v2  ;;  %v3902_v45 = vunpack.c.l.b16 %v2638_v7  ;;  %v4140_v41 = vunpack.c.h.b16 %v2638_v7 }
 0x2fb   : > { %3654 = vmatpush.bf16.msrb.mxu3 %v8476_v61  ;;  %3789 = vmatpush.bf16.xpose.msra.mxu0 %v8325_v36  ;;  %v4655_v36 = vunpack.c.h.b16 %v2635_v38  ;;  %v9508_v38 = vld [vmem:[#allocation20_spill] sm:$0xff] }
 0x2fc   : > { %4043 = vmatpush.bf16.xpose.msra.mxu2 %v8327_v57  ;;  %v8561_v2 = vpack.c.b16 %v3902_v45, %v3901_v10  ;;  %v8563_v61 = vpack.c.b16 %v4140_v41, %v4139_v50  ;;  %v9510_v10 = vld [vmem:[#allocation68_spill] sm:$0xff] }
 0x2fd   : > { %v2539_v11 = vpop.f32.mrf.mxu2 }
 0x2fe   : > { %3417 = vmatpush.bf16.msrb.mxu1 %v8462_v17  ;;  %v2588_v14 = vpop.f32.mrf.mxu3  ;;  %v2444_v49 = vpop.f32.mrf.mxu0  ;;  %v9495_v17 = vld [vmem:[#allocation29_spill] sm:$0xff] }
 0x2ff   : > { %3655 = vmatpush.bf16.msrb.mxu3 %v8464_v18  ;;  %v2639_v51 = vpack.c.bf16 %v2588_v14, %v2539_v11  ;;  %v2493_v57 = vpop.f32.mrf.mxu1 }
 0x300   : > { %v2642_v18 = vpack.c.bf16 %v2493_v57, %v2444_v49 }
 0x301   : > { %v4418_v28 = vunpack.c.l.b16 %v2639_v51  ;;  %v4656_v3 = vunpack.c.h.b16 %v2639_v51  ;;  %2775 = vmatmul.bf16.gmra.mxu0 %v9495_v17 }
 0x302   : > { %3418 = vmatpush.bf16.msrb.mxu1 %v9493_v6  ;;  %3029 = vmatmul.bf16.gmra.mxu2 %v9496_v62  ;;  %v3903_v19 = vunpack.c.l.b16 %v2642_v18  ;;  %v4141_v43 = vunpack.c.h.b16 %v2642_v18 }
 0x303   : > { %3656 = vmatpush.bf16.msrb.mxu3 %v9494_v35  ;;  %3790 = vmatpush.bf16.xpose.msra.mxu0 %v9497_v25  ;;  %v8570_v26 = vpack.c.b16 %v4418_v28, %v4417_v58  ;;  %v8572_v37 = vpack.c.b16 %v4656_v3, %v4655_v36  ;;  %v9513_v36 = vld [vmem:[#allocation65_spill] sm:$0xff]  ;;  %v9514_v28 = vld [vmem:[#allocation66_spill] sm:$0xff] }
 0x304   : > { %4044 = vmatpush.bf16.xpose.msra.mxu2 %v9500_v40 }
 0x305   : > { %9498 = vst [vmem:[#allocation26_spill] sm:$0xff] %v8570_v26  ;;  %v2542_v21 = vpop.f32.mrf.mxu2 }
 0x306   : > { %9499 = vst [vmem:[#allocation73_spill] sm:$0xff] %v8572_v37  ;;  %3419 = vmatpush.bf16.msrb.mxu1 %v9501_v33  ;;  %v2591_v48 = vpop.f32.mrf.mxu3  ;;  %v2446_v23 = vpop.f32.mrf.mxu0 }
 0x307   : > { %3657 = vmatpush.bf16.msrb.mxu3 %v9502_v20  ;;  %v2643_v9 = vpack.c.bf16 %v2591_v48, %v2542_v21  ;;  %v2495_v27 = vpop.f32.mrf.mxu1 }
 0x308   : > { %v2646_v12 = vpack.c.bf16 %v2495_v27, %v2446_v23  ;;  %v9518_v27 = vld [vmem:[#allocation64_spill] sm:$0xff] }
 0x309   : > { %v4419_v56 = vunpack.c.l.b16 %v2643_v9  ;;  %v4657_v42 = vunpack.c.h.b16 %v2643_v9  ;;  %v9515_v9 = vld [vmem:[#allocation23_spill] sm:$0xff] }
 0x30a   : > { %3420 = vmatpush.bf16.msrb.mxu1 %v9503_v32  ;;  %v3904_v30 = vunpack.c.l.b16 %v2646_v12  ;;  %v4142_v63 = vunpack.c.h.b16 %v2646_v12  ;;  %v9516_v32 = vld [vmem:[#allocation24_spill] sm:$0xff] }
 0x30b   : > { %3658 = vmatpush.bf16.msrb.mxu3 %v9504_v4  ;;  %3791 = vmatpush.bf16.xpose.msra.mxu0 %v9505_v53  ;;  %v9517_v4 = vld [vmem:[#allocation63_spill] sm:$0xff] }
 0x30c   : > { %4045 = vmatpush.bf16.xpose.msra.mxu2 %v9506_v22  ;;  %v8581_v60 = vpack.c.b16 %v3904_v30, %v3903_v19  ;;  %v8583_v13 = vpack.c.b16 %v4142_v63, %v4141_v43 }
 0x30d   : > { %v2544_v31 = vpop.f32.mrf.mxu2 }
 0x30e   : > { %v2593_v16 = vpop.f32.mrf.mxu3  ;;  %v2449_v59 = vpop.f32.mrf.mxu0 }
 0x30f   : > { %v2647_v54 = vpack.c.bf16 %v2593_v16, %v2544_v31  ;;  %v2498_v8 = vpop.f32.mrf.mxu1 }
 0x310   : > { %v2650_v44 = vpack.c.bf16 %v2498_v8, %v2449_v59 }
 0x311   : > { %v4420_v47 = vunpack.c.l.b16 %v2647_v54  ;;  %v4658_v5 = vunpack.c.h.b16 %v2647_v54  ;;  %3276 = vmatmul.bf16.vlgmr.msrb.gmra.mxu0 %v9507_v24  ;;  %v9520_v54 = vld [vmem:[#allocation61_spill] sm:$0xff] }
 0x312   : > { %3530 = vmatmul.bf16.vlgmr.msrb.gmra.mxu2 %v9508_v38  ;;  %v3905_v51 = vunpack.c.l.b16 %v2650_v44  ;;  %v4143_v6 = vunpack.c.h.b16 %v2650_v44 }
 0x313   : > { %4300 = vmatpush.bf16.xpose.msrb.mxu0 %v9509_v0  ;;  %v8589_v50 = vpack.c.b16 %v4420_v47, %v4419_v56  ;;  %v8591_v7 = vpack.c.b16 %v4658_v5, %v4657_v42  ;;  %v9521_v56 = vld [vmem:[#allocation62_spill] sm:$0xff] }
 0x314   : > { %4554 = vmatpush.bf16.xpose.msrb.mxu2 %v9510_v10 }
 0x315   : > { %9511 = vst [vmem:[#allocation74_spill] sm:$0xff] %v8589_v50  ;;  %v2547_v45 = vpop.f32.mrf.mxu2 }
 0x316   : > { %9512 = vst [vmem:[#allocation29_spill] sm:$0xff] %v8591_v7  ;;  %v2596_v41 = vpop.f32.mrf.mxu3  ;;  %v2451_v11 = vpop.f32.mrf.mxu0 }
 0x317   : > { %v2651_v14 = vpack.c.bf16 %v2596_v41, %v2547_v45  ;;  %v2500_v49 = vpop.f32.mrf.mxu1 }
 0x318   : > { %v2654_v58 = vpack.c.bf16 %v2500_v49, %v2451_v11 }
 0x319   : > { %v4421_v33 = vunpack.c.l.b16 %v2651_v14  ;;  %v4659_v20 = vunpack.c.h.b16 %v2651_v14 }
 0x31a   : > { %v3906_v3 = vunpack.c.l.b16 %v2654_v58  ;;  %v4144_v35 = vunpack.c.h.b16 %v2654_v58  ;;  %v9524_v58 = vld [vmem:[#allocation59_spill] sm:$0xff] }
 0x31b   : > { %4301 = vmatpush.bf16.xpose.msrb.mxu0 %v9513_v36  ;;  %v9525_v36 = vld [vmem:[#allocation60_spill] sm:$0xff] }
 0x31c   : > { %4555 = vmatpush.bf16.xpose.msrb.mxu2 %v9514_v28  ;;  %v8595_v62 = vpack.c.b16 %v3906_v3, %v3905_v51  ;;  %v8597_v25 = vpack.c.b16 %v4144_v35, %v4143_v6  ;;  %v9522_v51 = vld [vmem:[#allocation27_spill] sm:$0xff]  ;;  %v9523_v6 = vld [vmem:[#allocation28_spill] sm:$0xff] }
 0x31d   : > { %v2549_v57 = vpop.f32.mrf.mxu2 }
 0x31e   : > { %v2598_v17 = vpop.f32.mrf.mxu3  ;;  %v2454_v18 = vpop.f32.mrf.mxu0 }
 0x31f   : > { %v2655_v40 = vpack.c.bf16 %v2598_v17, %v2549_v57  ;;  %v2503_v23 = vpop.f32.mrf.mxu1 }
 0x320   : > { %v2658_v53 = vpack.c.bf16 %v2503_v23, %v2454_v18  ;;  %v9527_v23 = vld [vmem:[#allocation58_spill] sm:$0xff] }
 0x321   : > { %v4422_v21 = vunpack.c.l.b16 %v2655_v40  ;;  %v4660_v48 = vunpack.c.h.b16 %v2655_v40  ;;  %3281 = vmatmul.bf16.gmra.mxu0 %v9515_v9 }
 0x322   : > { %3535 = vmatmul.bf16.gmra.mxu2 %v9516_v32  ;;  %v3907_v31 = vunpack.c.l.b16 %v2658_v53  ;;  %v4145_v16 = vunpack.c.h.b16 %v2658_v53 }
 0x323   : > { %4302 = vmatpush.bf16.xpose.msrb.mxu0 %v9517_v4  ;;  %v8603_v19 = vpack.c.b16 %v4422_v21, %v4421_v33  ;;  %v8605_v43 = vpack.c.b16 %v4660_v48, %v4659_v20  ;;  %v9526_v48 = vld [vmem:[#allocation57_spill] sm:$0xff] }
 0x324   : > { %4556 = vmatpush.bf16.xpose.msrb.mxu2 %v9518_v27 }
 0x325   : > { %9519 = vst [vmem:[#allocation30_spill] sm:$0xff] %v8603_v19  ;;  %v2552_v12 = vpop.f32.mrf.mxu2 }
 0x326   : > { %v2601_v30 = vpop.f32.mrf.mxu3  ;;  %v2456_v63 = vpop.f32.mrf.mxu0 }
 0x327   : > { %v2505_v22 = vpop.f32.mrf.mxu1  ;;  %v2659_v5 = vpack.c.bf16 %v2601_v30, %v2552_v12 }
 0x328   : > { %v2662_v59 = vpack.c.bf16 %v2505_v22, %v2456_v63 }
 0x329   : > { %v4423_v45 = vunpack.c.l.b16 %v2659_v5  ;;  %v4661_v41 = vunpack.c.h.b16 %v2659_v5  ;;  %v9530_v5 = vld [vmem:[#allocation55_spill] sm:$0xff] }
 0x32a   : > { %v3908_v42 = vunpack.c.l.b16 %v2662_v59  ;;  %v4146_v47 = vunpack.c.h.b16 %v2662_v59 }
 0x32b   : > { %4303 = vmatpush.bf16.xpose.msrb.mxu0 %v9520_v54 }
 0x32c   : > { %4557 = vmatpush.bf16.xpose.msrb.mxu2 %v9521_v56  ;;  %v8609_v38 = vpack.c.b16 %v3908_v42, %v3907_v31  ;;  %v8611_v0 = vpack.c.b16 %v4146_v47, %v4145_v16  ;;  %v9528_v42 = vld [vmem:[#allocation31_spill] sm:$0xff]  ;;  %v9529_v47 = vld [vmem:[#allocation32_spill] sm:$0xff] }
 0x32d   : > { %v2554_v8 = vpop.f32.mrf.mxu2 }
 0x32e   : > { %v2603_v24 = vpop.f32.mrf.mxu3  ;;  %v2459_v44 = vpop.f32.mrf.mxu0 }
 0x32f   : > { %v2663_v10 = vpack.c.bf16 %v2603_v24, %v2554_v8  ;;  %v2508_v49 = vpop.f32.mrf.mxu1  ;;  %v9531_v8 = vld [vmem:[#allocation56_spill] sm:$0xff] }
 0x330   : > { %v2666_v57 = vpack.c.bf16 %v2508_v49, %v2459_v44 }
 0x331   : > { %v4424_v11 = vunpack.c.l.b16 %v2663_v10  ;;  %v4662_v14 = vunpack.c.h.b16 %v2663_v10  ;;  %3286 = vmatmul.bf16.gmra.mxu0 %v9522_v51 }
 0x332   : > { %3540 = vmatmul.bf16.gmra.mxu2 %v9523_v6  ;;  %v3909_v33 = vunpack.c.l.b16 %v2666_v57  ;;  %v4147_v20 = vunpack.c.h.b16 %v2666_v57 }
 0x333   : > { %4304 = vmatpush.bf16.xpose.msrb.mxu0 %v9524_v58  ;;  %v8617_v28 = vpack.c.b16 %v4424_v11, %v4423_v45  ;;  %v8619_v3 = vpack.c.b16 %v4662_v14, %v4661_v41  ;;  %v9532_v58 = vld [vmem:[#allocation51_spill] sm:$0xff] }
 0x334   : > { %4558 = vmatpush.bf16.xpose.msrb.mxu2 %v9525_v36  ;;  %v9533_v36 = vld [vmem:[#allocation52_spill] sm:$0xff] }
 0x335   : > { %v2557_v35 = vpop.f32.mrf.mxu2 }
 0x336   : > { %v2606_v17 = vpop.f32.mrf.mxu3  ;;  %v2461_v18 = vpop.f32.mrf.mxu0 }
 0x337   : > { %v2510_v40 = vpop.f32.mrf.mxu1  ;;  %v2667_v4 = vpack.c.bf16 %v2606_v17, %v2557_v35 }
 0x338   : > { %v2670_v21 = vpack.c.bf16 %v2510_v40, %v2461_v18 }
 0x339   : > { %v4425_v31 = vunpack.c.l.b16 %v2667_v4  ;;  %v4663_v16 = vunpack.c.h.b16 %v2667_v4 }
 0x33a   : > { %v3910_v9 = vunpack.c.l.b16 %v2670_v21  ;;  %v4148_v32 = vunpack.c.h.b16 %v2670_v21 }
 0x33b   : > { %4305 = vmatpush.bf16.xpose.msrb.mxu0 %v9526_v48 }
 0x33c   : > { %4559 = vmatpush.bf16.xpose.msrb.mxu2 %v9527_v23  ;;  %v8623_v30 = vpack.c.b16 %v3910_v9, %v3909_v33  ;;  %v8625_v63 = vpack.c.b16 %v4148_v32, %v4147_v20 }
 0x33d   : > { %v2559_v27 = vpop.f32.mrf.mxu2 }
 0x33e   : > { %v2608_v12 = vpop.f32.mrf.mxu3  ;;  %v2464_v53 = vpop.f32.mrf.mxu0 }
 0x33f   : > { %v2671_v22 = vpack.c.bf16 %v2608_v12, %v2559_v27  ;;  %v2513_v56 = vpop.f32.mrf.mxu1  ;;  %v9534_v12 = vld [vmem:[#allocation33_spill] sm:$0xff] }
 0x340   : > { %v2674_v45 = vpack.c.bf16 %v2513_v56, %v2464_v53  ;;  %v9535_v53 = vld [vmem:[#allocation34_spill] sm:$0xff] }
 0x341   : > { %v4426_v59 = vunpack.c.l.b16 %v2671_v22  ;;  %v4664_v54 = vunpack.c.h.b16 %v2671_v22  ;;  %3291 = vmatmul.bf16.gmra.mxu0 %v9528_v42 }
 0x342   : > { %3545 = vmatmul.bf16.gmra.mxu2 %v9529_v47  ;;  %v3911_v49 = vunpack.c.l.b16 %v2674_v45  ;;  %v4149_v51 = vunpack.c.h.b16 %v2674_v45 }
 0x343   : > { %4306 = vmatpush.bf16.xpose.msrb.mxu0 %v9530_v5  ;;  %v8631_v24 = vpack.c.b16 %v4426_v59, %v4425_v31  ;;  %v8633_v44 = vpack.c.b16 %v4664_v54, %v4663_v16 }
 0x344   : > { %4560 = vmatpush.bf16.xpose.msrb.mxu2 %v9531_v8  ;;  %v9536_v8 = vld [vmem:[#allocation37_spill] sm:$0xff] }
 0x345   : > { %v2562_v10 = vpop.f32.mrf.mxu2 }
 0x346   : > { %v2611_v41 = vpop.f32.mrf.mxu3  ;;  %v2466_v11 = vpop.f32.mrf.mxu0 }
 0x347   : > { %v2515_v14 = vpop.f32.mrf.mxu1  ;;  %v2675_v17 = vpack.c.bf16 %v2611_v41, %v2562_v10  ;;  %v9537_v10 = vld [vmem:[#allocation38_spill] sm:$0xff] }
 0x348   : > { %v2678_v6 = vpack.c.bf16 %v2515_v14, %v2466_v11 }
 0x349   : > { %v4427_v9 = vunpack.c.l.b16 %v2675_v17  ;;  %v4665_v32 = vunpack.c.h.b16 %v2675_v17 }
 0x34a   : > { %v3912_v35 = vunpack.c.l.b16 %v2678_v6  ;;  %v4150_v57 = vunpack.c.h.b16 %v2678_v6 }
 0x34b   : > { %4307 = vmatpush.bf16.xpose.msrb.mxu0 %v9532_v58 }
 0x34c   : > { %4561 = vmatpush.bf16.xpose.msrb.mxu2 %v9533_v36  ;;  %v8637_v40 = vpack.c.b16 %v3912_v35, %v3911_v49  ;;  %v8639_v33 = vpack.c.b16 %v4150_v57, %v4149_v51  ;;  %v9538_v35 = vld [vmem:[#allocation41_spill] sm:$0xff]  ;;  %v9539_v57 = vld [vmem:[#allocation42_spill] sm:$0xff] }
 0x34d   : > { %v2564_v18 = vpop.f32.mrf.mxu2 }
 0x34e   : > { %v2613_v20 = vpop.f32.mrf.mxu3  ;;  %v2761_v21 = vpop.f32.mrf.mxu0 }
 0x34f   : > { %v2679_v48 = vpack.c.bf16 %v2613_v20, %v2564_v18  ;;  %v8641_v23 = vmul.f32 0.088388346, %v2761_v21 }
 0x351   : > { %v4428_v4 = vunpack.c.l.b16 %v2679_v48  ;;  %v4666_v27 = vunpack.c.h.b16 %v2679_v48  ;;  %2789 = vmax.xlane.f32.xlu1 %v8641_v23  ;;  %3792 = vmatmul.bf16.vlgmr.msra.gmra.mxu0 %v9534_v12 }
 0x352   : > { %4046 = vmatmul.bf16.vlgmr.msra.gmra.mxu2 %v9535_v53 }
 0x353   : > { %v8646_v22 = vpack.c.b16 %v4428_v4, %v4427_v9  ;;  %v8648_v31 = vpack.c.b16 %v4666_v27, %v4665_v32  ;;  %v9540_v4 = vld [vmem:[#allocation45_spill] sm:$0xff]  ;;  %v9541_v27 = vld [vmem:[#allocation46_spill] sm:$0xff] }
 0x355   : > { %v3015_v16 = vpop.f32.mrf.mxu2 }
 0x356   : > { %v8650_v59 = vmul.f32 0.088388346, %v3015_v16  ;;  %v2763_v54 = vpop.f32.mrf.mxu0 }
 0x357   : > { %v8652_v56 = vmul.f32 0.088388346, %v2763_v54 }
 0x358   : > { %3043 = vmax.xlane.f32.xlu0 %v8650_v59 }
 0x359   : > { %2791 = vmax.xlane.f32.xlu1 %v8652_v56 }
 0x35d   : > { %v3017_v42 = vpop.f32.mrf.mxu2 }
 0x35e   : > { %v2766_v47 = vpop.f32.mrf.mxu0  ;;  %v8656_v5 = vmul.f32 0.088388346, %v3017_v42 }
 0x35f   : > { %v8661_v41 = vmul.f32 0.088388346, %v2766_v47 }
 0x360   : > { %3045 = vmax.xlane.f32.xlu0 %v8656_v5 }
 0x361   : > { %3797 = vmatmul.bf16.gmra.mxu0 %v9536_v8 }
 0x362   : > { %4051 = vmatmul.bf16.gmra.mxu2 %v9537_v10 }
 0x365   : > { %v3020_v45 = vpop.f32.mrf.mxu2 }
 0x366   : > { %v8663_v11 = vmul.f32 0.088388346, %v3020_v45  ;;  %v2768_v14 = vpop.f32.mrf.mxu0  ;;  %v9542_v45 = vld [vmem:[#allocation35_spill] sm:$0xff] }
 0x367   : > { %v8665_v49 = vmul.f32 0.088388346, %v2768_v14  ;;  %v9543_v14 = vld [vmem:[#allocation36_spill] sm:$0xff] }
 0x368   : > { %3047 = vmax.xlane.f32.xlu2 %v8663_v11  ;;  %2793 = vmax.xlane.f32.xlu0 %v8661_v41 }
 0x369   : > { %2795 = vmax.xlane.f32.xlu1 %v8665_v49 }
 0x36d   : > { %v3022_v51 = vpop.f32.mrf.mxu2 }
 0x36e   : > { %v2771_v6 = vpop.f32.mrf.mxu0  ;;  %v8670_v58 = vmul.f32 0.088388346, %v3022_v51 }
 0x36f   : > { %v8672_v36 = vmul.f32 0.088388346, %v2771_v6 }
 0x370   : > { %3049 = vmax.xlane.f32.xlu2 %v8670_v58 }
 0x371   : > { %2797 = vmax.xlane.f32.xlu1 %v8672_v36  ;;  %3802 = vmatmul.bf16.gmra.mxu0 %v9538_v35 }
 0x372   : > { %4056 = vmatmul.bf16.gmra.mxu2 %v9539_v57 }
 0x375   : > { %v3025_v17 = vpop.f32.mrf.mxu2 }
 0x376   : > { %v8678_v18 = vmul.f32 0.088388346, %v3025_v17  ;;  %v2773_v20 = vpop.f32.mrf.mxu0 }
 0x377   : > { %v8683_v32 = vmul.f32 0.088388346, %v2773_v20 }
 0x378   : > { %3051 = vmax.xlane.f32.xlu2 %v8678_v18 }
 0x37d   : > { %v3027_v21 = vpop.f32.mrf.mxu2 }
 0x37e   : > { %v2776_v48 = vpop.f32.mrf.mxu0  ;;  %v8681_v9 = vmul.f32 0.088388346, %v3027_v21 }
 0x37f   : > { %v8689_v53 = vmul.f32 0.088388346, %v2776_v48 }
 0x380   : > { %3053 = vmax.xlane.f32.xlu0 %v8681_v9  ;;  %2799 = vmax.xlane.f32.xlu2 %v8683_v32 }
 0x381   : > { %3807 = vmatmul.bf16.gmra.mxu0 %v9540_v4  ;;  %v9544_v4 = vld [vmem:[#allocation39_spill] sm:$0xff] }
 0x382   : > { %4061 = vmatmul.bf16.gmra.mxu2 %v9541_v27  ;;  %v9545_v27 = vld [vmem:[#allocation40_spill] sm:$0xff] }
 0x385   : > { %v3030_v12 = vpop.f32.mrf.mxu2 }
 0x386   : > { %v8691_v16 = vmul.f32 0.088388346, %v3030_v12  ;;  %v2778_v54 = vpop.f32.mrf.mxu0 }
 0x387   : > { %v8697_v10 = vmul.f32 0.088388346, %v2778_v54 }
 0x388   : > { %3055 = vmax.xlane.f32.xlu0 %v8691_v16  ;;  %2801 = vmax.xlane.f32.xlu2 %v8689_v53 }
 0x38d   : > { %v3032_v42 = vpop.f32.mrf.mxu2 }
 0x38e   : > { %v3277_v47 = vpop.f32.mrf.mxu0  ;;  %v8695_v8 = vmul.f32 0.088388346, %v3032_v42 }
 0x38f   : > { %v8703_v6 = vmul.f32 0.088388346, %v3277_v47 }
 0x390   : > { %3057 = vmax.xlane.f32.xlu1 %v8695_v8  ;;  %2803 = vmax.xlane.f32.xlu0 %v8697_v10 }
 0x391   : > { %4308 = vmatmul.bf16.vlgmr.msrb.gmra.mxu0 %v9542_v45 }
 0x392   : > { %4562 = vmatmul.bf16.vlgmr.msrb.gmra.mxu2 %v9543_v14 }
 0x395   : > { %v3531_v51 = vpop.f32.mrf.mxu2 }
 0x396   : > { %v8705_v35 = vmul.f32 0.088388346, %v3531_v51  ;;  %v3279_v57 = vpop.f32.mrf.mxu0 }
 0x397   : > { %v8711_v48 = vmul.f32 0.088388346, %v3279_v57 }
 0x398   : > { %3559 = vmax.xlane.f32.xlu1 %v8705_v35  ;;  %3305 = vmax.xlane.f32.xlu0 %v8703_v6 }
 0x39d   : > { %v3533_v17 = vpop.f32.mrf.mxu2 }
 0x39e   : > { %v3282_v20 = vpop.f32.mrf.mxu0  ;;  %v8709_v21 = vmul.f32 0.088388346, %v3533_v17  ;;  %v9546_v17 = vld [vmem:[#allocation43_spill] sm:$0xff] }
 0x39f   : > { %v8717_v54 = vmul.f32 0.088388346, %v3282_v20  ;;  %v9547_v20 = vld [vmem:[#allocation44_spill] sm:$0xff] }
 0x3a0   : > { %3561 = vmax.xlane.f32.xlu2 %v8709_v21  ;;  %3307 = vmax.xlane.f32.xlu1 %v8711_v48 }
 0x3a1   : > { %4313 = vmatmul.bf16.gmra.mxu0 %v9544_v4 }
 0x3a2   : > { %4567 = vmatmul.bf16.gmra.mxu2 %v9545_v27 }
 0x3a5   : > { %v3536_v12 = vpop.f32.mrf.mxu2 }
 0x3a6   : > { %v8719_v42 = vmul.f32 0.088388346, %v3536_v12  ;;  %v3284_v47 = vpop.f32.mrf.mxu0 }
 0x3a7   : > { %v8723_v51 = vmul.f32 0.088388346, %v3284_v47 }
 0x3a8   : > { %3563 = vmax.xlane.f32.xlu2 %v8719_v42  ;;  %3309 = vmax.xlane.f32.xlu1 %v8717_v54 }
 0x3ad   : > { %v3538_v45 = vpop.f32.mrf.mxu2 }
 0x3ae   : > { %v3287_v14 = vpop.f32.mrf.mxu0  ;;  %v8725_v57 = vmul.f32 0.088388346, %v3538_v45 }
 0x3af   : > { %v8731_v27 = vmul.f32 0.088388346, %v3287_v14  ;;  %v9551_v14 = vld [vmem:[#allocation48_spill] sm:$0xff] }
 0x3b0   : > { %3311 = vmax.xlane.f32.xlu2 %v8723_v51  ;;  %3565 = vmax.xlane.f32.xlu0 %v8725_v57 }
 0x3b1   : > { %4318 = vmatmul.bf16.gmra.mxu0 %v9546_v17  ;;  %v9550_v17 = vld [vmem:[#allocation47_spill] sm:$0xff] }
 0x3b2   : > { %4572 = vmatmul.bf16.gmra.mxu2 %v9547_v20 }
 0x3b5   : > { %v3541_v4 = vpop.f32.mrf.mxu2 }
 0x3b6   : > { %v8733_v12 = vmul.f32 0.088388346, %v3541_v4  ;;  %v3289_v15 = vpop.f32.mrf.mxu0 }
 0x3b7   : > { %v8739_v29 = vmul.f32 0.088388346, %v3289_v15 }
 0x3b8   : > { %3313 = vmax.xlane.f32.xlu2 %v8731_v27  ;;  %3567 = vmax.xlane.f32.xlu0 %v8733_v12 }
 0x3b9   : > { %9549 = vst [vmem:[#allocation54_spill] sm:$0xff] %v8739_v29 }
 0x3bd   : > { %v3543_v47 = vpop.f32.mrf.mxu2 }
 0x3be   : > { %v3292_v45 = vpop.f32.mrf.mxu0  ;;  %v8737_v39 = vmul.f32 0.088388346, %v3543_v47 }
 0x3bf   : > { %v8745_v46 = vmul.f32 0.088388346, %v3292_v45 }
 0x3c0   : > { %9548 = vst [vmem:[#allocation53_spill] sm:$0xff] %v8737_v39  ;;  %3569 = vmax.xlane.f32.xlu1 %v8737_v39  ;;  %3315 = vmax.xlane.f32.xlu0 %v8739_v29 }
 0x3c1   : > { %4323 = vmatmul.bf16.gmra.mxu0 %v9550_v17  ;;  %9552 = vst [vmem:[#allocation71_spill] sm:$0xff] %v8745_v46 }
 0x3c2   : > { %4577 = vmatmul.bf16.gmra.mxu2 %v9551_v14 }
 0x3c4   : > { %v2790_v20 = vpop.xlane.xlu1 %2789 }
 0x3c5   : > { %v3546_v4 = vpop.f32.mrf.mxu2  ;;  %v2805_v47 = vsub.f32 %v8641_v23, %v2790_v20 }
 0x3c6   : > { %v8747_v37 = vmul.f32 0.088388346, %v3546_v4  ;;  %v3294_v26 = vpop.f32.mrf.mxu0 }
 0x3c7   : > { %v2813_v39 = vmul.f32 1.442695, %v2805_v47  ;;  %v8755_v45 = vmul.f32 0.088388346, %v3294_v26 }
 0x3c8   : > { %3571 = vmax.xlane.f32.xlu1 %v8747_v37  ;;  %3317 = vmax.xlane.f32.xlu0 %v8745_v46 }
 0x3c9   : > { %7378 = vpow2.f32 %v2813_v39 }
 0x3cb   : > { %v3044_v15 = vpop.xlane.xlu0 %3043 }
 0x3cc   : > { %v2792_v29 = vpop.xlane.xlu1 %2791  ;;  %v3059_v4 = vsub.f32 %v8650_v59, %v3044_v15 }
 0x3cd   : > { %v3548_v7 = vpop.f32.mrf.mxu2  ;;  %v2806_v17 = vsub.f32 %v8652_v56, %v2792_v29 }
 0x3ce   : > { %v3793_v14 = vpop.f32.mrf.mxu0  ;;  %v8753_v50 = vmul.f32 0.088388346, %v3548_v7  ;;  %v3067_v23 = vmul.f32 1.442695, %v3059_v4 }
 0x3cf   : > { %v2815_v19 = vmul.f32 1.442695, %v2806_v17  ;;  %v8761_v29 = vpop.eup %7378  ;;  %v8763_v7 = vmul.f32 0.088388346, %v3793_v14 }
 0x3d0   : > { %3573 = vmax.xlane.f32.xlu2 %v8753_v50  ;;  %3319 = vmax.xlane.f32.xlu1 %v8755_v45 }
 0x3d1   : > { %7380 = vpow2.f32 %v2815_v19  ;;  %9553 = vst [vmem:[#allocation72_spill] sm:$0xff] %v8763_v7 }
 0x3d2   : > { %7382 = vpow2.f32 %v3067_v23 }
 0x3d3   : > { %v3046_v20 = vpop.xlane.xlu0 %3045 }
 0x3d4   : > { %v3060_v47 = vsub.f32 %v8656_v5, %v3046_v20 }
 0x3d5   : > { %v4047_v46 = vpop.f32.mrf.mxu2 }
 0x3d6   : > { %v3069_v26 = vmul.f32 1.442695, %v3060_v47  ;;  %v8765_v56 = vmul.f32 0.088388346, %v4047_v46  ;;  %v3795_v59 = vpop.f32.mrf.mxu0 }
 0x3d7   : > { %v8767_v15 = vpop.eup %7380 }
 0x3d8   : > { %9554 = vst [vmem:[#allocation69_spill] sm:$0xff] %v8765_v56  ;;  %v2845_v39 = vpack.c.bf16 %v8767_v15, %v8761_v29  ;;  %7384 = vpow2.f32 %v3069_v26  ;;  %4075 = vmax.xlane.f32.xlu2 %v8765_v56  ;;  %3821 = vmax.xlane.f32.xlu1 %v8763_v7  ;;  %v8775_v14 = vpop.eup %7382  ;;  %v8782_v7 = vmul.f32 0.088388346, %v3795_v59 }
 0x3da   : > { %2905 = vmatmul.bf16.vlgmr.msra.gmra.mxu1 %v2845_v39 }
 0x3db   : > { %v3048_v19 = vpop.xlane.xlu2 %3047  ;;  %v2794_v5 = vpop.xlane.xlu0 %2793  ;;  %3929 = vmatpush.bf16.msra.mxu1 %v8637_v40 }
 0x3dc   : > { %v2807_v46 = vsub.f32 %v8661_v41, %v2794_v5  ;;  %v2796_v17 = vpop.xlane.xlu1 %2795  ;;  %v3061_v40 = vsub.f32 %v8663_v11, %v3048_v19 }
 0x3dd   : > { %v2808_v4 = vsub.f32 %v8665_v49, %v2796_v17  ;;  %v4049_v23 = vpop.f32.mrf.mxu2 }
 0x3de   : > { %v8778_v20 = vpop.eup %7384  ;;  %v2817_v47 = vmul.f32 1.442695, %v2807_v46  ;;  %v3798_v26 = vpop.f32.mrf.mxu0  ;;  %v8780_v56 = vmul.f32 0.088388346, %v4049_v23  ;;  %v3071_v49 = vmul.f32 1.442695, %v3061_v40 }
 0x3df   : > { %v3099_v39 = vpack.c.bf16 %v8778_v20, %v8775_v14  ;;  %v2819_v41 = vmul.f32 1.442695, %v2808_v4  ;;  %3930 = vmatpush.bf16.msra.mxu1 %v8623_v30  ;;  %v8793_v11 = vmul.f32 0.088388346, %v3798_v26 }
 0x3e0   : > { %4077 = vmax.xlane.f32.xlu0 %v8780_v56  ;;  %3823 = vmax.xlane.f32.xlu2 %v8782_v7  ;;  %7386 = vpow2.f32 %v2817_v47 }
 0x3e1   : > { %3143 = vmatmul.bf16.vlgmr.msra.gmra.mxu3 %v3099_v39  ;;  %7388 = vpow2.f32 %v2819_v41 }
 0x3e2   : > { %4167 = vmatpush.bf16.msra.mxu3 %v8639_v33  ;;  %7390 = vpow2.f32 %v3071_v49 }
 0x3e3   : > { %v3050_v59 = vpop.xlane.xlu2 %3049  ;;  %3931 = vmatpush.bf16.msra.mxu1 %v8609_v38 }
 0x3e4   : > { %v3062_v5 = vsub.f32 %v8670_v58, %v3050_v59  ;;  %v2798_v58 = vpop.xlane.xlu1 %2797 }
 0x3e5   : > { %v4052_v46 = vpop.f32.mrf.mxu2  ;;  %v2809_v26 = vsub.f32 %v8672_v36, %v2798_v58 }
 0x3e6   : > { %v3073_v19 = vmul.f32 1.442695, %v3062_v5  ;;  %v8795_v30 = vmul.f32 0.088388346, %v4052_v46  ;;  %4168 = vmatpush.bf16.msra.mxu3 %v8625_v63  ;;  %v3800_v17 = vpop.f32.mrf.mxu0  ;;  %v8798_v4 = vpop.eup %7386 }
 0x3e7   : > { %3932 = vmatpush.bf16.msra.mxu1 %v8595_v62  ;;  %v8801_v33 = vpop.eup %7388 }
 0x3e8   : > { %7392 = vpow2.f32 %v3073_v19  ;;  %4079 = vmax.xlane.f32.xlu0 %v8795_v30  ;;  %3825 = vmax.xlane.f32.xlu2 %v8793_v11  ;;  %v2846_v38 = vpack.c.bf16 %v8801_v33, %v8798_v4  ;;  %v8809_v23 = vpop.eup %7390 }
 0x3ea   : > { %4169 = vmatpush.bf16.msra.mxu3 %v8611_v0  ;;  %2910 = vmatmul.bf16.gmra.mxu1 %v2846_v38  ;;  %v8818_v0 = vmul.f32 0.088388346, %v3800_v17 }
 0x3eb   : > { %v3052_v63 = vpop.xlane.xlu2 %3051  ;;  %3933 = vmatpush.bf16.msra.mxu1 %v8581_v60  ;;  %v2821_v60 = vmul.f32 1.442695, %v2809_v26 }
 0x3ec   : > { %v3063_v41 = vsub.f32 %v8678_v18, %v3052_v63 }
 0x3ed   : > { %v4054_v62 = vpop.f32.mrf.mxu2  ;;  %7394 = vpow2.f32 %v2821_v60 }
 0x3ee   : > { %v8811_v47 = vpop.eup %7392  ;;  %4170 = vmatpush.bf16.msra.mxu3 %v8597_v25  ;;  %v3803_v39 = vpop.f32.mrf.mxu0  ;;  %v8815_v40 = vmul.f32 0.088388346, %v4054_v62  ;;  %v3075_v25 = vmul.f32 1.442695, %v3063_v41 }
 0x3ef   : > { %v3100_v49 = vpack.c.bf16 %v8811_v47, %v8809_v23  ;;  %3934 = vmatpush.bf16.msra.mxu1 %v8561_v2 }
 0x3f0   : > { %4081 = vmax.xlane.f32.xlu1 %v8815_v40  ;;  %3827 = vmax.xlane.f32.xlu0 %v8818_v0  ;;  %7396 = vpow2.f32 %v3075_v25 }
 0x3f1   : > { %3148 = vmatmul.bf16.gmra.mxu3 %v3100_v49 }
 0x3f2   : > { %4171 = vmatpush.bf16.msra.mxu3 %v8583_v13  ;;  %v8832_v13 = vmul.f32 0.088388346, %v3803_v39 }
 0x3f3   : > { %v3054_v36 = vpop.xlane.xlu0 %3053  ;;  %v2800_v59 = vpop.xlane.xlu2 %2799  ;;  %3935 = vmatpush.bf16.msra.mxu1 %v8541_v1 }
 0x3f4   : > { %v3064_v18 = vsub.f32 %v8681_v9, %v3054_v36  ;;  %v2810_v5 = vsub.f32 %v8683_v32, %v2800_v59  ;;  %v8838_v9 = vpop.eup %7394 }
 0x3f5   : > { %v4057_v46 = vpop.f32.mrf.mxu2 }
 0x3f6   : > { %v3077_v2 = vmul.f32 1.442695, %v3064_v18  ;;  %v2823_v19 = vmul.f32 1.442695, %v2810_v5  ;;  %v8829_v17 = vmul.f32 0.088388346, %v4057_v46  ;;  %4172 = vmatpush.bf16.msra.mxu3 %v8563_v61  ;;  %v3805_v38 = vpop.f32.mrf.mxu0  ;;  %v8840_v58 = vpop.eup %7396 }
 0x3f7   : > { %3936 = vmatpush.bf16.msra.mxu1 %v8514_v52  ;;  %v8848_v39 = vmul.f32 0.088388346, %v3805_v38 }
 0x3f8   : > { %7398 = vpow2.f32 %v3077_v2  ;;  %4083 = vmax.xlane.f32.xlu1 %v8829_v17  ;;  %3829 = vmax.xlane.f32.xlu0 %v8832_v13 }
 0x3f9   : > { %7400 = vpow2.f32 %v2823_v19 }
 0x3fa   : > { %4173 = vmatpush.bf16.msra.mxu3 %v8543_v55 }
 0x3fb   : > { %v3056_v1 = vpop.xlane.xlu0 %3055  ;;  %v2802_v32 = vpop.xlane.xlu2 %2801 }
 0x3fc   : > { %v3065_v62 = vsub.f32 %v8691_v16, %v3056_v1  ;;  %v2811_v55 = vsub.f32 %v8689_v53, %v2802_v32 }
 0x3fd   : > { %v4059_v61 = vpop.f32.mrf.mxu2 }
 0x3fe   : > { %v8842_v63 = vpop.eup %7398  ;;  %4174 = vmatpush.bf16.msra.mxu3 %v8516_v34  ;;  %v3808_v52 = vpop.f32.mrf.mxu0  ;;  %v8846_v26 = vmul.f32 0.088388346, %v4059_v61  ;;  %v3079_v34 = vmul.f32 1.442695, %v3065_v62  ;;  %v2825_v60 = vmul.f32 1.442695, %v2811_v55 }
 0x3ff   : > { %v8850_v41 = vpop.eup %7400  ;;  %v3101_v49 = vpack.c.bf16 %v8842_v63, %v8840_v58  ;;  %v8861_v18 = vmul.f32 0.088388346, %v3808_v52 }
 0x400   : > { %4085 = vmax.xlane.f32.xlu2 %v8846_v26  ;;  %3831 = vmax.xlane.f32.xlu1 %v8848_v39  ;;  %v2847_v16 = vpack.c.bf16 %v8850_v41, %v8838_v9  ;;  %7402 = vpow2.f32 %v3079_v34 }
 0x401   : > { %3153 = vmatmul.bf16.gmra.mxu3 %v3101_v49  ;;  %7404 = vpow2.f32 %v2825_v60 }
 0x402   : > { %2915 = vmatmul.bf16.gmra.mxu1 %v2847_v16 }
 0x403   : > { %v3058_v25 = vpop.xlane.xlu1 %3057  ;;  %v2804_v36 = vpop.xlane.xlu0 %2803 }
 0x404   : > { %v3066_v59 = vsub.f32 %v8695_v8, %v3058_v25  ;;  %v2812_v53 = vsub.f32 %v8697_v10, %v2804_v36 }
 0x405   : > { %v4062_v5 = vpop.f32.mrf.mxu2 }
 0x406   : > { %v3081_v46 = vmul.f32 1.442695, %v3066_v59  ;;  %v2827_v2 = vmul.f32 1.442695, %v2812_v53  ;;  %v8863_v19 = vmul.f32 0.088388346, %v4062_v5  ;;  %v3810_v38 = vpop.f32.mrf.mxu0  ;;  %v8867_v32 = vpop.eup %7402 }
 0x407   : > { %v8870_v61 = vpop.eup %7404  ;;  %v8876_v34 = vmul.f32 0.088388346, %v3810_v38 }
 0x408   : > { %7406 = vpow2.f32 %v3081_v46  ;;  %4087 = vmax.xlane.f32.xlu2 %v8863_v19  ;;  %3833 = vmax.xlane.f32.xlu1 %v8861_v18 }
 0x409   : > { %7408 = vpow2.f32 %v2827_v2 }
 0x40b   : > { %v3560_v1 = vpop.xlane.xlu1 %3559  ;;  %v3306_v8 = vpop.xlane.xlu0 %3305 }
 0x40c   : > { %v3321_v10 = vsub.f32 %v8703_v6, %v3306_v8  ;;  %v3575_v25 = vsub.f32 %v8705_v35, %v3560_v1 }
 0x40d   : > { %v4064_v62 = vpop.f32.mrf.mxu2 }
 0x40e   : > { %v8872_v52 = vpop.eup %7406  ;;  %v3329_v55 = vmul.f32 1.442695, %v3321_v10  ;;  %v4309_v49 = vpop.f32.mrf.mxu0  ;;  %v8874_v16 = vmul.f32 0.088388346, %v4064_v62  ;;  %v3583_v59 = vmul.f32 1.442695, %v3575_v25 }
 0x40f   : > { %v8878_v60 = vpop.eup %7408  ;;  %v3102_v36 = vpack.c.bf16 %v8872_v52, %v8867_v32  ;;  %v8889_v62 = vmul.f32 0.088388346, %v4309_v49 }
 0x410   : > { %4089 = vmax.xlane.f32.xlu0 %v8874_v16  ;;  %3835 = vmax.xlane.f32.xlu2 %v8876_v34  ;;  %v2848_v6 = vpack.c.bf16 %v8878_v60, %v8870_v61  ;;  %7410 = vpow2.f32 %v3329_v55 }
 0x411   : > { %3158 = vmatmul.bf16.gmra.mxu3 %v3102_v36  ;;  %7412 = vpow2.f32 %v3583_v59 }
 0x412   : > { %2920 = vmatmul.bf16.gmra.mxu1 %v2848_v6 }
 0x413   : > { %v3562_v53 = vpop.xlane.xlu2 %3561  ;;  %v3308_v5 = vpop.xlane.xlu1 %3307 }
 0x414   : > { %v3576_v46 = vsub.f32 %v8709_v21, %v3562_v53  ;;  %v3322_v35 = vsub.f32 %v8711_v48, %v3308_v5 }
 0x415   : > { %v4563_v2 = vpop.f32.mrf.mxu2 }
 0x416   : > { %v3585_v38 = vmul.f32 1.442695, %v3576_v46  ;;  %v3331_v1 = vmul.f32 1.442695, %v3322_v35  ;;  %v4311_v8 = vpop.f32.mrf.mxu0  ;;  %v7411_v10 = vpop.eup %7410  ;;  %v8897_v6 = vmul.f32 0.088388346, %v4563_v2 }
 0x417   : > { %3345 = vadd.xlane.f32.xlu1 %v7411_v10  ;;  %v8893_v21 = vpop.eup %7412 }
 0x418   : > { %7414 = vpow2.f32 %v3585_v38  ;;  %2829 = vadd.xlane.f32.xlu0 %v8761_v29  ;;  %4337 = vmax.xlane.f32.xlu2 %v8889_v62 }
 0x419   : > { %7416 = vpow2.f32 %v3331_v1 }
 0x41b   : > { %v3564_v55 = vpop.xlane.xlu2 %3563  ;;  %v3310_v25 = vpop.xlane.xlu1 %3309 }
 0x41c   : > { %v3577_v59 = vsub.f32 %v8719_v42, %v3564_v55  ;;  %v3323_v5 = vsub.f32 %v8717_v54, %v3310_v25  ;;  %v8911_v25 = vmul.f32 0.088388346, %v4311_v8 }
 0x41d   : > { %v4565_v48 = vpop.f32.mrf.mxu2 }
 0x41e   : > { %v8895_v36 = vpop.eup %7414  ;;  %v8900_v49 = vmul.f32 0.088388346, %v4565_v48  ;;  %v4314_v35 = vpop.f32.mrf.mxu0  ;;  %v3587_v2 = vmul.f32 1.442695, %v3577_v59  ;;  %v3333_v42 = vmul.f32 1.442695, %v3323_v5 }
 0x41f   : > { %v7417_v53 = vpop.eup %7416  ;;  %v3615_v29 = vpack.c.bf16 %v8895_v36, %v8893_v21 }
 0x420   : > { %v3361_v46 = vpack.c.bf16 %v7417_v53, %v7411_v10  ;;  %4591 = vmax.xlane.f32.xlu0 %v8897_v6  ;;  %4593 = vmax.xlane.f32.xlu1 %v8900_v49  ;;  %7418 = vpow2.f32 %v3587_v2 }
 0x421   : > { %3347 = vadd.xlane.f32.xlu2 %v7417_v53  ;;  %3659 = vmatmul.bf16.vlgmr.msrb.gmra.mxu3 %v3615_v29  ;;  %7420 = vpow2.f32 %v3333_v42  ;;  %v9556_v42 = vld [vmem:[#allocation74_spill] sm:$0xff] }
 0x422   : > { %3421 = vmatmul.bf16.vlgmr.msrb.gmra.mxu1 %v3361_v46  ;;  %4683 = vmatpush.bf16.msrb.mxu3 %v8648_v31  ;;  %v9555_v46 = vld [vmem:[#allocation30_spill] sm:$0xff] }
 0x423   : > { %4445 = vmatpush.bf16.msrb.mxu1 %v8646_v22  ;;  %v3312_v38 = vpop.xlane.xlu2 %3311  ;;  %v3566_v1 = vpop.xlane.xlu0 %3565 }
 0x424   : > { %v3324_v55 = vsub.f32 %v8723_v51, %v3312_v38  ;;  %v3578_v54 = vsub.f32 %v8725_v57, %v3566_v1 }
 0x425   : > { %v4568_v10 = vpop.f32.mrf.mxu2 }
 0x426   : > { %v3335_v48 = vmul.f32 1.442695, %v3324_v55  ;;  %v3589_v53 = vmul.f32 1.442695, %v3578_v54  ;;  %4684 = vmatpush.bf16.msrb.mxu3 %v8633_v44  ;;  %v4316_v22 = vpop.f32.mrf.mxu0  ;;  %v8919_v57 = vpop.eup %7418  ;;  %v9558_v54 = vld [vmem:[#allocation53_spill] sm:$0xff] }
 0x427   : > { %4446 = vmatpush.bf16.msrb.mxu1 %v8631_v24  ;;  %v8921_v8 = vpop.eup %7420  ;;  %v8925_v24 = vmul.f32 0.088388346, %v4314_v35 }
 0x428   : > { %7422 = vpow2.f32 %v3335_v48  ;;  %2831 = vadd.xlane.f32.xlu1 %v8767_v15  ;;  %4339 = vmax.xlane.f32.xlu0 %v8911_v25  ;;  %v8927_v15 = vmul.f32 0.088388346, %v4568_v10  ;;  %v9559_v48 = vld [vmem:[#allocation54_spill] sm:$0xff] }
 0x429   : > { %7424 = vpow2.f32 %v3589_v53 }
 0x42a   : > { %4685 = vmatpush.bf16.msrb.mxu3 %v8619_v3 }
 0x42b   : > { %4447 = vmatpush.bf16.msrb.mxu1 %v8617_v28  ;;  %v3314_v31 = vpop.xlane.xlu2 %3313  ;;  %v3568_v51 = vpop.xlane.xlu0 %3567 }
 0x42c   : > { %v3325_v29 = vsub.f32 %v8731_v27, %v3314_v31  ;;  %v3579_v3 = vsub.f32 %v8733_v12, %v3568_v51  ;;  %v9557_v12 = vld [vmem:[#allocation29_spill] sm:$0xff]  ;;  %v8948_v51 = vmul.f32 0.088388346, %v4316_v22 }
 0x42d   : > { %v4570_v44 = vpop.f32.mrf.mxu2  ;;  %v9563_v22 = vld [vmem:[#allocation25_spill] sm:$0xff] }
 0x42e   : > { %v8923_v59 = vpop.eup %7422  ;;  %v8930_v5 = vmul.f32 0.088388346, %v4570_v44  ;;  %4686 = vmatpush.bf16.msrb.mxu3 %v8605_v43  ;;  %v3337_v35 = vmul.f32 1.442695, %v3325_v29  ;;  %v3591_v43 = vmul.f32 1.442695, %v3579_v3  ;;  %v4319_v55 = vpop.f32.mrf.mxu0 }
 0x42f   : > { %v8933_v28 = vpop.eup %7424  ;;  %4448 = vmatpush.bf16.msrb.mxu1 %v9555_v46  ;;  %v3362_v2 = vpack.c.bf16 %v8923_v59, %v8921_v8  ;;  %v9560_v46 = vld [vmem:[#allocation26_spill] sm:$0xff]  ;;  %v9561_v3 = vld [vmem:[#allocation73_spill] sm:$0xff] }
 0x430   : > { %4595 = vmax.xlane.f32.xlu1 %v8927_v15  ;;  %4341 = vmax.xlane.f32.xlu0 %v8925_v24  ;;  %v3616_v27 = vpack.c.bf16 %v8933_v28, %v8919_v57  ;;  %7426 = vpow2.f32 %v3337_v35 }
 0x431   : > { %4597 = vmax.xlane.f32.xlu2 %v8930_v5  ;;  %7428 = vpow2.f32 %v3591_v43 }
 0x432   : > { %3426 = vmatmul.bf16.gmra.mxu1 %v3362_v2  ;;  %3664 = vmatmul.bf16.gmra.mxu3 %v3616_v27  ;;  %v9562_v2 = vld [vmem:[#allocation22_spill] sm:$0xff] }
 0x433   : > { %4449 = vmatpush.bf16.msrb.mxu1 %v9556_v42  ;;  %4687 = vmatpush.bf16.msrb.mxu3 %v9557_v12  ;;  %v3570_v38 = vpop.xlane.xlu1 %3569  ;;  %v3316_v1 = vpop.xlane.xlu0 %3315 }
 0x434   : > { %v3580_v10 = vsub.f32 %v9558_v54, %v3570_v38  ;;  %v3326_v53 = vsub.f32 %v9559_v48, %v3316_v1  ;;  %v9565_v48 = vld [vmem:[#allocation71_spill] sm:$0xff] }
 0x435   : > { %v4573_v31 = vpop.f32.mrf.mxu2 }
 0x436   : > { %v3593_v44 = vmul.f32 1.442695, %v3580_v10  ;;  %v3339_v29 = vmul.f32 1.442695, %v3326_v53  ;;  %v8957_v35 = vpop.eup %7426  ;;  %v4321_v1 = vpop.f32.mrf.mxu0 }
 0x437   : > { %4450 = vmatpush.bf16.msrb.mxu1 %v9560_v46  ;;  %4688 = vmatpush.bf16.msrb.mxu3 %v9561_v3  ;;  %v8959_v42 = vpop.eup %7428 }
 0x438   : > { %7430 = vpow2.f32 %v3593_v44  ;;  %3601 = vadd.xlane.f32.xlu0 %v8895_v36  ;;  %4343 = vmax.xlane.f32.xlu1 %v8948_v51  ;;  %v9566_v44 = vld [vmem:[#allocation18_spill] sm:$0xff] }
 0x439   : > { %7432 = vpow2.f32 %v3339_v29  ;;  %3599 = vadd.xlane.f32.xlu2 %v8893_v21  ;;  %v8968_v21 = vmul.f32 0.088388346, %v4573_v31  ;;  %v9567_v29 = vld [vmem:[#allocation21_spill] sm:$0xff] }
 0x43b   : > { %4451 = vmatpush.bf16.msrb.mxu1 %v9562_v2  ;;  %4689 = vmatpush.bf16.msrb.mxu3 %v9563_v22  ;;  %v3572_v27 = vpop.xlane.xlu1 %3571  ;;  %v3318_v43 = vpop.xlane.xlu0 %3317  ;;  %9564 = vst [vmem:[#allocation70_spill] sm:$0xff] %v8968_v21 }
 0x43c   : > { %v3581_v36 = vsub.f32 %v8747_v37, %v3572_v27  ;;  %v3327_v53 = vsub.f32 %v9565_v48, %v3318_v43  ;;  %v8982_v48 = vmul.f32 0.088388346, %v4319_v55 }
 0x43d   : > { %v4575_v12 = vpop.f32.mrf.mxu2 }
 0x43e   : > { %v8961_v38 = vpop.eup %7430  ;;  %v8964_v54 = vmul.f32 0.088388346, %v4575_v12  ;;  %v3595_v31 = vmul.f32 1.442695, %v3581_v36  ;;  %v3341_v3 = vmul.f32 1.442695, %v3327_v53 }
 0x43f   : > { %v8966_v10 = vpop.eup %7432  ;;  %4452 = vmatpush.bf16.msrb.mxu1 %v9566_v44  ;;  %4690 = vmatpush.bf16.msrb.mxu3 %v9567_v29  ;;  %v3617_v46 = vpack.c.bf16 %v8961_v38, %v8959_v42  ;;  %v8984_v29 = vmul.f32 0.088388346, %v4321_v1 }
 0x440   : > { %4601 = vmax.xlane.f32.xlu0 %v8964_v54  ;;  %3083 = vadd.xlane.f32.xlu1 %v8775_v14  ;;  %v3363_v37 = vpack.c.bf16 %v8966_v10, %v8957_v35  ;;  %7434 = vpow2.f32 %v3595_v31 }
 0x441   : > { %4599 = vmax.xlane.f32.xlu2 %v8968_v21  ;;  %9568 = vst [vmem:[#allocation49_spill] sm:$0xff] %v8984_v29  ;;  %7436 = vpow2.f32 %v3341_v3  ;;  %v4324_v21 = vpop.f32.mrf.mxu0 }
 0x442   : > { %3431 = vmatmul.bf16.gmra.mxu1 %v3363_v37  ;;  %3669 = vmatmul.bf16.gmra.mxu3 %v3617_v46  ;;  %v9570_v37 = vld [vmem:[#allocation69_spill] sm:$0xff] }
 0x443   : > { %v3574_v2 = vpop.xlane.xlu2 %3573  ;;  %v3320_v22 = vpop.xlane.xlu1 %3319 }
 0x444   : > { %v3582_v27 = vsub.f32 %v8753_v50, %v3574_v2  ;;  %v3328_v43 = vsub.f32 %v8755_v45, %v3320_v22  ;;  %v9572_v2 = vld [vmem:[#allocation72_spill] sm:$0xff] }
 0x445   : > { %v4578_v12 = vpop.f32.mrf.mxu2 }
 0x446   : > { %v3597_v14 = vmul.f32 1.442695, %v3582_v27  ;;  %v3343_v44 = vmul.f32 1.442695, %v3328_v43  ;;  %v8989_v45 = vpop.eup %7434  ;;  %v8995_v1 = vmul.f32 0.088388346, %v4578_v12 }
 0x447   : > { %v8991_v36 = vpop.eup %7436 }
 0x448   : > { %7438 = vpow2.f32 %v3597_v14  ;;  %3349 = vadd.xlane.f32.xlu0 %v8921_v8  ;;  %4345 = vmax.xlane.f32.xlu1 %v8982_v48  ;;  %9569 = vst [vmem:[#allocation50_spill] sm:$0xff] %v8995_v1 }
 0x449   : > { %7440 = vpow2.f32 %v3343_v44  ;;  %4347 = vmax.xlane.f32.xlu2 %v8984_v29  ;;  %v4326_v12 = vpop.f32.mrf.mxu0  ;;  %v9014_v29 = vmul.f32 0.088388346, %v4324_v21 }
 0x44b   : > { %v4076_v50 = vpop.xlane.xlu2 %4075  ;;  %v3822_v55 = vpop.xlane.xlu1 %3821 }
 0x44c   : > { %v4091_v31 = vsub.f32 %v9570_v37, %v4076_v50  ;;  %v3837_v22 = vsub.f32 %v9572_v2, %v3822_v55  ;;  %v9012_v2 = vmul.f32 0.088388346, %v4326_v12 }
 0x44d   : > { %v4580_v53 = vpop.f32.mrf.mxu2 }
 0x44e   : > { %v8993_v46 = vpop.eup %7438  ;;  %v8998_v3 = vmul.f32 0.088388346, %v4580_v53  ;;  %v4099_v14 = vmul.f32 1.442695, %v4091_v31  ;;  %v3845_v44 = vmul.f32 1.442695, %v3837_v22 }
 0x44f   : > { %v9000_v8 = vpop.eup %7440  ;;  %v3618_v27 = vpack.c.bf16 %v8993_v46, %v8989_v45 }
 0x450   : > { %9571 = vst [vmem:[#allocation19_spill] sm:$0xff] %v8998_v3  ;;  %4603 = vmax.xlane.f32.xlu0 %v8995_v1  ;;  %4605 = vmax.xlane.f32.xlu1 %v8998_v3  ;;  %v3364_v43 = vpack.c.bf16 %v9000_v8, %v8991_v36  ;;  %7442 = vpow2.f32 %v4099_v14 }
 0x451   : > { %3085 = vadd.xlane.f32.xlu2 %v8778_v20  ;;  %7444 = vpow2.f32 %v3845_v44 }
 0x452   : > { %3436 = vmatmul.bf16.gmra.mxu1 %v3364_v43  ;;  %3674 = vmatmul.bf16.gmra.mxu3 %v3618_v27 }
 0x453   : > { %v4078_v50 = vpop.xlane.xlu0 %4077  ;;  %v3824_v53 = vpop.xlane.xlu2 %3823 }
 0x454   : > { %v4092_v55 = vsub.f32 %v8780_v56, %v4078_v50  ;;  %v3838_v37 = vsub.f32 %v8782_v7, %v3824_v53 }
 0x456   : > { %v4101_v3 = vmul.f32 1.442695, %v4092_v55  ;;  %v3847_v1 = vmul.f32 1.442695, %v3838_v37  ;;  %v9021_v7 = vpop.eup %7442 }
 0x457   : > { %v9018_v20 = vpop.f32.mrf.mxu1  ;;  %v9023_v22 = vpop.eup %7444 }
 0x458   : > { %7446 = vpow2.f32 %v4101_v3  ;;  %3351 = vadd.xlane.f32.xlu1 %v8923_v59  ;;  %4351 = vmax.xlane.f32.xlu0 %v9012_v2 }
 0x459   : > { %7448 = vpow2.f32 %v3847_v1  ;;  %4349 = vmax.xlane.f32.xlu2 %v9014_v29 }
 0x45b   : > { %v4080_v56 = vpop.xlane.xlu0 %4079  ;;  %v3826_v31 = vpop.xlane.xlu2 %3825 }
 0x45c   : > { %v4093_v21 = vsub.f32 %v8795_v30, %v4080_v56  ;;  %v3839_v1 = vsub.f32 %v8793_v11, %v3826_v31 }
 0x45e   : > { %v9025_v27 = vpop.eup %7446  ;;  %v4103_v12 = vmul.f32 1.442695, %v4093_v21  ;;  %v3849_v30 = vmul.f32 1.442695, %v3839_v1 }
 0x45f   : > { %v9028_v3 = vpop.eup %7448  ;;  %v4131_v59 = vpack.c.bf16 %v9025_v27, %v9021_v7  ;;  %v9038_v14 = vpop.f32.mrf.mxu1 }
 0x460   : > { %v3877_v43 = vpack.c.bf16 %v9028_v3, %v9023_v22  ;;  %3603 = vadd.xlane.f32.xlu1 %v8919_v57  ;;  %2835 = vadd.xlane.f32.xlu0 %v8801_v33  ;;  %7450 = vpow2.f32 %v4103_v12 }
 0x461   : > { %2833 = vadd.xlane.f32.xlu2 %v8798_v4  ;;  %7452 = vpow2.f32 %v3849_v30 }
 0x462   : > { %3937 = vmatmul.bf16.vlgmr.msra.gmra.mxu1 %v3877_v43  ;;  %4175 = vmatmul.bf16.vlgmr.msra.gmra.mxu3 %v4131_v59 }
 0x463   : > { %v4082_v44 = vpop.xlane.xlu1 %4081  ;;  %v3828_v53 = vpop.xlane.xlu0 %3827 }
 0x464   : > { %v4094_v50 = vsub.f32 %v8815_v40, %v4082_v44  ;;  %v9041_v11 = vpop.f32.mrf.mxu3  ;;  %v3840_v55 = vsub.f32 %v8818_v0, %v3828_v53 }
 0x466   : > { %v4105_v57 = vmul.f32 1.442695, %v4094_v50  ;;  %v3851_v33 = vmul.f32 1.442695, %v3840_v55  ;;  %v9047_v37 = vpop.eup %7450  ;;  %v7220_v55 = vld [vmem:[#allocation11 + $0x30] sm:$0xff] }
 0x467   : > { %v9051_v31 = vpop.eup %7452  ;;  %v9053_v0 = vpop.f32.mrf.mxu1 }
 0x468   : > { %7454 = vpow2.f32 %v4105_v57  ;;  %3089 = vadd.xlane.f32.xlu1 %v8811_v47  ;;  %3087 = vadd.xlane.f32.xlu0 %v8809_v23  ;;  %v7237_v57 = vld [vmem:[#allocation11 + $0xb8] sm:$0xff] }
 0x469   : > { %7456 = vpow2.f32 %v3851_v33  ;;  %3605 = vadd.xlane.f32.xlu2 %v8933_v28  ;;  %5510 = vmatpush.bf16.msra.mxu2 %v7237_v57  ;;  %v7216_v57 = vld [vmem:[#allocation11 + $0x10] sm:$0xff] }
 0x46b   : > { %v4084_v4 = vpop.xlane.xlu1 %4083  ;;  %v3830_v40 = vpop.xlane.xlu0 %3829 }
 0x46c   : > { %v9049_v56 = vpop.f32.mrf.mxu3  ;;  %v4095_v59 = vsub.f32 %v8829_v17, %v4084_v4  ;;  %v3841_v23 = vsub.f32 %v8832_v13, %v3830_v40  ;;  %v7221_v17 = vld [vmem:[#allocation11 + $0x38] sm:$0xff] }
 0x46d   : > { %5452 = vmatpush.bf16.msra.mxu0 %v7221_v17 }
 0x46e   : > { %v9055_v21 = vpop.eup %7454  ;;  %v4107_v43 = vmul.f32 1.442695, %v4095_v59  ;;  %v3853_v12 = vmul.f32 1.442695, %v3841_v23 }
 0x46f   : > { %v9058_v47 = vpop.eup %7456  ;;  %v4132_v28 = vpack.c.bf16 %v9055_v21, %v9047_v37 }
 0x470   : > { %2837 = vadd.xlane.f32.xlu1 %v8838_v9  ;;  %3355 = vadd.xlane.f32.xlu0 %v8966_v10  ;;  %v3878_v1 = vpack.c.bf16 %v9058_v47, %v9051_v31  ;;  %7458 = vpow2.f32 %v4107_v43 }
 0x471   : > { %3353 = vadd.xlane.f32.xlu2 %v8957_v35  ;;  %7460 = vpow2.f32 %v3853_v12  ;;  %v9072_v35 = vpop.f32.mrf.mxu1  ;;  %5453 = vmatpush.bf16.msra.mxu0 %v7220_v55  ;;  %v7235_v12 = vld [vmem:[#allocation11 + $0xa8] sm:$0xff] }
 0x472   : > { %3942 = vmatmul.bf16.gmra.mxu1 %v3878_v1  ;;  %4180 = vmatmul.bf16.gmra.mxu3 %v4132_v28 }
 0x473   : > { %v4086_v30 = vpop.xlane.xlu2 %4085  ;;  %v3832_v44 = vpop.xlane.xlu1 %3831 }
 0x474   : > { %v4096_v13 = vsub.f32 %v8846_v26, %v4086_v30  ;;  %v3842_v50 = vsub.f32 %v8848_v39, %v3832_v44  ;;  %v9070_v53 = vpop.f32.mrf.mxu3  ;;  %v7219_v26 = vld [vmem:[#allocation11 + $0x28] sm:$0xff]  ;;  %v7236_v39 = vld [vmem:[#allocation11 + $0xb0] sm:$0xff] }
 0x475   : > { %5454 = vmatpush.bf16.msra.mxu0 %v7219_v26  ;;  %5511 = vmatpush.bf16.msra.mxu2 %v7236_v39  ;;  %v7233_v39 = vld [vmem:[#allocation11 + $0x98] sm:$0xff] }
 0x476   : > { %v4109_v9 = vmul.f32 1.442695, %v4096_v13  ;;  %v3855_v10 = vmul.f32 1.442695, %v3842_v50  ;;  %v9077_v4 = vpop.eup %7458 }
 0x477   : > { %v9081_v23 = vpop.eup %7460 }
 0x478   : > { %7462 = vpow2.f32 %v4109_v9  ;;  %3609 = vadd.xlane.f32.xlu1 %v8961_v38  ;;  %3607 = vadd.xlane.f32.xlu0 %v8959_v42  ;;  %v7218_v38 = vld [vmem:[#allocation11 + $0x20] sm:$0xff] }
 0x479   : > { %7464 = vpow2.f32 %v3855_v10  ;;  %2839 = vadd.xlane.f32.xlu2 %v8850_v41  ;;  %5455 = vmatpush.bf16.msra.mxu0 %v7218_v38  ;;  %v7234_v9 = vld [vmem:[#allocation11 + $0xa0] sm:$0xff] }
 0x47a   : > { %5512 = vmatpush.bf16.msra.mxu2 %v7235_v12 }
 0x47b   : > { %v4088_v33 = vpop.xlane.xlu2 %4087  ;;  %v3834_v40 = vpop.xlane.xlu1 %3833 }
 0x47c   : > { %v9079_v59 = vpop.f32.mrf.mxu3  ;;  %v4097_v42 = vsub.f32 %v8863_v19, %v4088_v33  ;;  %v3843_v1 = vsub.f32 %v8861_v18, %v3834_v40  ;;  %v7217_v18 = vld [vmem:[#allocation11 + $0x18] sm:$0xff]  ;;  %v7232_v40 = vld [vmem:[#allocation11 + $0x90] sm:$0xff] }
 0x47d   : > { %5456 = vmatpush.bf16.msra.mxu0 %v7217_v18 }
 0x47e   : > { %v9083_v28 = vpop.eup %7462  ;;  %v4111_v19 = vmul.f32 1.442695, %v4097_v42  ;;  %v3857_v44 = vmul.f32 1.442695, %v3843_v1  ;;  %5513 = vmatpush.bf16.msra.mxu2 %v7234_v9  ;;  %v7230_v9 = vld [vmem:[#allocation11 + $0x80] sm:$0xff] }
 0x47f   : > { %v9086_v41 = vpop.eup %7464  ;;  %v9089_v43 = vpop.f32.mrf.mxu1  ;;  %v4133_v17 = vpack.c.bf16 %v9083_v28, %v9077_v4 }
 0x480   : > { %3357 = vadd.xlane.f32.xlu1 %v8991_v36  ;;  %3093 = vadd.xlane.f32.xlu0 %v8842_v63  ;;  %v3879_v30 = vpack.c.bf16 %v9086_v41, %v9081_v23  ;;  %7466 = vpow2.f32 %v4111_v19 }
 0x481   : > { %3091 = vadd.xlane.f32.xlu2 %v8840_v58  ;;  %7468 = vpow2.f32 %v3857_v44  ;;  %5457 = vmatpush.bf16.msra.mxu0 %v7216_v57 }
 0x482   : > { %3947 = vmatmul.bf16.gmra.mxu1 %v3879_v30  ;;  %4185 = vmatmul.bf16.gmra.mxu3 %v4133_v17  ;;  %v7231_v30 = vld [vmem:[#allocation11 + $0x88] sm:$0xff] }
 0x483   : > { %v4090_v13 = vpop.xlane.xlu0 %4089  ;;  %v3836_v50 = vpop.xlane.xlu2 %3835  ;;  %5514 = vmatpush.bf16.msra.mxu2 %v7233_v39 }
 0x484   : > { %v4098_v10 = vsub.f32 %v8874_v16, %v4090_v13  ;;  %v3844_v36 = vsub.f32 %v8876_v34, %v3836_v50  ;;  %v9100_v63 = vpop.f32.mrf.mxu3  ;;  %v7215_v16 = vld [vmem:[#allocation11 + $0x8] sm:$0xff] }
 0x485   : > { %5458 = vmatpush.bf16.msra.mxu0 %v7215_v16 }
 0x486   : > { %v4113_v55 = vmul.f32 1.442695, %v4098_v10  ;;  %v3859_v58 = vmul.f32 1.442695, %v3844_v36  ;;  %v9107_v42 = vpop.eup %7466 }
 0x487   : > { %v9102_v26 = vpop.f32.mrf.mxu1  ;;  %v9111_v1 = vpop.eup %7468  ;;  %5515 = vmatpush.bf16.msra.mxu2 %v7232_v40 }
 0x488   : > { %7470 = vpow2.f32 %v4113_v55  ;;  %2843 = vadd.xlane.f32.xlu1 %v8878_v60  ;;  %2841 = vadd.xlane.f32.xlu0 %v8870_v61  ;;  %v7214_v61 = vld [vmem:[#allocation11] sm:$0xff] }
 0x489   : > { %7472 = vpow2.f32 %v3859_v58  ;;  %3359 = vadd.xlane.f32.xlu2 %v9000_v8  ;;  %5459 = vmatpush.bf16.msra.mxu0 %v7214_v61 }
 0x48a   : > { %v3346_v34 = vpop.xlane.xlu1 %3345 }
 0x48b   : > { %v2830_v33 = vpop.xlane.xlu0 %2829  ;;  %v4338_v18 = vpop.xlane.xlu2 %4337  ;;  %5516 = vmatpush.bf16.msra.mxu2 %v7231_v30 }
 0x48c   : > { %v9109_v38 = vpop.f32.mrf.mxu3  ;;  %7474 = vrcp.f32 %v2830_v33  ;;  %v4353_v57 = vsub.f32 %v8889_v62, %v4338_v18 }
 0x48d   : > { %7476 = vrcp.f32 %v3346_v34 }
 0x48e   : > { %v9113_v60 = vpop.eup %7470 }
 0x48f   : > { %v9115_v17 = vpop.eup %7472  ;;  %v9117_v8 = vpop.f32.mrf.mxu1  ;;  %v4134_v12 = vpack.c.bf16 %v9113_v60, %v9107_v42  ;;  %5517 = vmatpush.bf16.msra.mxu2 %v7230_v9 }
 0x490   : > { %3095 = vadd.xlane.f32.xlu1 %v8867_v32  ;;  %3613 = vadd.xlane.f32.xlu0 %v8993_v46  ;;  %v3880_v19 = vpack.c.bf16 %v9115_v17, %v9111_v1 }
 0x491   : > { %3611 = vadd.xlane.f32.xlu2 %v8989_v45 }
 0x492   : > { %3952 = vmatmul.bf16.gmra.mxu1 %v3880_v19  ;;  %4190 = vmatmul.bf16.gmra.mxu3 %v4134_v12  ;;  %v7475_v44 = vpop.eup %7474  ;;  %v7245_v19 = vld [vmem:[#allocation11 + $0xf8] sm:$0xff] }
 0x493   : > { %v4592_v13 = vpop.xlane.xlu0 %4591  ;;  %v4594_v50 = vpop.xlane.xlu1 %4593  ;;  %v2934_v10 = vmul.f32 %v7475_v44, %v9018_v20  ;;  %5539 = vmatpush.bf16.msra.mxu3 %v7245_v19 }
 0x494   : > { %v4607_v32 = vsub.f32 %v8897_v6, %v4592_v13  ;;  %v4608_v46 = vsub.f32 %v8900_v49, %v4594_v50  ;;  %v9129_v36 = vpop.f32.mrf.mxu3  ;;  %v4361_v6 = vmul.f32 1.442695, %v4353_v57  ;;  %v3348_v16 = vpop.xlane.xlu2 %3347 }
 0x495   : > { %v2942_v55 = vpack.c.bf16 %v2934_v10, %v2934_v10  ;;  %v7477_v33 = vpop.eup %7476 }
 0x496   : > { %v4615_v58 = vmul.f32 1.442695, %v4607_v32  ;;  %v4617_v45 = vmul.f32 1.442695, %v4608_v46 }
 0x497   : > { %v9132_v39 = vpop.f32.mrf.mxu1  ;;  %2950 = vst [vmem:[#allocation2] sm:$0xf] %v2942_v55  ;;  %v7244_v55 = vld [vmem:[#allocation11 + $0xf0] sm:$0xff] }
 0x498   : > { %7478 = vpow2.f32 %v4615_v58  ;;  %4117 = vadd.xlane.f32.xlu1 %v9025_v27  ;;  %4115 = vadd.xlane.f32.xlu0 %v9021_v7 }
 0x499   : > { %7480 = vpow2.f32 %v4617_v45  ;;  %3097 = vadd.xlane.f32.xlu2 %v8872_v52  ;;  %5540 = vmatpush.bf16.msra.mxu3 %v7244_v55 }
 0x49b   : > { %v2832_v49 = vpop.xlane.xlu1 %2831  ;;  %v4340_v20 = vpop.xlane.xlu0 %4339 }
 0x49c   : > { %7482 = vrcp.f32 %v2832_v49  ;;  %v4354_v34 = vsub.f32 %v8911_v25, %v4340_v20  ;;  %v9138_v62 = vpop.f32.mrf.mxu3  ;;  %v7229_v49 = vld [vmem:[#allocation11 + $0x78] sm:$0xff]  ;;  %v7243_v20 = vld [vmem:[#allocation11 + $0xe8] sm:$0xff] }
 0x49d   : > { %7484 = vpow2.f32 %v4361_v6  ;;  %5481 = vmatpush.bf16.msra.mxu1 %v7229_v49  ;;  %5541 = vmatpush.bf16.msra.mxu3 %v7243_v20 }
 0x49e   : > { %v7479_v40 = vpop.eup %7478  ;;  %v4363_v61 = vmul.f32 1.442695, %v4354_v34 }
 0x49f   : > { %v9140_v12 = vpop.eup %7480  ;;  %v3422_v27 = vpop.f32.mrf.mxu1 }
 0x4a0   : > { %v4647_v7 = vpack.c.bf16 %v9140_v12, %v7479_v40  ;;  %7486 = vpow2.f32 %v4363_v61  ;;  %v3450_v52 = vmul.f32 %v7477_v33, %v3422_v27  ;;  %3865 = vadd.xlane.f32.xlu1 %v9051_v31  ;;  %3863 = vadd.xlane.f32.xlu0 %v9028_v3 }
 0x4a1   : > { %7488 = vrcp.f32 %v3348_v16  ;;  %3861 = vadd.xlane.f32.xlu2 %v9023_v22 }
 0x4a2   : > { %v7483_v25 = vpop.eup %7482  ;;  %v3458_v30 = vpack.c.bf16 %v3450_v52, %v3450_v52  ;;  %4691 = vmatmul.bf16.vlgmr.msrb.gmra.mxu3 %v4647_v7  ;;  %v7228_v52 = vld [vmem:[#allocation11 + $0x70] sm:$0xff] }
 0x4a3   : > { %v2935_v18 = vmul.f32 %v7483_v25, %v9038_v14  ;;  %v4596_v44 = vpop.xlane.xlu1 %4595  ;;  %v4342_v13 = vpop.xlane.xlu0 %4341  ;;  %v7242_v25 = vld [vmem:[#allocation11 + $0xe0] sm:$0xff]  ;;  %5482 = vmatpush.bf16.msra.mxu1 %v7228_v52  ;;  %v7239_v52 = vld [vmem:[#allocation11 + $0xc8] sm:$0xff] }
 0x4a4   : > { %3466 = vst [vmem:[#allocation2 + $0x8] sm:$0xf] %v3458_v30  ;;  %v4609_v50 = vsub.f32 %v8927_v15, %v4596_v44  ;;  %v4598_v9 = vpop.xlane.xlu2 %4597  ;;  %v9148_v10 = vpop.f32.mrf.mxu3  ;;  %v4355_v14 = vsub.f32 %v8925_v24, %v4342_v13  ;;  %5542 = vmatpush.bf16.msra.mxu3 %v7242_v25  ;;  %v7227_v13 = vld [vmem:[#allocation11 + $0x68] sm:$0xff] }
 0x4a5   : > { %v7485_v31 = vpop.eup %7484  ;;  %v2943_v3 = vpack.c.bf16 %v2935_v18, %v2935_v18  ;;  %v4610_v32 = vsub.f32 %v8930_v5, %v4598_v9 }
 0x4a6   : > { %v7487_v22 = vpop.eup %7486  ;;  %v4619_v46 = vmul.f32 1.442695, %v4609_v50  ;;  %v4365_v16 = vmul.f32 1.442695, %v4355_v14 }
 0x4a7   : > { %v7489_v58 = vpop.eup %7488  ;;  %2951 = vst [vmem:[#allocation2 + $0x20] sm:$0xf] %v2943_v3  ;;  %v4393_v45 = vpack.c.bf16 %v7487_v22, %v7485_v31  ;;  %v4621_v57 = vmul.f32 1.442695, %v4610_v32  ;;  %v3424_v6 = vpop.f32.mrf.mxu1  ;;  %5483 = vmatpush.bf16.msra.mxu1 %v7227_v13 }
 0x4a8   : > { %7490 = vpow2.f32 %v4619_v46  ;;  %v3451_v15 = vmul.f32 %v7489_v58, %v3424_v6  ;;  %4631 = vadd.xlane.f32.xlu1 %v7479_v40  ;;  %4121 = vadd.xlane.f32.xlu0 %v9055_v21  ;;  %v6603_v40 = vld [vmem:[#allocation2] sm:$0xf]  ;;  %v7241_v58 = vld [vmem:[#allocation11 + $0xd8] sm:$0xff] }
 0x4a9   : > { %4119 = vadd.xlane.f32.xlu2 %v9047_v37  ;;  %4453 = vmatmul.bf16.vlgmr.msrb.gmra.mxu1 %v4393_v45  ;;  %7492 = vpow2.f32 %v4621_v57  ;;  %v9573_v6 = vld [vmem:[#allocation70_spill] sm:$0xff] }
 0x4aa   : > { %v3459_v5 = vpack.c.bf16 %v3451_v15, %v3451_v15  ;;  %5543 = vmatpush.bf16.msra.mxu3 %v7241_v58 }
 0x4ab   : > { %v3602_v34 = vpop.xlane.xlu0 %3601  ;;  %v4344_v33 = vpop.xlane.xlu1 %4343  ;;  %v6611_v46 = vld [vmem:[#allocation2 + $0x8] sm:$0xf] }
 0x4ac   : > { %3467 = vst [vmem:[#allocation2 + $0x28] sm:$0xf] %v3459_v5  ;;  %7494 = vrcp.f32 %v3602_v34  ;;  %v4356_v24 = vsub.f32 %v8948_v51, %v4344_v33  ;;  %v3600_v61 = vpop.xlane.xlu2 %3599  ;;  %v3662_v27 = vpop.f32.mrf.mxu3  ;;  %v7226_v34 = vld [vmem:[#allocation11 + $0x60] sm:$0xff] }
 0x4ad   : > { %7496 = vrcp.f32 %v3600_v61  ;;  %5484 = vmatpush.bf16.msra.mxu1 %v7226_v34 }
 0x4ae   : > { %v7491_v21 = vpop.eup %7490  ;;  %v4367_v7 = vmul.f32 1.442695, %v4356_v24  ;;  %v7186_v37 = vld [vmem:[#allocation2 + $0x1c] sm:$0xf0]  ;;  %7498 = vpow2.f32 %v4365_v16  ;;  %v7240_v24 = vld [vmem:[#allocation11 + $0xd0] sm:$0xff] }
 0x4af   : > { %v9155_v30 = vpop.f32.mrf.mxu1  ;;  %v6604_v19 = vor.u32 %v7186_v37, %v6603_v40  ;;  %v9157_v18 = vpop.eup %7492  ;;  %5544 = vmatpush.bf16.msra.mxu3 %v7240_v24 }
 0x4b0   : > { %7500 = vpow2.f32 %v4367_v7  ;;  %4379 = vadd.xlane.f32.xlu1 %v7487_v22  ;;  %4377 = vadd.xlane.f32.xlu0 %v7485_v31  ;;  %v4648_v51 = vpack.c.bf16 %v9157_v18, %v7491_v21 }
 0x4b1   : > { %3867 = vadd.xlane.f32.xlu2 %v9058_v47  ;;  %5460 = vmatmul.bf16.vlgmr.msra.gmra.mxu0 %v6604_v19 }
 0x4b2   : > { %v7495_v44 = vpop.eup %7494  ;;  %4696 = vmatmul.bf16.gmra.mxu3 %v4648_v51 }
 0x4b3   : > { %v7497_v50 = vpop.eup %7496  ;;  %v3689_v9 = vmul.f32 %v7495_v44, %v3662_v27  ;;  %v4602_v3 = vpop.xlane.xlu0 %4601  ;;  %v7187_v55 = vld [vmem:[#allocation2 + $0x24] sm:$0xf0]  ;;  %v7225_v27 = vld [vmem:[#allocation11 + $0x58] sm:$0xff]  ;;  %5545 = vmatpush.bf16.msra.mxu3 %v7239_v52 }
 0x4b4   : > { %v3084_v32 = vpop.xlane.xlu1 %3083  ;;  %v3688_v22 = vmul.f32 %v7497_v50, %v9148_v10  ;;  %v4612_v31 = vsub.f32 %v8964_v54, %v4602_v3  ;;  %v4600_v47 = vpop.xlane.xlu2 %4599  ;;  %v6612_v45 = vor.u32 %v7187_v55, %v6611_v46  ;;  %5485 = vmatpush.bf16.msra.mxu1 %v7225_v27  ;;  %v7224_v50 = vld [vmem:[#allocation11 + $0x50] sm:$0xff]  ;;  %v7223_v55 = vld [vmem:[#allocation11 + $0x48] sm:$0xff] }
 0x4b5   : > { %7502 = vrcp.f32 %v3084_v32  ;;  %v7499_v14 = vpop.eup %7498  ;;  %v3697_v57 = vpack.c.bf16 %v3689_v9, %v3689_v9  ;;  %v4611_v49 = vsub.f32 %v9573_v6, %v4600_v47  ;;  %v9164_v15 = vpop.f32.mrf.mxu3  ;;  %v7238_v32 = vld [vmem:[#allocation11 + $0xc0] sm:$0xff] }
 0x4b6   : > { %v7501_v5 = vpop.eup %7500  ;;  %v3696_v20 = vpack.c.bf16 %v3688_v22, %v3688_v22  ;;  %v4625_v16 = vmul.f32 1.442695, %v4612_v31  ;;  %5518 = vmatmul.bf16.vlgmr.msra.gmra.mxu2 %v6612_v45  ;;  %v9575_v47 = vld [vmem:[#allocation50_spill] sm:$0xff] }
 0x4b7   : > { %3705 = vst [vmem:[#allocation2 + $0x2c] sm:$0xf] %v3697_v57  ;;  %v4623_v33 = vmul.f32 1.442695, %v4611_v49  ;;  %v9166_v10 = vpop.f32.mrf.mxu1  ;;  %v4394_v54 = vpack.c.bf16 %v7501_v5, %v7499_v14  ;;  %v9576_v57 = vld [vmem:[#allocation19_spill] sm:$0xff]  ;;  %5546 = vmatpush.bf16.msra.mxu3 %v7238_v32 }
 0x4b8   : > { %3704 = vst [vmem:[#allocation2 + $0xc] sm:$0xf] %v3696_v20  ;;  %7504 = vpow2.f32 %v4625_v16  ;;  %3871 = vadd.xlane.f32.xlu1 %v9086_v41  ;;  %4635 = vadd.xlane.f32.xlu0 %v7491_v21  ;;  %v9574_v41 = vld [vmem:[#allocation49_spill] sm:$0xff] }
 0x4b9   : > { %7506 = vpow2.f32 %v4623_v33  ;;  %4633 = vadd.xlane.f32.xlu2 %v9140_v12  ;;  %4458 = vmatmul.bf16.gmra.mxu1 %v4394_v54  ;;  %v7222_v33 = vld [vmem:[#allocation11 + $0x40] sm:$0xff] }
 0x4ba   : > { %5486 = vmatpush.bf16.msra.mxu1 %v7224_v50 }
 0x4bb   : > { %v7503_v61 = vpop.eup %7502  ;;  %v3350_v7 = vpop.xlane.xlu0 %3349 }
 0x4bc   : > { %v3172_v40 = vmul.f32 %v7503_v61, %v9041_v11  ;;  %v4346_v37 = vpop.xlane.xlu1 %4345  ;;  %7508 = vrcp.f32 %v3350_v7  ;;  %v4348_v19 = vpop.xlane.xlu2 %4347 }
 0x4bd   : > { %v4357_v25 = vsub.f32 %v8982_v48, %v4346_v37  ;;  %v4358_v21 = vsub.f32 %v9574_v41, %v4348_v19  ;;  %v9173_v44 = vpop.f32.mrf.mxu3 }
 0x4be   : > { %v3180_v51 = vpack.c.bf16 %v3172_v40, %v3172_v40  ;;  %v7505_v12 = vpop.eup %7504  ;;  %5487 = vmatpush.bf16.msra.mxu1 %v7223_v55 }
 0x4bf   : > { %v4369_v13 = vmul.f32 1.442695, %v4357_v25  ;;  %v7507_v9 = vpop.eup %7506  ;;  %v4371_v11 = vmul.f32 1.442695, %v4358_v21  ;;  %v9175_v3 = vpop.f32.mrf.mxu1 }
 0x4c0   : > { %3188 = vst [vmem:[#allocation2 + $0x4] sm:$0xf] %v3180_v51  ;;  %4383 = vadd.xlane.f32.xlu0 %v7501_v5  ;;  %4637 = vadd.xlane.f32.xlu1 %v9157_v18  ;;  %v4649_v48 = vpack.c.bf16 %v7505_v12, %v7507_v9 }
 0x4c1   : > { %7510 = vpow2.f32 %v4369_v13  ;;  %4381 = vadd.xlane.f32.xlu2 %v7499_v14 }
 0x4c2   : > { %7512 = vpow2.f32 %v4371_v11  ;;  %v7509_v46 = vpop.eup %7508  ;;  %4701 = vmatmul.bf16.gmra.mxu3 %v4649_v48  ;;  %5488 = vmatpush.bf16.msra.mxu1 %v7222_v33 }
 0x4c3   : > { %v3452_v58 = vmul.f32 %v7509_v46, %v9155_v30  ;;  %v4604_v22 = vpop.xlane.xlu0 %4603 }
 0x4c4   : > { %v4606_v31 = vpop.xlane.xlu1 %4605  ;;  %v4613_v45 = vsub.f32 %v9575_v47, %v4604_v22  ;;  %v3086_v49 = vpop.xlane.xlu2 %3085 }
 0x4c5   : > { %v4614_v6 = vsub.f32 %v9576_v57, %v4606_v31  ;;  %v3460_v5 = vpack.c.bf16 %v3452_v58, %v3452_v58  ;;  %7514 = vrcp.f32 %v3086_v49  ;;  %v9181_v18 = vpop.f32.mrf.mxu3 }
 0x4c6   : > { %v4627_v14 = vmul.f32 1.442695, %v4613_v45 }
 0x4c7   : > { %v7511_v20 = vpop.eup %7510  ;;  %v4629_v16 = vmul.f32 1.442695, %v4614_v6  ;;  %3468 = vst [vmem:[#allocation2 + $0x48] sm:$0xf] %v3460_v5  ;;  %v9183_v30 = vpop.f32.mrf.mxu1 }
 0x4c8   : > { %v7513_v34 = vpop.eup %7512  ;;  %7516 = vpow2.f32 %v4627_v14  ;;  %3869 = vadd.xlane.f32.xlu0 %v9081_v23  ;;  %4123 = vadd.xlane.f32.xlu1 %v9077_v4 }
 0x4c9   : > { %v4395_v54 = vpack.c.bf16 %v7513_v34, %v7511_v20  ;;  %7518 = vpow2.f32 %v4629_v16  ;;  %4639 = vadd.xlane.f32.xlu2 %v7507_v9 }
 0x4cb   : > { %4463 = vmatmul.bf16.gmra.mxu1 %v4395_v54  ;;  %v7515_v24 = vpop.eup %7514  ;;  %v4352_v27 = vpop.xlane.xlu0 %4351 }
 0x4cc   : > { %v3352_v61 = vpop.xlane.xlu1 %3351  ;;  %v3173_v40 = vmul.f32 %v7515_v24, %v9049_v56  ;;  %v4360_v7 = vsub.f32 %v9012_v2, %v4352_v27  ;;  %v4350_v37 = vpop.xlane.xlu2 %4349 }
 0x4cd   : > { %7520 = vrcp.f32 %v3352_v61  ;;  %v4359_v52 = vsub.f32 %v9014_v29, %v4350_v37  ;;  %v9190_v25 = vpop.f32.mrf.mxu3 }
 0x4ce   : > { %v7517_v23 = vpop.eup %7516  ;;  %v3181_v4 = vpack.c.bf16 %v3173_v40, %v3173_v40  ;;  %v4375_v19 = vmul.f32 1.442695, %v4360_v7  ;;  %v6643_v14 = vld [vmem:[#allocation2 + $0x48] sm:$0xf] }
 0x4cf   : > { %v9192_v51 = vpop.eup %7518  ;;  %v4373_v41 = vmul.f32 1.442695, %v4359_v52  ;;  %v9194_v21 = vpop.f32.mrf.mxu1 }
 0x4d0   : > { %3189 = vst [vmem:[#allocation2 + $0x24] sm:$0xf] %v3181_v4  ;;  %7522 = vpow2.f32 %v4375_v19  ;;  %4641 = vadd.xlane.f32.xlu0 %v7505_v12  ;;  %4385 = vadd.xlane.f32.xlu1 %v7511_v20  ;;  %v4650_v56 = vpack.c.bf16 %v9192_v51, %v7517_v23  ;;  %v6613_v20 = vld [vmem:[#allocation2 + $0x28] sm:$0xf0] }
 0x4d1   : > { %7524 = vpow2.f32 %v4373_v41  ;;  %4387 = vadd.xlane.f32.xlu2 %v7513_v34  ;;  %v7183_v34 = vld [vmem:[#allocation2 + $0xc] sm:$0xf] }
 0x4d2   : > { %4706 = vmatmul.bf16.gmra.mxu3 %v4650_v56 }
 0x4d3   : > { %v7521_v2 = vpop.eup %7520  ;;  %v2836_v50 = vpop.xlane.xlu0 %2835 }
 0x4d4   : > { %v3453_v29 = vmul.f32 %v7521_v2, %v9166_v10  ;;  %v3604_v13 = vpop.xlane.xlu1 %3603  ;;  %v2834_v9 = vpop.xlane.xlu2 %2833 }
 0x4d5   : > { %7526 = vrcp.f32 %v3604_v13  ;;  %v9198_v48 = vpop.f32.mrf.mxu3 }
 0x4d6   : > { %v3461_v11 = vpack.c.bf16 %v3453_v29, %v3453_v29  ;;  %7528 = vrcp.f32 %v2836_v50  ;;  %v7523_v32 = vpop.eup %7522  ;;  %v7182_v29 = vld [vmem:[#allocation2 + $0x4] sm:$0xf]  ;;  %v7269_v50 = vld [vmem:[#allocation11 + $0x1b8] sm:$0xff] }
 0x4d7   : > { %7530 = vrcp.f32 %v2834_v9  ;;  %v7525_v12 = vpop.eup %7524  ;;  %v9200_v46 = vpop.f32.mrf.mxu1  ;;  %v7253_v9 = vld [vmem:[#allocation11 + $0x138] sm:$0xff]  ;;  %5626 = vmatpush.bf16.msrb.mxu2 %v7269_v50 }
 0x4d8   : > { %3469 = vst [vmem:[#allocation2 + $0x68] sm:$0xf] %v3461_v11  ;;  %3875 = vadd.xlane.f32.xlu0 %v9115_v17  ;;  %4643 = vadd.xlane.f32.xlu1 %v7517_v23  ;;  %v4396_v55 = vpack.c.bf16 %v7523_v32, %v7525_v12  ;;  %v7277_v11 = vld [vmem:[#allocation11 + $0x1f8] sm:$0xff] }
 0x4d9   : > { %4125 = vadd.xlane.f32.xlu2 %v9083_v28  ;;  %5568 = vmatpush.bf16.msrb.mxu0 %v7253_v9  ;;  %v7249_v50 = vld [vmem:[#allocation11 + $0x118] sm:$0xff] }
 0x4da   : > { %5655 = vmatpush.bf16.msrb.mxu3 %v7277_v11 }
 0x4db   : > { %v7527_v10 = vpop.eup %7526  ;;  %4468 = vmatmul.bf16.gmra.mxu1 %v4396_v55  ;;  %v3088_v47 = vpop.xlane.xlu0 %3087 }
 0x4dc   : > { %v7529_v58 = vpop.eup %7528  ;;  %v3690_v22 = vmul.f32 %v7527_v10, %v9164_v15  ;;  %v3090_v31 = vpop.xlane.xlu1 %3089 }
 0x4dd   : > { %v7531_v45 = vpop.eup %7530  ;;  %v2937_v57 = vmul.f32 %v7529_v58, %v9072_v35  ;;  %7532 = vrcp.f32 %v3090_v31  ;;  %v3606_v6 = vpop.xlane.xlu2 %3605 }
 0x4de   : > { %v3698_v49 = vpack.c.bf16 %v3690_v22, %v3690_v22  ;;  %v2936_v5 = vmul.f32 %v7531_v45, %v9053_v0  ;;  %7534 = vrcp.f32 %v3088_v47  ;;  %v9207_v17 = vpop.f32.mrf.mxu3  ;;  %v6616_v0 = vor.u32 %v7183_v34, %v6613_v20 }
 0x4df   : > { %v2945_v28 = vpack.c.bf16 %v2937_v57, %v2937_v57  ;;  %7536 = vrcp.f32 %v3606_v6  ;;  %v7195_v16 = vld [vmem:[#allocation2 + $0x64] sm:$0xf0]  ;;  %v9209_v33 = vpop.f32.mrf.mxu1 }
 0x4e0   : > { %3706 = vst [vmem:[#allocation2 + $0x4c] sm:$0xf] %v3698_v49  ;;  %v2944_v15 = vpack.c.bf16 %v2936_v5, %v2936_v5  ;;  %v6644_v54 = vor.u32 %v7195_v16, %v6643_v14  ;;  %4391 = vadd.xlane.f32.xlu1 %v7523_v32  ;;  %4389 = vadd.xlane.f32.xlu0 %v7525_v12  ;;  %v7261_v5 = vld [vmem:[#allocation11 + $0x178] sm:$0xff]  ;;  %v7276_v14 = vld [vmem:[#allocation11 + $0x1f0] sm:$0xff]  ;;  %v7251_v16 = vld [vmem:[#allocation11 + $0x128] sm:$0xff] }
 0x4e1   : > { %2953 = vst [vmem:[#allocation2 + $0x60] sm:$0xf] %v2945_v28  ;;  %3873 = vadd.xlane.f32.xlu2 %v9111_v1  ;;  %v6605_v1 = vld [vmem:[#allocation2 + $0x20] sm:$0xf0]  ;;  %v7268_v28 = vld [vmem:[#allocation11 + $0x1b0] sm:$0xff]  ;;  %5597 = vmatpush.bf16.msrb.mxu1 %v7261_v5 }
 0x4e2   : > { %2952 = vst [vmem:[#allocation2 + $0x40] sm:$0xf] %v2944_v15  ;;  %5523 = vmatmul.bf16.gmra.mxu2 %v6644_v54  ;;  %5547 = vmatmul.bf16.vlgmr.msra.gmra.mxu3 %v6616_v0  ;;  %v6608_v13 = vor.u32 %v7182_v29, %v6605_v1  ;;  %v7267_v29 = vld [vmem:[#allocation11 + $0x1a8] sm:$0xff] }
 0x4e3   : > { %v7533_v35 = vpop.eup %7532  ;;  %v3356_v40 = vpop.xlane.xlu0 %3355  ;;  %5627 = vmatpush.bf16.msrb.mxu2 %v7268_v28  ;;  %5656 = vmatpush.bf16.msrb.mxu3 %v7276_v14  ;;  %v7274_v28 = vld [vmem:[#allocation11 + $0x1e0] sm:$0xff] }
 0x4e4   : > { %v7535_v24 = vpop.eup %7534  ;;  %v3175_v61 = vmul.f32 %v7533_v35, %v9079_v59  ;;  %v2838_v27 = vpop.xlane.xlu1 %2837 }
 0x4e5   : > { %v7537_v7 = vpop.eup %7536  ;;  %v3174_v37 = vmul.f32 %v7535_v24, %v9070_v53  ;;  %7538 = vrcp.f32 %v2838_v27  ;;  %v3354_v52 = vpop.xlane.xlu2 %3353 }
 0x4e6   : > { %v3183_v23 = vpack.c.bf16 %v3175_v61, %v3175_v61  ;;  %v3691_v4 = vmul.f32 %v7537_v7, %v9173_v44  ;;  %7540 = vrcp.f32 %v3356_v40  ;;  %v9215_v19 = vpop.f32.mrf.mxu3 }
 0x4e7   : > { %v3182_v41 = vpack.c.bf16 %v3174_v37, %v3174_v37  ;;  %7542 = vrcp.f32 %v3354_v52  ;;  %v9217_v59 = vpop.f32.mrf.mxu1  ;;  %v7191_v49 = vld [vmem:[#allocation2 + $0x4c] sm:$0xf]  ;;  %5628 = vmatpush.bf16.msrb.mxu2 %v7267_v29 }
 0x4e8   : > { %3191 = vst [vmem:[#allocation2 + $0x64] sm:$0xf] %v3183_v23  ;;  %v3699_v56 = vpack.c.bf16 %v3691_v4, %v3691_v4  ;;  %v7194_v2 = vld [vmem:[#allocation2 + $0x5c] sm:$0xf0]  ;;  %4129 = vadd.xlane.f32.xlu1 %v9113_v60  ;;  %4127 = vadd.xlane.f32.xlu0 %v9107_v42  ;;  %v7260_v23 = vld [vmem:[#allocation11 + $0x170] sm:$0xff] }
 0x4e9   : > { %3190 = vst [vmem:[#allocation2 + $0x44] sm:$0xf] %v3182_v41  ;;  %v6635_v53 = vld [vmem:[#allocation2 + $0x40] sm:$0xf]  ;;  %4645 = vadd.xlane.f32.xlu2 %v9192_v51  ;;  %5598 = vmatpush.bf16.msrb.mxu1 %v7260_v23 }
 0x4ea   : > { %3707 = vst [vmem:[#allocation2 + $0x6c] sm:$0xf] %v3699_v56  ;;  %v6636_v44 = vor.u32 %v7194_v2, %v6635_v53  ;;  %v7250_v4 = vld [vmem:[#allocation11 + $0x120] sm:$0xff]  ;;  %v7275_v53 = vld [vmem:[#allocation11 + $0x1e8] sm:$0xff] }
 0x4eb   : > { %v7539_v32 = vpop.eup %7538  ;;  %5489 = vmatmul.bf16.vlgmr.msra.gmra.mxu1 %v6608_v13  ;;  %v3608_v58 = vpop.xlane.xlu0 %3607  ;;  %5657 = vmatpush.bf16.msrb.mxu3 %v7275_v53 }
 0x4ec   : > { %v7541_v12 = vpop.eup %7540  ;;  %v2938_v55 = vmul.f32 %v7539_v32, %v9089_v43  ;;  %5465 = vmatmul.bf16.gmra.mxu0 %v6636_v44  ;;  %v3610_v10 = vpop.xlane.xlu1 %3609  ;;  %v7252_v43 = vld [vmem:[#allocation11 + $0x130] sm:$0xff]  ;;  %v7259_v44 = vld [vmem:[#allocation11 + $0x168] sm:$0xff] }
 0x4ed   : > { %v7543_v60 = vpop.eup %7542  ;;  %v3455_v42 = vmul.f32 %v7541_v12, %v9183_v30  ;;  %7544 = vrcp.f32 %v3610_v10  ;;  %v2840_v22 = vpop.xlane.xlu2 %2839  ;;  %5569 = vmatpush.bf16.msrb.mxu0 %v7252_v43  ;;  %5599 = vmatpush.bf16.msrb.mxu1 %v7259_v44 }
 0x4ee   : > { %v2946_v51 = vpack.c.bf16 %v2938_v55, %v2938_v55  ;;  %v3454_v31 = vmul.f32 %v7543_v60, %v9175_v3  ;;  %7546 = vrcp.f32 %v3608_v58  ;;  %v9225_v47 = vpop.f32.mrf.mxu3 }
 0x4ef   : > { %v3463_v45 = vpack.c.bf16 %v3455_v42, %v3455_v42  ;;  %7548 = vrcp.f32 %v2840_v22  ;;  %v9227_v6 = vpop.f32.mrf.mxu1  ;;  %v6637_v52 = vld [vmem:[#allocation2 + $0x60] sm:$0xf0]  ;;  %5658 = vmatpush.bf16.msrb.mxu3 %v7274_v28 }
 0x4f0   : > { %2954 = vst [vmem:[#allocation2 + $0x80] sm:$0xf] %v2946_v51  ;;  %v3462_v57 = vpack.c.bf16 %v3454_v31, %v3454_v31  ;;  %v7190_v37 = vld [vmem:[#allocation2 + $0x44] sm:$0xf] }
 0x4f1   : > { %3471 = vst [vmem:[#allocation2 + $0xa8] sm:$0xf] %v3463_v45  ;;  %v6645_v30 = vld [vmem:[#allocation2 + $0x68] sm:$0xf0]  ;;  %5570 = vmatpush.bf16.msrb.mxu0 %v7251_v16  ;;  %v6640_v56 = vor.u32 %v7190_v37, %v6637_v52  ;;  %v7258_v31 = vld [vmem:[#allocation11 + $0x160] sm:$0xff]  ;;  %v7248_v45 = vld [vmem:[#allocation11 + $0x110] sm:$0xff] }
 0x4f2   : > { %3470 = vst [vmem:[#allocation2 + $0x88] sm:$0xf] %v3462_v57  ;;  %v6648_v20 = vor.u32 %v7191_v49, %v6645_v30  ;;  %5600 = vmatpush.bf16.msrb.mxu1 %v7258_v31  ;;  %v7257_v16 = vld [vmem:[#allocation11 + $0x158] sm:$0xff]  ;;  %v7246_v52 = vld [vmem:[#allocation11 + $0x100] sm:$0xff] }
 0x4f3   : > { %v7545_v3 = vpop.eup %7544  ;;  %v3094_v0 = vpop.xlane.xlu0 %3093 }
 0x4f4   : > { %v7547_v34 = vpop.eup %7546  ;;  %v3693_v15 = vmul.f32 %v7545_v3, %v9190_v25  ;;  %5552 = vmatmul.bf16.gmra.mxu3 %v6648_v20  ;;  %v3358_v54 = vpop.xlane.xlu1 %3357  ;;  %v7266_v20 = vld [vmem:[#allocation11 + $0x1a0] sm:$0xff]  ;;  %v7247_v3 = vld [vmem:[#allocation11 + $0x108] sm:$0xff] }
 0x4f5   : > { %v7549_v35 = vpop.eup %7548  ;;  %v3692_v24 = vmul.f32 %v7547_v34, %v9181_v18  ;;  %7550 = vrcp.f32 %v3358_v54  ;;  %v3092_v61 = vpop.xlane.xlu2 %3091  ;;  %5571 = vmatpush.bf16.msrb.mxu0 %v7250_v4  ;;  %5629 = vmatpush.bf16.msrb.mxu2 %v7266_v20 }
 0x4f6   : > { %v3701_v27 = vpack.c.bf16 %v3693_v15, %v3693_v15  ;;  %v2939_v40 = vmul.f32 %v7549_v35, %v9102_v26  ;;  %7552 = vrcp.f32 %v3094_v0  ;;  %v9232_v7 = vpop.f32.mrf.mxu3  ;;  %5601 = vmatpush.bf16.msrb.mxu1 %v7257_v16 }
 0x4f7   : > { %v3700_v25 = vpack.c.bf16 %v3692_v24, %v3692_v24  ;;  %7554 = vrcp.f32 %v3092_v61  ;;  %v9234_v41 = vpop.f32.mrf.mxu1  ;;  %v6667_v49 = vld [vmem:[#allocation2 + $0x80] sm:$0xf] }
 0x4f8   : > { %3709 = vst [vmem:[#allocation2 + $0xac] sm:$0xf] %v3701_v27  ;;  %v2947_v1 = vpack.c.bf16 %v2939_v40, %v2939_v40  ;;  %v7203_v18 = vld [vmem:[#allocation2 + $0xa4] sm:$0xf0] }
 0x4f9   : > { %3708 = vst [vmem:[#allocation2 + $0x8c] sm:$0xf] %v3700_v25  ;;  %v6675_v2 = vld [vmem:[#allocation2 + $0x88] sm:$0xf]  ;;  %5572 = vmatpush.bf16.msrb.mxu0 %v7249_v50  ;;  %v7256_v25 = vld [vmem:[#allocation11 + $0x150] sm:$0xff] }
 0x4fa   : > { %2955 = vst [vmem:[#allocation2 + $0xa0] sm:$0xf] %v2947_v1  ;;  %v6676_v26 = vor.u32 %v7203_v18, %v6675_v2  ;;  %v7265_v18 = vld [vmem:[#allocation11 + $0x198] sm:$0xff]  ;;  %5602 = vmatpush.bf16.msrb.mxu1 %v7256_v25 }
 0x4fb   : > { %v7551_v13 = vpop.eup %7550  ;;  %5494 = vmatmul.bf16.gmra.mxu1 %v6640_v56  ;;  %v2842_v12 = vpop.xlane.xlu0 %2841  ;;  %v7273_v56 = vld [vmem:[#allocation11 + $0x1d8] sm:$0xff]  ;;  %5630 = vmatpush.bf16.msrb.mxu2 %v7265_v18 }
 0x4fc   : > { %v7553_v9 = vpop.eup %7552  ;;  %v3456_v11 = vmul.f32 %v7551_v13, %v9194_v21  ;;  %5528 = vmatmul.bf16.gmra.mxu2 %v6676_v26  ;;  %v2844_v32 = vpop.xlane.xlu1 %2843  ;;  %v7255_v26 = vld [vmem:[#allocation11 + $0x148] sm:$0xff]  ;;  %5659 = vmatpush.bf16.msrb.mxu3 %v7273_v56 }
 0x4fd   : > { %v7555_v55 = vpop.eup %7554  ;;  %v3177_v10 = vmul.f32 %v7553_v9, %v9109_v38  ;;  %7556 = vrcp.f32 %v2844_v32  ;;  %v3360_v58 = vpop.xlane.xlu2 %3359  ;;  %5573 = vmatpush.bf16.msrb.mxu0 %v7248_v45  ;;  %v7264_v45 = vld [vmem:[#allocation11 + $0x190] sm:$0xff] }
 0x4fe   : > { %v3464_v60 = vpack.c.bf16 %v3456_v11, %v3456_v11  ;;  %v3176_v42 = vmul.f32 %v7555_v55, %v9100_v63  ;;  %7558 = vrcp.f32 %v2842_v12  ;;  %v9239_v22 = vpop.f32.mrf.mxu3  ;;  %5603 = vmatpush.bf16.msrb.mxu1 %v7255_v26 }
 0x4ff   : > { %v3185_v51 = vpack.c.bf16 %v3177_v10, %v3177_v10  ;;  %7560 = vrcp.f32 %v3360_v58  ;;  %v6677_v21 = vld [vmem:[#allocation2 + $0xa8] sm:$0xf0]  ;;  %v9241_v38 = vpop.f32.mrf.mxu1  ;;  %v7254_v58 = vld [vmem:[#allocation11 + $0x140] sm:$0xff]  ;;  %5631 = vmatpush.bf16.msrb.mxu2 %v7264_v45 }
 0x500   : > { %3472 = vst [vmem:[#allocation2 + $0xc8] sm:$0xf] %v3464_v60  ;;  %v3184_v43 = vpack.c.bf16 %v3176_v42, %v3176_v42  ;;  %v7199_v57 = vld [vmem:[#allocation2 + $0x8c] sm:$0xf] }
 0x501   : > { %3193 = vst [vmem:[#allocation2 + $0xa4] sm:$0xf] %v3185_v51  ;;  %v7202_v30 = vld [vmem:[#allocation2 + $0x9c] sm:$0xf0]  ;;  %v6680_v5 = vor.u32 %v7199_v57, %v6677_v21  ;;  %5574 = vmatpush.bf16.msrb.mxu0 %v7247_v3 }
 0x502   : > { %3192 = vst [vmem:[#allocation2 + $0x84] sm:$0xf] %v3184_v43  ;;  %v6668_v63 = vor.u32 %v7202_v30, %v6667_v49  ;;  %v7272_v43 = vld [vmem:[#allocation11 + $0x1d0] sm:$0xff]  ;;  %5604 = vmatpush.bf16.msrb.mxu1 %v7254_v58 }
 0x503   : > { %v7557_v14 = vpop.eup %7556  ;;  %v3614_v0 = vpop.xlane.xlu0 %3613  ;;  %5660 = vmatpush.bf16.msrb.mxu3 %v7272_v43 }
 0x504   : > { %v7559_v34 = vpop.eup %7558  ;;  %v2941_v15 = vmul.f32 %v7557_v14, %v9132_v39  ;;  %5470 = vmatmul.bf16.gmra.mxu0 %v6668_v63  ;;  %5557 = vmatmul.bf16.gmra.mxu3 %v6680_v5  ;;  %v3096_v54 = vpop.xlane.xlu1 %3095 }
 0x505   : > { %v7561_v35 = vpop.eup %7560  ;;  %v2940_v24 = vmul.f32 %v7559_v34, %v9117_v8  ;;  %7562 = vrcp.f32 %v3096_v54  ;;  %v3612_v61 = vpop.xlane.xlu2 %3611  ;;  %5575 = vmatpush.bf16.msrb.mxu0 %v7246_v52 }
 0x506   : > { %v2949_v27 = vpack.c.bf16 %v2941_v15, %v2941_v15  ;;  %v3457_v40 = vmul.f32 %v7561_v35, %v9200_v46  ;;  %7564 = vrcp.f32 %v3614_v0  ;;  %v9246_v37 = vpop.f32.mrf.mxu3  ;;  %v7263_v15 = vld [vmem:[#allocation11 + $0x188] sm:$0xff] }
 0x507   : > { %v2948_v39 = vpack.c.bf16 %v2940_v24, %v2940_v24  ;;  %7566 = vrcp.f32 %v3612_v61  ;;  %v9248_v2 = vpop.f32.mrf.mxu1  ;;  %5632 = vmatpush.bf16.msrb.mxu2 %v7263_v15  ;;  %v7271_v24 = vld [vmem:[#allocation11 + $0x1c8] sm:$0xff] }
 0x508   : > { %2957 = vst [vmem:[#allocation2 + $0xe0] sm:$0xf] %v2949_v27  ;;  %v3465_v23 = vpack.c.bf16 %v3457_v40, %v3457_v40  ;;  %v6669_v4 = vld [vmem:[#allocation2 + $0xa0] sm:$0xf0]  ;;  %5661 = vmatpush.bf16.msrb.mxu3 %v7271_v24 }
 0x509   : > { %2956 = vst [vmem:[#allocation2 + $0xc0] sm:$0xf] %v2948_v39  ;;  %v7198_v8 = vld [vmem:[#allocation2 + $0x84] sm:$0xf] }
 0x50a   : > { %3473 = vst [vmem:[#allocation2 + $0xe8] sm:$0xf] %v3465_v23  ;;  %v6672_v1 = vor.u32 %v7198_v8, %v6669_v4  ;;  %v7262_v27 = vld [vmem:[#allocation11 + $0x180] sm:$0xff] }
 0x50b   : > { %v7563_v46 = vpop.eup %7562  ;;  %v4116_v44 = vpop.xlane.xlu0 %4115  ;;  %5633 = vmatpush.bf16.msrb.mxu2 %v7262_v27 }
 0x50c   : > { %v7565_v29 = vpop.eup %7564  ;;  %v3178_v53 = vmul.f32 %v7563_v46, %v9129_v36  ;;  %5499 = vmatmul.bf16.gmra.mxu1 %v6672_v1  ;;  %v4118_v13 = vpop.xlane.xlu1 %4117 }
 0x50d   : > { %v7567_v50 = vpop.eup %7566  ;;  %v3695_v9 = vmul.f32 %v7565_v29, %v9207_v17  ;;  %7568 = vrcp.f32 %v4118_v13  ;;  %v3098_v11 = vpop.xlane.xlu2 %3097  ;;  %v6707_v17 = vld [vmem:[#allocation2 + $0xc8] sm:$0xf] }
 0x50e   : > { %v3186_v32 = vpack.c.bf16 %v3178_v53, %v3178_v53  ;;  %v3694_v12 = vmul.f32 %v7567_v50, %v9198_v48  ;;  %7570 = vrcp.f32 %v4116_v44  ;;  %v9253_v55 = vpop.f32.mrf.mxu3 }
 0x50f   : > { %v3703_v10 = vpack.c.bf16 %v3695_v9, %v3695_v9  ;;  %7572 = vrcp.f32 %v3098_v11  ;;  %v7210_v36 = vld [vmem:[#allocation2 + $0xdc] sm:$0xf0]  ;;  %v9257_v28 = vpop.f32.mrf.mxu1 }
 0x510   : > { %3194 = vst [vmem:[#allocation2 + $0xc4] sm:$0xf] %v3186_v32  ;;  %v3702_v60 = vpack.c.bf16 %v3694_v12, %v3694_v12  ;;  %v6699_v42 = vld [vmem:[#allocation2 + $0xc0] sm:$0xf] }
 0x511   : > { %3711 = vst [vmem:[#allocation2 + $0xec] sm:$0xf] %v3703_v10  ;;  %v6700_v51 = vor.u32 %v7210_v36, %v6699_v42  ;;  %v7211_v21 = vld [vmem:[#allocation2 + $0xe4] sm:$0xf0] }
 0x512   : > { %3710 = vst [vmem:[#allocation2 + $0xcc] sm:$0xf] %v3702_v60  ;;  %v6708_v31 = vor.u32 %v7211_v21, %v6707_v17 }
 0x513   : > { %v7569_v48 = vpop.eup %7568  ;;  %v3864_v5 = vpop.xlane.xlu0 %3863 }
 0x514   : > { %v7571_v57 = vpop.eup %7570  ;;  %v4205_v49 = vmul.f32 %v7569_v48, %v9225_v47  ;;  %5475 = vmatmul.bf16.gmra.mxu0 %v6700_v51  ;;  %5533 = vmatmul.bf16.gmra.mxu2 %v6708_v31  ;;  %v3866_v30 = vpop.xlane.xlu1 %3865 }
 0x515   : > { %v7573_v63 = vpop.eup %7572  ;;  %v4204_v20 = vmul.f32 %v7571_v57, %v9215_v19  ;;  %7574 = vrcp.f32 %v3866_v30  ;;  %v3862_v14 = vpop.xlane.xlu2 %3861 }
 0x516   : > { %v4213_v3 = vpack.c.bf16 %v4205_v49, %v4205_v49  ;;  %v3179_v16 = vmul.f32 %v7573_v63, %v9138_v62  ;;  %7576 = vrcp.f32 %v3864_v5  ;;  %v9260_v34 = vpop.f32.mrf.mxu3 }
 0x517   : > { %v4212_v47 = vpack.c.bf16 %v4204_v20, %v4204_v20  ;;  %7578 = vrcp.f32 %v3862_v14  ;;  %v9267_v46 = vpop.f32.mrf.mxu1  ;;  %v7206_v29 = vld [vmem:[#allocation2 + $0xc4] sm:$0xf] }
 0x518   : > { %4221 = vst [vmem:[#allocation2 + $0x34] sm:$0xf] %v4213_v3  ;;  %v3187_v54 = vpack.c.bf16 %v3179_v16, %v3179_v16  ;;  %v6709_v0 = vld [vmem:[#allocation2 + $0xe8] sm:$0xf0] }
 0x519   : > { %4220 = vst [vmem:[#allocation2 + $0x14] sm:$0xf] %v4212_v47  ;;  %v7207_v19 = vld [vmem:[#allocation2 + $0xcc] sm:$0xf] }
 0x51a   : > { %3195 = vst [vmem:[#allocation2 + $0xe4] sm:$0xf] %v3187_v54  ;;  %v6712_v35 = vor.u32 %v7207_v19, %v6709_v0 }
 0x51b   : > { %v7575_v61 = vpop.eup %7574  ;;  %v4122_v52 = vpop.xlane.xlu0 %4121 }
 0x51c   : > { %v7577_v40 = vpop.eup %7576  ;;  %v3968_v62 = vmul.f32 %v7575_v61, %v9227_v6  ;;  %5562 = vmatmul.bf16.gmra.mxu3 %v6712_v35  ;;  %v4632_v39 = vpop.xlane.xlu1 %4631  ;;  %7580 = vrcp.f32 %v4122_v52  ;;  %v7270_v6 = vld [vmem:[#allocation11 + $0x1c0] sm:$0xff] }
 0x51d   : > { %v7579_v25 = vpop.eup %7578  ;;  %v3967_v23 = vmul.f32 %v7577_v40, %v9217_v59  ;;  %v4120_v4 = vpop.xlane.xlu2 %4119  ;;  %5662 = vmatpush.bf16.msrb.mxu3 %v7270_v6 }
 0x51e   : > { %v3976_v8 = vpack.c.bf16 %v3968_v62, %v3968_v62  ;;  %v3966_v1 = vmul.f32 %v7579_v25, %v9209_v33  ;;  %v9265_v18 = vpop.f32.mrf.mxu3  ;;  %7582 = vrcp.f32 %v4120_v4 }
 0x51f   : > { %v3975_v56 = vpack.c.bf16 %v3967_v23, %v3967_v23  ;;  %7584 = vrcp.f32 %v4632_v39  ;;  %v6621_v3 = vld [vmem:[#allocation2 + $0x30] sm:$0xf0] }
 0x520   : > { %3984 = vst [vmem:[#allocation2 + $0x50] sm:$0xf] %v3976_v8  ;;  %v3974_v26 = vpack.c.bf16 %v3966_v1, %v3966_v1  ;;  %v7184_v14 = vld [vmem:[#allocation2 + $0x14] sm:$0xf] }
 0x521   : > { %3983 = vst [vmem:[#allocation2 + $0x30] sm:$0xf] %v3975_v56  ;;  %v6701_v59 = vld [vmem:[#allocation2 + $0xe0] sm:$0xf0]  ;;  %v6624_v54 = vor.u32 %v7184_v14, %v6621_v3 }
 0x522   : > { %3982 = vst [vmem:[#allocation2 + $0x10] sm:$0xf] %v3974_v26  ;;  %v6704_v53 = vor.u32 %v7206_v29, %v6701_v59  ;;  %v7581_v13 = vpop.eup %7580 }
 0x523   : > { %v4378_v44 = vpop.xlane.xlu0 %4377  ;;  %v4207_v9 = vmul.f32 %v7581_v13, %v9239_v22 }
 0x524   : > { %5504 = vmatmul.bf16.gmra.mxu1 %v6704_v53  ;;  %v4380_v33 = vpop.xlane.xlu1 %4379  ;;  %v7583_v50 = vpop.eup %7582  ;;  %7586 = vrcp.f32 %v4378_v44 }
 0x525   : > { %v3868_v11 = vpop.xlane.xlu2 %3867  ;;  %v7585_v32 = vpop.eup %7584  ;;  %v4206_v12 = vmul.f32 %v7583_v50, %v9232_v7  ;;  %v4215_v36 = vpack.c.bf16 %v4207_v9, %v4207_v9 }
 0x526   : > { %v4692_v10 = vpop.f32.mrf.mxu3  ;;  %7588 = vrcp.f32 %v3868_v11  ;;  %v4454_v60 = vpop.f32.mrf.mxu1 }
 0x527   : > { %v4720_v58 = vmul.f32 %v7585_v32, %v4692_v10  ;;  %v4214_v42 = vpack.c.bf16 %v4206_v12, %v4206_v12  ;;  %4223 = vst [vmem:[#allocation2 + $0x74] sm:$0xf] %v4215_v36  ;;  %7590 = vrcp.f32 %v4380_v33  ;;  %v6651_v4 = vld [vmem:[#allocation2 + $0x50] sm:$0xf] }
 0x528   : > { %v7188_v51 = vld [vmem:[#allocation2 + $0x2c] sm:$0xf0] }
 0x529   : > { %v4728_v17 = vpack.c.bf16 %v4720_v58, %v4720_v58  ;;  %v6619_v21 = vld [vmem:[#allocation2 + $0x10] sm:$0xf]  ;;  %4222 = vst [vmem:[#allocation2 + $0x54] sm:$0xf] %v4214_v42 }
 0x52a   : > { %v6620_v31 = vor.u32 %v7188_v51, %v6619_v21  ;;  %v7587_v22 = vpop.eup %7586 }
 0x52b   : > { %4736 = vst [vmem:[#allocation2 + $0x1c] sm:$0xf] %v4728_v17  ;;  %v4636_v43 = vpop.xlane.xlu0 %4635  ;;  %v4482_v48 = vmul.f32 %v7587_v22, %v4454_v60 }
 0x52c   : > { %5576 = vmatmul.bf16.vlgmr.msrb.gmra.mxu0 %v6620_v31  ;;  %v3872_v45 = vpop.xlane.xlu1 %3871  ;;  %v7589_v7 = vpop.eup %7588 }
 0x52d   : > { %7592 = vrcp.f32 %v3872_v45  ;;  %v4634_v57 = vpop.xlane.xlu2 %4633  ;;  %v3969_v49 = vmul.f32 %v7589_v7, %v9234_v41  ;;  %v7591_v5 = vpop.eup %7590  ;;  %v4490_v63 = vpack.c.bf16 %v4482_v48, %v4482_v48 }
 0x52e   : > { %v4694_v30 = vpop.f32.mrf.mxu3  ;;  %7594 = vrcp.f32 %v4634_v57  ;;  %v4456_v20 = vpop.f32.mrf.mxu1  ;;  %v6653_v12 = vld [vmem:[#allocation2 + $0x70] sm:$0xf0] }
 0x52f   : > { %v3977_v16 = vpack.c.bf16 %v3969_v49, %v3969_v49  ;;  %v4483_v47 = vmul.f32 %v7591_v5, %v4456_v20  ;;  %4498 = vst [vmem:[#allocation2 + $0x18] sm:$0xf] %v4490_v63  ;;  %7596 = vrcp.f32 %v4636_v43 }
 0x530   : > { %v7192_v32 = vld [vmem:[#allocation2 + $0x54] sm:$0xf] }
 0x531   : > { %3985 = vst [vmem:[#allocation2 + $0x70] sm:$0xf] %v3977_v16  ;;  %v4491_v15 = vpack.c.bf16 %v4483_v47, %v4483_v47  ;;  %v6656_v21 = vor.u32 %v7192_v32, %v6653_v12 }
 0x532   : > { %v7185_v60 = vld [vmem:[#allocation2 + $0x1c] sm:$0xf] }
 0x533   : > { %v7593_v0 = vpop.eup %7592  ;;  %4499 = vst [vmem:[#allocation2 + $0x38] sm:$0xf] %v4491_v15  ;;  %v4384_v41 = vpop.xlane.xlu0 %4383 }
 0x534   : > { %v3971_v19 = vmul.f32 %v7593_v0, %v9248_v2  ;;  %5605 = vmatmul.bf16.vlgmr.msrb.gmra.mxu1 %v6624_v54  ;;  %v4638_v35 = vpop.xlane.xlu1 %4637  ;;  %v7595_v24 = vpop.eup %7594 }
 0x535   : > { %v4382_v61 = vpop.xlane.xlu2 %4381  ;;  %v4721_v40 = vmul.f32 %v7595_v24, %v4694_v30  ;;  %v7597_v62 = vpop.eup %7596 }
 0x536   : > { %v3979_v27 = vpack.c.bf16 %v3971_v19, %v3971_v19  ;;  %7598 = vrcp.f32 %v4382_v61  ;;  %v4697_v39 = vpop.f32.mrf.mxu3  ;;  %v4459_v52 = vpop.f32.mrf.mxu1  ;;  %v6627_v56 = vld [vmem:[#allocation2 + $0x18] sm:$0xf] }
 0x537   : > { %v4729_v25 = vpack.c.bf16 %v4721_v40, %v4721_v40  ;;  %7600 = vrcp.f32 %v4384_v41  ;;  %v4722_v23 = vmul.f32 %v7597_v62, %v4697_v39 }
 0x538   : > { %3987 = vst [vmem:[#allocation2 + $0xb0] sm:$0xf] %v3979_v27  ;;  %7602 = vrcp.f32 %v4638_v35  ;;  %v7196_v8 = vld [vmem:[#allocation2 + $0x6c] sm:$0xf0] }
 0x539   : > { %4737 = vst [vmem:[#allocation2 + $0x3c] sm:$0xf] %v4729_v25  ;;  %v4730_v2 = vpack.c.bf16 %v4722_v23, %v4722_v23  ;;  %v6652_v1 = vor.u32 %v7196_v8, %v6651_v4 }
 0x53a   : > { %v7189_v6 = vld [vmem:[#allocation2 + $0x34] sm:$0xf0] }
 0x53b   : > { %4738 = vst [vmem:[#allocation2 + $0x5c] sm:$0xf] %v4730_v2  ;;  %v3870_v26 = vpop.xlane.xlu0 %3869  ;;  %v6628_v59 = vor.u32 %v7189_v6, %v6627_v56 }
 0x53c   : > { %5581 = vmatmul.bf16.gmra.mxu0 %v6652_v1  ;;  %v4124_v29 = vpop.xlane.xlu1 %4123  ;;  %v7599_v53 = vpop.eup %7598  ;;  %7604 = vrcp.f32 %v3870_v26 }
 0x53d   : > { %v4640_v13 = vpop.xlane.xlu2 %4639  ;;  %v7601_v33 = vpop.eup %7600  ;;  %v4484_v44 = vmul.f32 %v7599_v53, %v4459_v52  ;;  %7606 = vrcp.f32 %v4124_v29  ;;  %5634 = vmatmul.bf16.vlgmr.msrb.gmra.mxu2 %v6628_v59 }
 0x53e   : > { %v7603_v50 = vpop.eup %7602  ;;  %v4699_v9 = vpop.f32.mrf.mxu3  ;;  %7608 = vrcp.f32 %v4640_v13 }
 0x53f   : > { %v4461_v11 = vpop.f32.mrf.mxu1  ;;  %v4492_v10 = vpack.c.bf16 %v4484_v44, %v4484_v44  ;;  %v4723_v36 = vmul.f32 %v7603_v50, %v4699_v9  ;;  %v7204_v40 = vld [vmem:[#allocation2 + $0xac] sm:$0xf0] }
 0x540   : > { %v4485_v58 = vmul.f32 %v7601_v33, %v4461_v11  ;;  %v6629_v42 = vld [vmem:[#allocation2 + $0x38] sm:$0xf0] }
 0x541   : > { %4500 = vst [vmem:[#allocation2 + $0x58] sm:$0xf] %v4492_v10  ;;  %v4731_v51 = vpack.c.bf16 %v4723_v36, %v4723_v36  ;;  %v6632_v31 = vor.u32 %v7185_v60, %v6629_v42 }
 0x542   : > { %v4493_v17 = vpack.c.bf16 %v4485_v58, %v4485_v58  ;;  %v7605_v22 = vpop.eup %7604  ;;  %v7193_v8 = vld [vmem:[#allocation2 + $0x5c] sm:$0xf] }
 0x543   : > { %v7607_v45 = vpop.eup %7606  ;;  %v3970_v43 = vmul.f32 %v7605_v22, %v9241_v38  ;;  %4739 = vst [vmem:[#allocation2 + $0x7c] sm:$0xf] %v4731_v51  ;;  %5663 = vmatmul.bf16.vlgmr.msrb.gmra.mxu3 %v6632_v31  ;;  %v4642_v7 = vpop.xlane.xlu0 %4641 }
 0x544   : > { %5610 = vmatmul.bf16.gmra.mxu1 %v6656_v21  ;;  %v4386_v48 = vpop.xlane.xlu1 %4385  ;;  %v4208_v57 = vmul.f32 %v7607_v45, %v9246_v37  ;;  %4501 = vst [vmem:[#allocation2 + $0x78] sm:$0xf] %v4493_v17  ;;  %v7609_v5 = vpop.eup %7608 }
 0x545   : > { %v4388_v49 = vpop.xlane.xlu2 %4387  ;;  %v3978_v30 = vpack.c.bf16 %v3970_v43, %v3970_v43  ;;  %7610 = vrcp.f32 %v4386_v48 }
 0x546   : > { %v4216_v63 = vpack.c.bf16 %v4208_v57, %v4208_v57  ;;  %v4702_v20 = vpop.f32.mrf.mxu3  ;;  %7612 = vrcp.f32 %v4642_v7 }
 0x547   : > { %3986 = vst [vmem:[#allocation2 + $0x90] sm:$0xf] %v3978_v30  ;;  %v4724_v14 = vmul.f32 %v7609_v5, %v4702_v20  ;;  %7614 = vrcp.f32 %v4388_v49 }
 0x548   : > { %v4464_v3 = vpop.f32.mrf.mxu1  ;;  %4224 = vst [vmem:[#allocation2 + $0x94] sm:$0xf] %v4216_v63  ;;  %v6659_v54 = vld [vmem:[#allocation2 + $0x58] sm:$0xf] }
 0x549   : > { %v4732_v38 = vpack.c.bf16 %v4724_v14, %v4724_v14 }
 0x54a   : > { %v6661_v62 = vld [vmem:[#allocation2 + $0x78] sm:$0xf0] }
 0x54b   : > { %v7611_v16 = vpop.eup %7610  ;;  %4740 = vst [vmem:[#allocation2 + $0x9c] sm:$0xf] %v4732_v38  ;;  %v3876_v47 = vpop.xlane.xlu0 %3875  ;;  %v7197_v37 = vld [vmem:[#allocation2 + $0x74] sm:$0xf0]  ;;  %v6664_v1 = vor.u32 %v7193_v8, %v6661_v62 }
 0x54c   : > { %v4644_v15 = vpop.xlane.xlu1 %4643  ;;  %v4486_v0 = vmul.f32 %v7611_v16, %v4464_v3  ;;  %7616 = vrcp.f32 %v3876_v47  ;;  %v6660_v41 = vor.u32 %v7197_v37, %v6659_v54  ;;  %v7613_v35 = vpop.eup %7612 }
 0x54d   : > { %v4126_v19 = vpop.xlane.xlu2 %4125  ;;  %v7615_v39 = vpop.eup %7614 }
 0x54e   : > { %v4494_v24 = vpack.c.bf16 %v4486_v0, %v4486_v0  ;;  %7618 = vrcp.f32 %v4126_v19  ;;  %v4704_v61 = vpop.f32.mrf.mxu3  ;;  %5639 = vmatmul.bf16.gmra.mxu2 %v6660_v41  ;;  %v6683_v27 = vld [vmem:[#allocation2 + $0x90] sm:$0xf]  ;;  %v5461_v41 = vpop.f32.mrf.mxu0 }
 0x54f   : > { %v4725_v52 = vmul.f32 %v7613_v35, %v4704_v61  ;;  %v6684_v23 = vor.u32 %v7204_v40, %v6683_v27  ;;  %7620 = vrcp.f32 %v4644_v15  ;;  %v7200_v57 = vld [vmem:[#allocation2 + $0x94] sm:$0xf] }
 0x550   : > { %v4466_v25 = vpop.f32.mrf.mxu1  ;;  %4502 = vst [vmem:[#allocation2 + $0x98] sm:$0xf] %v4494_v24 }
 0x551   : > { %v4487_v4 = vmul.f32 %v7615_v39, %v4466_v25  ;;  %v4733_v2 = vpack.c.bf16 %v4725_v52, %v4725_v52  ;;  %5586 = vmatmul.bf16.gmra.mxu0 %v6684_v23 }
 0x552   : > { %v7617_v56 = vpop.eup %7616  ;;  %v7201_v5 = vld [vmem:[#allocation2 + $0x9c] sm:$0xf] }
 0x553   : > { %v4495_v6 = vpack.c.bf16 %v4487_v4, %v4487_v4  ;;  %v3973_v26 = vmul.f32 %v7617_v56, %v9267_v46  ;;  %4741 = vst [vmem:[#allocation2 + $0xbc] sm:$0xf] %v4733_v2  ;;  %5668 = vmatmul.bf16.gmra.mxu3 %v6664_v1  ;;  %v4390_v59 = vpop.xlane.xlu0 %4389  ;;  %v5519_v1 = vpop.f32.mrf.mxu2 }
 0x554   : > { %v4392_v29 = vpop.xlane.xlu1 %4391  ;;  %v7619_v53 = vpop.eup %7618  ;;  %7622 = vrcp.f32 %v4390_v59 }
 0x555   : > { %4503 = vst [vmem:[#allocation2 + $0xb8] sm:$0xf] %v4495_v6  ;;  %v3874_v13 = vpop.xlane.xlu2 %3873  ;;  %v3981_v33 = vpack.c.bf16 %v3973_v26, %v3973_v26  ;;  %v4209_v44 = vmul.f32 %v7619_v53, %v9253_v55  ;;  %v7621_v50 = vpop.eup %7620 }
 0x556   : > { %7624 = vrcp.f32 %v3874_v13  ;;  %v4707_v9 = vpop.f32.mrf.mxu3  ;;  %v5463_v8 = vpop.f32.mrf.mxu0 }
 0x557   : > { %3989 = vst [vmem:[#allocation2 + $0xf0] sm:$0xf] %v3981_v33  ;;  %v4217_v11 = vpack.c.bf16 %v4209_v44, %v4209_v44  ;;  %v4726_v32 = vmul.f32 %v7621_v50, %v4707_v9  ;;  %7626 = vrcp.f32 %v4392_v29  ;;  %v6691_v60 = vld [vmem:[#allocation2 + $0x98] sm:$0xf] }
 0x558   : > { %v4469_v12 = vpop.f32.mrf.mxu1 }
 0x559   : > { %4225 = vst [vmem:[#allocation2 + $0xb4] sm:$0xf] %v4217_v11  ;;  %v4734_v46 = vpack.c.bf16 %v4726_v32, %v4726_v32 }
 0x55a   : > { %v7623_v10 = vpop.eup %7622  ;;  %v6693_v45 = vld [vmem:[#allocation2 + $0xb8] sm:$0xf0] }
 0x55b   : > { %4742 = vst [vmem:[#allocation2 + $0xdc] sm:$0xf] %v4734_v46  ;;  %v4128_v58 = vpop.xlane.xlu0 %4127  ;;  %v4488_v17 = vmul.f32 %v7623_v10, %v4469_v12  ;;  %v6696_v20 = vor.u32 %v7201_v5, %v6693_v45  ;;  %v5521_v29 = vpop.f32.mrf.mxu2 }
 0x55c   : > { %v4130_v36 = vpop.xlane.xlu1 %4129  ;;  %v7205_v42 = vld [vmem:[#allocation2 + $0xb4] sm:$0xf0]  ;;  %v7625_v51 = vpop.eup %7624 }
 0x55d   : > { %7628 = vrcp.f32 %v4130_v36  ;;  %v4646_v55 = vpop.xlane.xlu2 %4645  ;;  %v6692_v21 = vor.u32 %v7205_v42, %v6691_v60  ;;  %v3972_v31 = vmul.f32 %v7625_v51, %v9257_v28  ;;  %v4496_v22 = vpack.c.bf16 %v4488_v17, %v4488_v17  ;;  %v7627_v43 = vpop.eup %7626 }
 0x55e   : > { %7630 = vrcp.f32 %v4128_v58  ;;  %v4709_v15 = vpop.f32.mrf.mxu3  ;;  %v7212_v24 = vld [vmem:[#allocation2 + $0xec] sm:$0xf0] }
 0x55f   : > { %7632 = vrcp.f32 %v4646_v55  ;;  %5644 = vmatmul.bf16.gmra.mxu2 %v6692_v21  ;;  %v3980_v7 = vpack.c.bf16 %v3972_v31, %v3972_v31  ;;  %4504 = vst [vmem:[#allocation2 + $0xd8] sm:$0xf] %v4496_v22  ;;  %v9311_v31 = vld [vmem:[%s9405_s5] ss:$0 sm:$0xff] }
 0x560   : > { %v4471_v48 = vpop.f32.mrf.mxu1  ;;  %v6685_v30 = vld [vmem:[#allocation2 + $0xb0] sm:$0xf0]  ;;  %v5464_v5 = vadd.f32 %v9311_v31, %v5463_v8 }
 0x561   : > { %v4489_v49 = vmul.f32 %v7627_v43, %v4471_v48  ;;  %3988 = vst [vmem:[#allocation2 + $0xd0] sm:$0xf] %v3980_v7  ;;  %v6688_v63 = vor.u32 %v7200_v57, %v6685_v30  ;;  %v5462_v43 = vadd.f32 %v9311_v31, %v5461_v41 }
 0x562   : > { %v7209_v25 = vld [vmem:[#allocation2 + $0xdc] sm:$0xf] }
 0x563   : > { %v7629_v14 = vpop.eup %7628  ;;  %v4497_v3 = vpack.c.bf16 %v4489_v49, %v4489_v49  ;;  %5615 = vmatmul.bf16.gmra.mxu1 %v6688_v63  ;;  %5673 = vmatmul.bf16.gmra.mxu3 %v6696_v20 }
 0x564   : > { %v7631_v38 = vpop.eup %7630  ;;  %v4211_v28 = vmul.f32 %v7629_v14, %v9265_v18 }
 0x565   : > { %v7633_v16 = vpop.eup %7632  ;;  %v4210_v47 = vmul.f32 %v7631_v38, %v9260_v34  ;;  %4505 = vst [vmem:[#allocation2 + $0xf8] sm:$0xf] %v4497_v3  ;;  %v5524_v33 = vpop.f32.mrf.mxu2 }
 0x566   : > { %v4219_v54 = vpack.c.bf16 %v4211_v28, %v4211_v28  ;;  %v4727_v37 = vmul.f32 %v7633_v16, %v4709_v15  ;;  %v6723_v18 = vld [vmem:[#allocation2 + $0xd8] sm:$0xf]  ;;  %v5548_v56 = vpop.f32.mrf.mxu3 }
 0x567   : > { %v4218_v0 = vpack.c.bf16 %v4210_v47, %v4210_v47 }
 0x568   : > { %4227 = vst [vmem:[#allocation2 + $0xf4] sm:$0xf] %v4219_v54  ;;  %v4735_v19 = vpack.c.bf16 %v4727_v37, %v4727_v37  ;;  %v6715_v35 = vld [vmem:[#allocation2 + $0xd0] sm:$0xf]  ;;  %v5490_v40 = vpop.f32.mrf.mxu1 }
 0x569   : > { %4226 = vst [vmem:[#allocation2 + $0xd4] sm:$0xf] %v4218_v0  ;;  %v6716_v61 = vor.u32 %v7212_v24, %v6715_v35  ;;  %v5466_v6 = vpop.f32.mrf.mxu0  ;;  %v5491_v7 = vadd.f32 %v5490_v40, %v5462_v43 }
 0x56a   : > { %4743 = vst [vmem:[#allocation2 + $0xfc] sm:$0xf] %v4735_v19  ;;  %v5467_v15 = vadd.f32 %v9311_v31, %v5466_v6 }
 0x56b   : > { %5591 = vmatmul.bf16.gmra.mxu0 %v6716_v61  ;;  %v5520_v49 = vadd.f32 %v5519_v1, %v5491_v7  ;;  %v7634_v61 = vld [vmem:[%s8019_s3] sm:$0xff] }
 0x56c   : > { %v7213_v27 = vld [vmem:[#allocation2 + $0xf4] sm:$0xf0] }
 0x56d   : > { %v6724_v62 = vor.u32 %v7213_v27, %v6723_v18  ;;  %v5526_v11 = vpop.f32.mrf.mxu2  ;;  %v5549_v14 = vadd.f32 %v5548_v56, %v5520_v49  ;;  %v7635_v56 = vld [vmem:[%s8019_s3 + $0x8] sm:$0xff] }
 0x56e   : > { %v5550_v59 = vpop.f32.mrf.mxu3 }
 0x56f   : > { %5649 = vmatmul.bf16.gmra.mxu2 %v6724_v62  ;;  %v6717_v34 = vld [vmem:[#allocation2 + $0xf0] sm:$0xf0] }
 0x570   : > { %v7208_v39 = vld [vmem:[#allocation2 + $0xd4] sm:$0xf]  ;;  %v5492_v2 = vpop.f32.mrf.mxu1 }
 0x571   : > { %v6720_v52 = vor.u32 %v7208_v39, %v6717_v34  ;;  %v6725_v23 = vld [vmem:[#allocation2 + $0xf8] sm:$0xf0]  ;;  %v5468_v53 = vpop.f32.mrf.mxu0  ;;  %v5493_v20 = vadd.f32 %v5492_v2, %v5464_v5  ;;  %v7636_v5 = vld [vmem:[%s8019_s3 + $0x10] sm:$0xff] }
 0x572   : > { %v6728_v4 = vor.u32 %v7209_v25, %v6725_v23  ;;  %v5469_v34 = vadd.f32 %v9311_v31, %v5468_v53 }
 0x573   : > { %5620 = vmatmul.bf16.gmra.mxu1 %v6720_v52  ;;  %v5522_v28 = vadd.f32 %v5521_v29, %v5493_v20 }
 0x574   : > { %5678 = vmatmul.bf16.gmra.mxu3 %v6728_v4 }
 0x575   : > { %v5551_v41 = vadd.f32 %v5550_v59, %v5522_v28 }
 0x577   : > { %v5553_v50 = vpop.f32.mrf.mxu3 }
 0x578   : > { %v5495_v26 = vpop.f32.mrf.mxu1 }
 0x579   : > { %v5496_v19 = vadd.f32 %v5495_v26, %v5467_v15  ;;  %v7637_v15 = vld [vmem:[%s8019_s3 + $0x18] sm:$0xff] }
 0x57b   : > { %v5525_v40 = vadd.f32 %v5524_v33, %v5496_v19 }
 0x57d   : > { %v5554_v4 = vadd.f32 %v5553_v50, %v5525_v40 }
 0x57f   : > { %v9286_v12 = vpop.f32.mrf.mxu3  ;;  %v9288_v46 = vpop.f32.mrf.mxu2 }
 0x580   : > { %v5497_v13 = vpop.f32.mrf.mxu1 }
 0x581   : > { %v9280_v44 = vpop.f32.mrf.mxu0  ;;  %v5498_v23 = vadd.f32 %v5497_v13, %v5469_v34 }
 0x582   : > { %v5472_v29 = vadd.f32 %v9311_v31, %v9280_v44 }
 0x583   : > { %v5527_v59 = vadd.f32 %v5526_v11, %v5498_v23 }
 0x585   : > { %v5556_v13 = vadd.f32 %v9286_v12, %v5527_v59 }
 0x587   : > { %v9294_v58 = vpop.f32.mrf.mxu3  ;;  %v9298_v42 = vpop.f32.mrf.mxu2 }
 0x589   : > { %v9282_v9 = vpop.f32.mrf.mxu1  ;;  %v9284_v32 = vpop.f32.mrf.mxu0 }
 0x58a   : > { %v5501_v53 = vadd.f32 %v9282_v9, %v5472_v29  ;;  %v5474_v11 = vadd.f32 %v9311_v31, %v9284_v32 }
 0x58c   : > { %v5530_v49 = vadd.f32 %v9288_v46, %v5501_v53 }
 0x58e   : > { %v5559_v12 = vadd.f32 %v9294_v58, %v5530_v49 }
 0x58f   : > { %v9302_v17 = vpop.f32.mrf.mxu3 }
 0x591   : > { %v9290_v10 = vpop.f32.mrf.mxu1  ;;  %v9292_v36 = vpop.f32.mrf.mxu0 }
 0x592   : > { %v5503_v9 = vadd.f32 %v9290_v10, %v5474_v11  ;;  %v5477_v19 = vadd.f32 %v9311_v31, %v9292_v36 }
 0x597   : > { %v9304_v55 = vpop.f32.mrf.mxu2 }
 0x599   : > { %v9300_v51 = vpop.f32.mrf.mxu0 }
 0x59f   : > { %v9313_v45 = vpop.f32.mrf.mxu3  ;;  %v9316_v48 = vpop.f32.mrf.mxu2 }
 0x5a1   : > { %v9296_v60 = vpop.f32.mrf.mxu1 }
 0x5a2   : > { %v5506_v10 = vadd.f32 %v9296_v60, %v5477_v19 }
 0x5a7   : > { %v9319_v63 = vpop.f32.mrf.mxu3 }
 0x5a9   : > { %v9306_v21 = vpop.f32.mrf.mxu1  ;;  %v5577_v22 = vpop.f32.mrf.mxu0 }
 0x5aa   : > { %v5578_v3 = vadd.f32 %v5577_v22, %v5549_v14 }
 0x5b1   : > { %v5606_v57 = vpop.f32.mrf.mxu1  ;;  %v5579_v30 = vpop.f32.mrf.mxu0 }
 0x5b2   : > { %v5607_v16 = vadd.f32 %v5606_v57, %v5578_v3  ;;  %v5580_v24 = vadd.f32 %v5579_v30, %v5551_v41 }
 0x5b9   : > { %v5608_v47 = vpop.f32.mrf.mxu1  ;;  %v5582_v37 = vpop.f32.mrf.mxu0 }
 0x5ba   : > { %v5609_v62 = vadd.f32 %v5608_v47, %v5580_v24  ;;  %v5583_v1 = vadd.f32 %v5582_v37, %v5554_v4  ;;  %v5532_v47 = vadd.f32 %v9298_v42, %v5503_v9 }
 0x5bc   : > { %v5561_v58 = vadd.f32 %v9302_v17, %v5532_v47 }
 0x5c0   : > { %v5635_v38 = vpop.f32.mrf.mxu2 }
 0x5c1   : > { %v5636_v54 = vadd.f32 %v5635_v38, %v5607_v16  ;;  %v5611_v52 = vpop.f32.mrf.mxu1  ;;  %v5584_v2 = vpop.f32.mrf.mxu0 }
 0x5c2   : > { %v5612_v33 = vadd.f32 %v5611_v52, %v5583_v1  ;;  %v5585_v30 = vadd.f32 %v5584_v2, %v5556_v13  ;;  %v7639_v2 = vld [vmem:[%s8019_s3 + $0x28] sm:$0xff] }
 0x5c6   : > { %v5664_v0 = vpop.f32.mrf.mxu3 }
 0x5c7   : > { %v5665_v35 = vadd.f32 %v5664_v0, %v5636_v54 }
 0x5c8   : > { %v5637_v27 = vpop.f32.mrf.mxu2 }
 0x5c9   : > { %v5684_v18 = vadd.f32 %v7634_v61, %v5665_v35  ;;  %v5638_v39 = vadd.f32 %v5637_v27, %v5609_v62  ;;  %v5613_v7 = vpop.f32.mrf.mxu1  ;;  %v7638_v27 = vld [vmem:[%s8019_s3 + $0x20] sm:$0xff] }
 0x5ca   : > { %v5614_v14 = vadd.f32 %v5613_v7, %v5585_v30 }
 0x5cb   : > { %5692 = vst [vmem:[%s9326_s20] sm:$0xff] %v5684_v18  ;;  %v5535_v18 = vadd.f32 %v9304_v55, %v5506_v10 }
 0x5cd   : > { %v5564_v17 = vadd.f32 %v9313_v45, %v5535_v18 }
 0x5ce   : > { %v5666_v25 = vpop.f32.mrf.mxu3  ;;  %v5587_v57 = vpop.f32.mrf.mxu0 }
 0x5cf   : > { %v5667_v8 = vadd.f32 %v5666_v25, %v5638_v39  ;;  %v5588_v28 = vadd.f32 %v5587_v57, %v5559_v12  ;;  %v5479_v39 = vadd.f32 %v9311_v31, %v9300_v51 }
 0x5d1   : > { %v5685_v6 = vadd.f32 %v7635_v56, %v5667_v8  ;;  %v5640_v26 = vpop.f32.mrf.mxu2  ;;  %v5508_v60 = vadd.f32 %v9306_v21, %v5479_v39 }
 0x5d2   : > { %v5641_v22 = vadd.f32 %v5640_v26, %v5612_v33  ;;  %v7640_v33 = vld [vmem:[%s8019_s3 + $0x30] sm:$0xff] }
 0x5d3   : > { %5693 = vst [vmem:[%s9326_s20 + $0x8] sm:$0xff] %v5685_v6  ;;  %v5537_v8 = vadd.f32 %v9316_v48, %v5508_v60 }
 0x5d5   : > { %v5566_v21 = vadd.f32 %v9319_v63, %v5537_v8 }
 0x5d6   : > { %v5669_v43 = vpop.f32.mrf.mxu3  ;;  %v5589_v32 = vpop.f32.mrf.mxu0 }
 0x5d7   : > { %v5670_v50 = vadd.f32 %v5669_v43, %v5641_v22  ;;  %v5590_v24 = vadd.f32 %v5589_v32, %v5561_v58 }
 0x5d9   : > { %v5686_v20 = vadd.f32 %v7636_v5, %v5670_v50  ;;  %v5642_v44 = vpop.f32.mrf.mxu2  ;;  %v7641_v50 = vld [vmem:[%s8019_s3 + $0x38] sm:$0xff] }
 0x5da   : > { %v5643_v3 = vadd.f32 %v5642_v44, %v5614_v14 }
 0x5db   : > { %5694 = vst [vmem:[%s9326_s20 + $0x10] sm:$0xff] %v5686_v20 }
 0x5de   : > { %v5671_v38 = vpop.f32.mrf.mxu3 }
 0x5df   : > { %v5672_v16 = vadd.f32 %v5671_v38, %v5643_v3 }
 0x5e0   : > { %v5616_v46 = vpop.f32.mrf.mxu1 }
 0x5e1   : > { %v5687_v54 = vadd.f32 %v7637_v15, %v5672_v16  ;;  %v5617_v37 = vadd.f32 %v5616_v46, %v5588_v28 }
 0x5e2   : > { %v5645_v0 = vpop.f32.mrf.mxu2 }
 0x5e3   : > { %5695 = vst [vmem:[%s9326_s20 + $0x18] sm:$0xff] %v5687_v54  ;;  %v5646_v41 = vadd.f32 %v5645_v0, %v5617_v37 }
 0x5e6   : > { %v5674_v35 = vpop.f32.mrf.mxu3 }
 0x5e7   : > { %v5675_v61 = vadd.f32 %v5674_v35, %v5646_v41 }
 0x5e8   : > { %v5618_v42 = vpop.f32.mrf.mxu1  ;;  %v5592_v36 = vpop.f32.mrf.mxu0 }
 0x5e9   : > { %v5688_v40 = vadd.f32 %v7638_v27, %v5675_v61  ;;  %v5619_v62 = vadd.f32 %v5618_v42, %v5590_v24  ;;  %v5593_v23 = vadd.f32 %v5592_v36, %v5564_v17 }
 0x5ea   : > { %v5647_v34 = vpop.f32.mrf.mxu2 }
 0x5eb   : > { %5696 = vst [vmem:[%s9326_s20 + $0x20] sm:$0xff] %v5688_v40  ;;  %v5648_v52 = vadd.f32 %v5647_v34, %v5619_v62 }
 0x5ee   : > { %v5676_v25 = vpop.f32.mrf.mxu3 }
 0x5ef   : > { %v5677_v55 = vadd.f32 %v5676_v25, %v5648_v52 }
 0x5f0   : > { %v5621_v4 = vpop.f32.mrf.mxu1  ;;  %v5594_v31 = vpop.f32.mrf.mxu0 }
 0x5f1   : > { %v5689_v1 = vadd.f32 %v7639_v2, %v5677_v55  ;;  %v5622_v56 = vadd.f32 %v5621_v4, %v5593_v23  ;;  %v5595_v26 = vadd.f32 %v5594_v31, %v5566_v21 }
 0x5f2   : > { %v5650_v51 = vpop.f32.mrf.mxu2 }
 0x5f3   : > { %5697 = vst [vmem:[%s9326_s20 + $0x28] sm:$0xff] %v5689_v1  ;;  %v5651_v45 = vadd.f32 %v5650_v51, %v5622_v56 }
 0x5f7   : > { %v5679_v6 = vpop.f32.mrf.mxu3 }
 0x5f8   : > { %v5680_v29 = vadd.f32 %v5679_v6, %v5651_v45  ;;  %v5623_v59 = vpop.f32.mrf.mxu1 }
 0x5f9   : > { %v5624_v53 = vadd.f32 %v5623_v59, %v5595_v26 }
 0x5fa   : > { %v5690_v48 = vadd.f32 %v7640_v33, %v5680_v29  ;;  %v5652_v22 = vpop.f32.mrf.mxu2 }
 0x5fb   : > { %v5653_v63 = vadd.f32 %v5652_v22, %v5624_v53 }
 0x5fc   : > { %5698 = vst [vmem:[%s9326_s20 + $0x30] sm:$0xff] %v5690_v48 }
 0x5ff   : > { %v5681_v43 = vpop.f32.mrf.mxu3 }
 0x600   : > { %v5682_v13 = vadd.f32 %v5681_v43, %v5653_v63 }
 0x602   : > { %v5691_v7 = vadd.f32 %v7641_v50, %v5682_v13 }
 0x604   : > { %5699 = vst [vmem:[%s9326_s20 + $0x38] sm:$0xff] %v5691_v7 }
 0x605   : > { %7819 = shalt.err (!%p7816_p7)
}
 0x606   : > { %s7879_s0 = smov 128   ;;  %s7880_s3 = smov 8  }
 0x607   : > { %7299 = dma.vmem_to_hbm [thread:$0]  (%p7954_p5), %s5714_s12, 1024, %s5716_s14, %s5701_s26, %s7879_s0, %s7879_s0, %s7880_s3  }
 0x608 PF: > { %p7331_p8 = scmp.ge.s32.totalorder %s7866_s24, 2  ;;  %s5730_s30 = sand.u32 1, %s7854_s21  }
 0x609   : > { %s5731_s9 = scalar_lea.sflag [#allocation5], %s5730_s30 }
 0x60a   : > { %p7318_p9 = pnand %p7331_p8, %p7958_p6 }
 0x60c   : > { %p7319_p10 = pneg %p7318_p9 }
 0x60e   : > { %7849 = dma.done.wait (%p7319_p10), %s5731_s9, 1024  }
 0x60f   : > { %7851 = vsyncadd (%p7319_p10), %s5731_s9, 4294966272  ;;  %s9577_s15 = sld [smem:[#allocation17_spill]]  ;;  %p19_p11 = scmp.ge.s32.totalorder %s7941_s27, 4  }
 0x610   : > { %s9578_s21 = smov %s7858_s22  ;;  %s9579_s22 = smov %s7862_s23 }
 0x611   : > { %s9581_s24 = smov %s7941_s27  ;;  %21 = sbr.rel (!%p19_p11) target bundleno = 10 (0xa), region = 98 }
 0x615   : > { %s9580_s23 = smov %s9577_s15 }
 0x616   :  { %5737 = vsyncpa [#allocation4], 1 }
 0x617   :  { %5739 = vsyncpa [#allocation4 + $0x1], 1 }
 0x618   :  { %5740 = vsyncpa [#allocation7], 1 }
 0x619   :  { %5741 = vsyncpa [#allocation10], 1 }
 0x61a   :  { %5742 = vsyncpa [#allocation5], 1 }
 0x61b   :  { %5744 = vsyncpa [#allocation5 + $0x1], 1 }

</bundles_post_ra>
